<compile_context>
chip_gen: v7x
topology: tpu7x:2x2x1
jax: 0.10.0
libtpu: 0.0.40
codegen_flags: <defaults>
</compile_context>

<pallas_src>
import jax
import jax.numpy as jnp
from jax.experimental import pallas as pl
from jax.experimental.pallas import tpu as pltpu

# ----------------------------- config (small, consistent with the module) ----
B, T, C = 2, 16, 32          # batch, time, encoder_embed_dim
HEADS = 4                    # encoder_attention_heads
HEAD_DIM = C // HEADS
FFN = 64                     # encoder_ffn_embed_dim
N_LAYERS = 2                 # encoder_layers
CONV_K = 8                   # args.conv_pos (kernel size); padding=K//2, SamePad trims 1
CONV_PAD = CONV_K // 2
CONV_GROUPS = 4              # args.conv_pos_groups
ASTP_BOTTLENECK = 256        # hard-coded in TransformerEncoder.__init__
INTER_LOSS_LAYERS = [0]      # args.encoder_inter_loss_layer = "0"
EPS = 1e-5
MM_DTYPE = jnp.bfloat16      # matmul operand dtype (f32 accumulation via preferred_element_type)

# ----------------------------- packed-weight layout ---------------------------
# w_in (C, W_IN_COLS): [pos-conv taps | per-layer (wqkv|wo|w1) | aw1 | awm | aws]
PCW_OFF = 0
PCW_W = CONV_K * C                          # 256
LAYER_OFF = PCW_OFF + PCW_W                 # 256
LAYER_W = 3 * C + C + FFN                   # 192
AW1_OFF = LAYER_OFF + N_LAYERS * LAYER_W    # 640
AWM_OFF = AW1_OFF + ASTP_BOTTLENECK         # 896
AWS_OFF = AWM_OFF + C                       # 928
W_IN_COLS = AWS_OFF + C                     # 960

# vrows (N_VROWS, C) row indices: all (C,)-wide biases / LayerNorm params
VR_PCB = 0
VR_LN_G, VR_LN_B = 1, 2
VR_LAYER0 = 3                               # 6 rows/layer: bo, ln1_g, ln1_b, b2, ln2_g, ln2_b
VR_ASTP = VR_LAYER0 + 6 * N_LAYERS          # 15: abo, astp_ln_g, astp_ln_b
N_VROWS = VR_ASTP + 3                       # 18


# ----------------------------- in-kernel helpers ------------------------------
def _ln(x2, g, b):
    # LayerNorm over the last (channel) axis; g, b are (1, C).
    mu = jnp.mean(x2, axis=-1, keepdims=True)
    xc = x2 - mu
    var = jnp.mean(xc * xc, axis=-1, keepdims=True)
    return xc * jax.lax.rsqrt(var + EPS) * g + b


_ERF_P = 0.3275911
_ERF_A = (0.254829592, -0.284496736, 1.421413741, -1.453152027, 1.061405429)


def _erf_poly(z):
    # Abramowitz & Stegun 7.1.26, |err| < 1.5e-7 -> exact-erf GELU to f32 accuracy.
    a1, a2, a3, a4, a5 = _ERF_A
    za = jnp.abs(z)
    t = 1.0 / (1.0 + _ERF_P * za)
    poly = ((((a5 * t + a4) * t + a3) * t + a2) * t + a1) * t
    e = 1.0 - poly * jnp.exp(-za * za)
    return jnp.where(z >= 0.0, e, -e)


def _gelu_erf(x):
    # nn.GELU() default: 0.5 * x * (1 + erf(x / sqrt(2)))
    # TODO(synk): switch to jax.lax.erf if/when Mosaic guarantees an erf lowering.
    return 0.5 * x * (1.0 + _erf_poly(x * 0.7071067811865476))


# ----------------------------- fused encoder kernel ---------------------------
def _encoder_kernel(x_ref, maskv_ref, kbias_ref, w_in_ref, w2s_ref, aw2_ref,
                    vrows_ref, vwide_ref, out_ref):
    f32 = jnp.float32

    def row(i):
        return vrows_ref[i:i + 1, :]                     # (1, C)

    mv = maskv_ref[...]                                  # (B*T, 1), 1.0 = valid frame
    x = x_ref[...] * mv                                  # index_put(x, padding_mask, 0)

    # ---- grouped positional conv: Conv1d(C,C,K,pad=K//2,groups=G) + SamePad + GELU ----
    # One lane-dense matmul against all K per-tap dense (C,C) weights at once,
    # then K zero-filled time shifts accumulated per batch element.
    z = jnp.dot(x.astype(MM_DTYPE), w_in_ref[:, PCW_OFF:PCW_OFF + PCW_W],
                preferred_element_type=f32)              # (B*T, K*C)
    conv_parts = []
    for b in range(B):
        zb = z[b * T:(b + 1) * T, :]                     # (T, K*C)
        acc = jnp.zeros((T, C), f32)
        for kk in range(CONV_K):
            s = kk - CONV_PAD                            # shift in [-K//2, K//2)
            zk = zb[:, kk * C:(kk + 1) * C]              # = x_b @ W_k  (T, C)
            if s == 0:
                shifted = zk
            elif s > 0:
                shifted = jnp.concatenate(
                    [zk[s:, :], jnp.zeros((s, C), f32)], axis=0)
            else:
                shifted = jnp.concatenate(
                    [jnp.zeros((-s, C), f32), zk[:T + s, :]], axis=0)
            acc = acc + shifted
        conv_parts.append(acc)
    conv = jnp.concatenate(conv_parts, axis=0) + row(VR_PCB)     # (B*T, C)
    x = x + _gelu_erf(conv)
    # layer_norm_first = False -> LayerNorm before the stack
    x = _ln(x, row(VR_LN_G), row(VR_LN_B))

    scale = HEAD_DIM ** -0.5
    spk_full = None
    lr0 = None
    for l in range(N_LAYERS):
        base = LAYER_OFF + l * LAYER_W
        wqkv = w_in_ref[:, base:base + 3 * C]
        wo = w_in_ref[:, base + 3 * C:base + 4 * C]
        w1 = w_in_ref[:, base + 4 * C:base + 4 * C + FFN]
        w2 = w2s_ref[:, l * C:(l + 1) * C]
        bqkv = vwide_ref[l:l + 1, 0:3 * C]               # (1, 3C)
        b1 = vwide_ref[l:l + 1, 3 * C:3 * C + FFN]       # (1, FFN)
        vb = VR_LAYER0 + 6 * l
        bo, ln1g, ln1b, b2, ln2g, ln2b = (row(vb + i) for i in range(6))

        # ---- self attention (post-norm layer) ----
        residual = x
        qkv = jnp.dot(x.astype(MM_DTYPE), wqkv,
                      preferred_element_type=f32) + bqkv          # (B*T, 3C)
        # head-batched q/k/v: (H, B*T, D)
        q = qkv[:, 0:C].reshape(B * T, HEADS, HEAD_DIM).transpose(1, 0, 2)
        k = qkv[:, C:2 * C].reshape(B * T, HEADS, HEAD_DIM).transpose(1, 0, 2)
        v = qkv[:, 2 * C:3 * C].reshape(B * T, HEADS, HEAD_DIM).transpose(1, 0, 2)
        attn_parts = []
        for b in range(B):
            qb = q[:, b * T:(b + 1) * T, :]              # (H, T, D)
            kb = k[:, b * T:(b + 1) * T, :]
            vv = v[:, b * T:(b + 1) * T, :]
            sc = jnp.einsum('htd,hsd->hts', qb, kb,
                            preferred_element_type=f32) * scale
            sc = sc + kbias_ref[b:b + 1, :]              # -1e30 on padded keys
            sc = sc - jnp.max(sc, axis=-1, keepdims=True)
            e = jnp.exp(sc)
            p = e / jnp.sum(e, axis=-1, keepdims=True)   # exact divide (parity w/ torch.softmax)
            attn_parts.append(jnp.einsum('hts,hsd->htd', p, vv,
                                         preferred_element_type=f32))
        o = jnp.concatenate(attn_parts, axis=1)          # (H, B*T, D)
        attn = o.transpose(1, 0, 2).reshape(B * T, C)    # head-concat layout
        attn = jnp.dot(attn.astype(MM_DTYPE), wo,
                       preferred_element_type=f32) + bo
        x = residual + attn
        x = _ln(x, ln1g, ln1b)

        # ---- FFN (ReLU) ----
        residual = x
        h = jnp.maximum(jnp.dot(x.astype(MM_DTYPE), w1,
                                preferred_element_type=f32) + b1, 0.0)
        h = jnp.dot(h.astype(MM_DTYPE), w2, preferred_element_type=f32) + b2
        x = residual + h
        x = _ln(x, ln2g, ln2b)

        # ---- intermediate-loss (ASTP speaker embedding) branch ----
        if l in INTER_LOSS_LAYERS:
            if l == INTER_LOSS_LAYERS[0]:
                aw1 = w_in_ref[:, AW1_OFF:AW1_OFF + ASTP_BOTTLENECK]
                awm = w_in_ref[:, AWM_OFF:AWM_OFF + C]
                aws = w_in_ref[:, AWS_OFF:AWS_OFF + C]
                abo, ag, ab = row(VR_ASTP), row(VR_ASTP + 1), row(VR_ASTP + 2)
                xa = x * mv                              # x = x * mask
                hb = jnp.tanh(jnp.dot(xa.astype(MM_DTYPE), aw1,
                                      preferred_element_type=f32))
                sc = jnp.dot(hb.astype(MM_DTYPE), aw2_ref[...],
                             preferred_element_type=f32)
                sc = sc * mv + (1.0 - mv) * (-1000.0)    # matches the module exactly
                spk_parts = []
                for b in range(B):
                    scb = sc[b * T:(b + 1) * T, :]
                    xab = xa[b * T:(b + 1) * T, :]
                    scb = scb - jnp.max(scb, axis=0, keepdims=True)   # softmax over TIME
                    ea = jnp.exp(scb)
                    alpha = ea / jnp.sum(ea, axis=0, keepdims=True)
                    # NOTE: intentionally *un-pooled* elementwise statistics, exactly
                    # as written in the reference ASTP (no sum over time before out).
                    mean = alpha * xab
                    var = alpha * xab * xab - mean * mean
                    std = jnp.sqrt(var + 1e-5)
                    yb = (jnp.dot(mean.astype(MM_DTYPE), awm, preferred_element_type=f32)
                          + jnp.dot(std.astype(MM_DTYPE), aws, preferred_element_type=f32)
                          + abo)
                    spk_parts.append(_ln(yb, ag, ab))
                spk_full = jnp.concatenate(spk_parts, axis=0)         # (B*T, C)
            x = x - spk_full                             # spk_emb.detach(): same fwd value

        if l == 0:
            lr0 = x                                      # layer_results[1]

    # merged output slab: [spk_emb, layer-0 out, final out]
    out_ref[0] = spk_full.astype(out_ref.dtype)
    out_ref[1] = lr0.astype(out_ref.dtype)
    out_ref[2] = x.astype(out_ref.dtype)


# ----------------------------- model glue ------------------------------------
def transformer_encoder_forward(x, padding_mask, params):
    Bx, Tx, Cx = x.shape
    assert (Bx, Tx, Cx) == (B, T, C)
    pad_f = padding_mask.astype(jnp.float32)                      # (B, T), 1.0 = padded
    maskv = (1.0 - pad_f).reshape(Bx * Tx, 1)                     # (B*T, 1), 1.0 = valid
    # key_padding_mask -> additive bias; -1e30 gives exactly-zero softmax weight
    kbias = jnp.where(padding_mask, jnp.float32(-1e30), jnp.float32(0.0))   # (B, T)

    vmem = pl.BlockSpec(memory_space=pltpu.MemorySpace.VMEM)
    out = pl.pallas_call(
        _encoder_kernel,
        out_shape=jax.ShapeDtypeStruct((3, Bx * Tx, Cx), jnp.float32),
        in_specs=[vmem] * 8,
        out_specs=vmem,
    )(x.reshape(Bx * Tx, Cx), maskv, kbias,
      params["w_in"], params["w2s"], params["aw2"],
      params["vrows"], params["vwide"])

    out = out.reshape(3, Bx, Tx, Cx)
    spk, lr0, xout = out[0], out[1], out[2]
    # layer_results = [spk_emb, x after layer0 (minus spk_emb), x after layer1]
    return xout, [spk, lr0, xout]


# ----------------------------- deterministic params --------------------------
def init_params(key):
    keys = iter(jax.random.split(key, 64))

    def nrm(shape, scale=0.05):
        return scale * jax.random.normal(next(keys), shape, jnp.float32)

    # grouped pos-conv: torch weight (C_out, C_in/G, K) -> per-tap dense (C_in, C_out)
    cpg = C // CONV_GROUPS
    w_t = nrm((C, cpg, CONV_K))
    w_dense = jnp.zeros((CONV_K, C, C), jnp.float32)
    for g in range(CONV_GROUPS):
        sl = slice(g * cpg, (g + 1) * cpg)
        w_dense = w_dense.at[:, sl, sl].set(jnp.transpose(w_t[sl], (2, 1, 0)))
    # TODO(synk): weight_norm in make_conv_pos is an init-time reparam only; folded into the dense weight.
    pcw = jnp.concatenate([w_dense[kk] for kk in range(CONV_K)], axis=1)   # (C, K*C)

    w_in_cols = [pcw]
    w2_cols = []
    vrows = [nrm((C,)),                                             # pcb
             jnp.ones((C,), jnp.float32), jnp.zeros((C,), jnp.float32)]   # pre-stack LN g, b
    vwide = []
    for _ in range(N_LAYERS):
        w_in_cols += [nrm((C, 3 * C)), nrm((C, C)), nrm((C, FFN))]  # wqkv, wo, w1
        w2_cols.append(nrm((FFN, C)))                               # w2
        vwide.append(jnp.concatenate([nrm((3 * C,)), nrm((FFN,))]))  # [bqkv | b1]
        vrows += [nrm((C,)),                                        # bo
                  jnp.ones((C,), jnp.float32), jnp.zeros((C,), jnp.float32),  # ln1 g, b
                  nrm((C,)),                                        # b2
                  jnp.ones((C,), jnp.float32), jnp.zeros((C,), jnp.float32)]  # ln2 g, b
    # ASTP: linear1 Conv1d(C,256,1,bias=False), linear2 Conv1d(256,C,1,bias=False),
    # out Linear(2C,C) split into mean/std halves, LayerNorm(C).
    w_in_cols += [nrm((C, ASTP_BOTTLENECK)), nrm((C, C)), nrm((C, C))]     # aw1, awm, aws
    aw2 = nrm((ASTP_BOTTLENECK, C))
    vrows += [nrm((C,)),                                            # abo
              jnp.ones((C,), jnp.float32), jnp.zeros((C,), jnp.float32)]   # ASTP LN g, b

    w_in = jnp.concatenate(w_in_cols, axis=1)
    assert w_in.shape == (C, W_IN_COLS)
    assert len(vrows) == N_VROWS
    return {
        "w_in": w_in.astype(MM_DTYPE),                               # (C, 960) bf16
        "w2s": jnp.concatenate(w2_cols, axis=1).astype(MM_DTYPE),    # (FFN, L*C) bf16
        "aw2": aw2.astype(MM_DTYPE),                                 # (256, C) bf16
        "vrows": jnp.stack(vrows, axis=0),                           # (18, C) f32
        "vwide": jnp.stack(vwide, axis=0),                           # (L, 3C+FFN) f32
    }


# ----------------------------- main -------------------------------------------
if __name__ == "__main__":
    key = jax.random.PRNGKey(0)
    pkey, xkey = jax.random.split(key)
    params = init_params(pkey)

    x = jax.random.normal(xkey, (B, T, C), jnp.float32)
    lengths = jnp.array([T, T - 4])
    padding_mask = jnp.arange(T)[None, :] >= lengths[:, None]   # (B, T) bool, True = padded

    fwd = jax.jit(transformer_encoder_forward)
    out, layer_results = fwd(x, padding_mask, params)

    out = jax.block_until_ready(out)
    for lr in layer_results:
        jax.block_until_ready(lr)

    assert out.shape == (B, T, C)
    assert len(layer_results) == N_LAYERS + 1          # [spk_emb, layer0 out, layer1 out]
    assert bool(jnp.all(jnp.isfinite(out)))
    print("KERNEL_OK")
</pallas_src>

<mosaic_0001>
module attributes {stable_mosaic.version = 11 : i64} {
  func.func @_encoder_kernel(%arg0: memref<32x32xf32, #tpu.memory_space<vmem>>, %arg1: memref<32x1xf32, #tpu.memory_space<vmem>>, %arg2: memref<2x16xf32, #tpu.memory_space<vmem>>, %arg3: memref<32x960xbf16, #tpu.memory_space<vmem>>, %arg4: memref<64x64xbf16, #tpu.memory_space<vmem>>, %arg5: memref<256x32xbf16, #tpu.memory_space<vmem>>, %arg6: memref<18x32xf32, #tpu.memory_space<vmem>>, %arg7: memref<2x160xf32, #tpu.memory_space<vmem>>, %arg8: memref<3x32x32xf32, #tpu.memory_space<vmem>>) attributes {dimension_semantics = [], scalar_prefetch = 0 : i64, scratch_operands = 0 : i64, tpu.core_type = #tpu.core_type<tc>} {
    %c0 = arith.constant 0 : index
    %c0_0 = arith.constant 0 : index
    %0 = vector.load %arg1[%c0, %c0_0] : memref<32x1xf32, #tpu.memory_space<vmem>>, vector<32x1xf32>
    %c0_1 = arith.constant 0 : index
    %c0_2 = arith.constant 0 : index
    %1 = vector.load %arg0[%c0_1, %c0_2] : memref<32x32xf32, #tpu.memory_space<vmem>>, vector<32x32xf32>
    %2 = vector.broadcast %0 : vector<32x1xf32> to vector<32x32xf32>
    %3 = arith.mulf %1, %2 : vector<32x32xf32>
    %4 = arith.truncf %3 : vector<32x32xf32> to vector<32x32xbf16>
    %c0_3 = arith.constant 0 : index
    %c0_4 = arith.constant 0 : index
    %5 = vector.load %arg3[%c0_3, %c0_4] : memref<32x960xbf16, #tpu.memory_space<vmem>>, vector<32x256xbf16>
    %cst = arith.constant dense<0.000000e+00> : vector<32x256xf32>
    %6 = tpu.matmul %4, %5, %cst {dimension_numbers = #tpu.dot_dimension_numbers<[1], [0], [0], [1], [0, 0, 1, 1], [], []>} : vector<32x32xbf16>, vector<32x256xbf16>, vector<32x256xf32> -> vector<32x256xf32>
    %7 = vector.extract_strided_slice %6 {offsets = [0, 0], sizes = [16, 256], strides = [1, 1]} : vector<32x256xf32> to vector<16x256xf32>
    %cst_5 = arith.constant 0.000000e+00 : f32
    %8 = vector.broadcast %cst_5 : f32 to vector<16x32xf32>
    %9 = vector.extract_strided_slice %7 {offsets = [0, 0], sizes = [16, 32], strides = [1, 1]} : vector<16x256xf32> to vector<16x32xf32>
    %cst_6 = arith.constant 0.000000e+00 : f32
    %10 = vector.broadcast %cst_6 : f32 to vector<4x32xf32>
    %11 = vector.extract_strided_slice %9 {offsets = [0, 0], sizes = [12, 32], strides = [1, 1]} : vector<16x32xf32> to vector<12x32xf32>
    %12 = tpu.concatenate %10, %11 in 0 : vector<4x32xf32>, vector<12x32xf32> -> vector<16x32xf32>
    %13 = arith.addf %8, %12 : vector<16x32xf32>
    %14 = vector.extract_strided_slice %7 {offsets = [0, 32], sizes = [16, 32], strides = [1, 1]} : vector<16x256xf32> to vector<16x32xf32>
    %cst_7 = arith.constant 0.000000e+00 : f32
    %15 = vector.broadcast %cst_7 : f32 to vector<3x32xf32>
    %16 = vector.extract_strided_slice %14 {offsets = [0, 0], sizes = [13, 32], strides = [1, 1]} : vector<16x32xf32> to vector<13x32xf32>
    %17 = tpu.concatenate %15, %16 in 0 : vector<3x32xf32>, vector<13x32xf32> -> vector<16x32xf32>
    %18 = arith.addf %13, %17 : vector<16x32xf32>
    %19 = vector.extract_strided_slice %7 {offsets = [0, 64], sizes = [16, 32], strides = [1, 1]} : vector<16x256xf32> to vector<16x32xf32>
    %cst_8 = arith.constant 0.000000e+00 : f32
    %20 = vector.broadcast %cst_8 : f32 to vector<2x32xf32>
    %21 = vector.extract_strided_slice %19 {offsets = [0, 0], sizes = [14, 32], strides = [1, 1]} : vector<16x32xf32> to vector<14x32xf32>
    %22 = tpu.concatenate %20, %21 in 0 : vector<2x32xf32>, vector<14x32xf32> -> vector<16x32xf32>
    %23 = arith.addf %18, %22 : vector<16x32xf32>
    %24 = vector.extract_strided_slice %7 {offsets = [0, 96], sizes = [16, 32], strides = [1, 1]} : vector<16x256xf32> to vector<16x32xf32>
    %cst_9 = arith.constant 0.000000e+00 : f32
    %25 = vector.broadcast %cst_9 : f32 to vector<1x32xf32>
    %26 = vector.extract_strided_slice %24 {offsets = [0, 0], sizes = [15, 32], strides = [1, 1]} : vector<16x32xf32> to vector<15x32xf32>
    %27 = tpu.concatenate %25, %26 in 0 : vector<1x32xf32>, vector<15x32xf32> -> vector<16x32xf32>
    %28 = arith.addf %23, %27 : vector<16x32xf32>
    %29 = vector.extract_strided_slice %7 {offsets = [0, 128], sizes = [16, 32], strides = [1, 1]} : vector<16x256xf32> to vector<16x32xf32>
    %30 = arith.addf %28, %29 : vector<16x32xf32>
    %31 = vector.extract_strided_slice %7 {offsets = [0, 160], sizes = [16, 32], strides = [1, 1]} : vector<16x256xf32> to vector<16x32xf32>
    %32 = vector.extract_strided_slice %31 {offsets = [1, 0], sizes = [15, 32], strides = [1, 1]} : vector<16x32xf32> to vector<15x32xf32>
    %cst_10 = arith.constant 0.000000e+00 : f32
    %33 = vector.broadcast %cst_10 : f32 to vector<1x32xf32>
    %34 = tpu.concatenate %32, %33 in 0 : vector<15x32xf32>, vector<1x32xf32> -> vector<16x32xf32>
    %35 = arith.addf %30, %34 : vector<16x32xf32>
    %36 = vector.extract_strided_slice %7 {offsets = [0, 192], sizes = [16, 32], strides = [1, 1]} : vector<16x256xf32> to vector<16x32xf32>
    %37 = vector.extract_strided_slice %36 {offsets = [2, 0], sizes = [14, 32], strides = [1, 1]} : vector<16x32xf32> to vector<14x32xf32>
    %cst_11 = arith.constant 0.000000e+00 : f32
    %38 = vector.broadcast %cst_11 : f32 to vector<2x32xf32>
    %39 = tpu.concatenate %37, %38 in 0 : vector<14x32xf32>, vector<2x32xf32> -> vector<16x32xf32>
    %40 = arith.addf %35, %39 : vector<16x32xf32>
    %41 = vector.extract_strided_slice %7 {offsets = [0, 224], sizes = [16, 32], strides = [1, 1]} : vector<16x256xf32> to vector<16x32xf32>
    %42 = vector.extract_strided_slice %41 {offsets = [3, 0], sizes = [13, 32], strides = [1, 1]} : vector<16x32xf32> to vector<13x32xf32>
    %cst_12 = arith.constant 0.000000e+00 : f32
    %43 = vector.broadcast %cst_12 : f32 to vector<3x32xf32>
    %44 = tpu.concatenate %42, %43 in 0 : vector<13x32xf32>, vector<3x32xf32> -> vector<16x32xf32>
    %45 = arith.addf %40, %44 : vector<16x32xf32>
    %46 = vector.extract_strided_slice %6 {offsets = [16, 0], sizes = [16, 256], strides = [1, 1]} : vector<32x256xf32> to vector<16x256xf32>
    %cst_13 = arith.constant 0.000000e+00 : f32
    %47 = vector.broadcast %cst_13 : f32 to vector<16x32xf32>
    %48 = vector.extract_strided_slice %46 {offsets = [0, 0], sizes = [16, 32], strides = [1, 1]} : vector<16x256xf32> to vector<16x32xf32>
    %cst_14 = arith.constant 0.000000e+00 : f32
    %49 = vector.broadcast %cst_14 : f32 to vector<4x32xf32>
    %50 = vector.extract_strided_slice %48 {offsets = [0, 0], sizes = [12, 32], strides = [1, 1]} : vector<16x32xf32> to vector<12x32xf32>
    %51 = tpu.concatenate %49, %50 in 0 : vector<4x32xf32>, vector<12x32xf32> -> vector<16x32xf32>
    %52 = arith.addf %47, %51 : vector<16x32xf32>
    %53 = vector.extract_strided_slice %46 {offsets = [0, 32], sizes = [16, 32], strides = [1, 1]} : vector<16x256xf32> to vector<16x32xf32>
    %cst_15 = arith.constant 0.000000e+00 : f32
    %54 = vector.broadcast %cst_15 : f32 to vector<3x32xf32>
    %55 = vector.extract_strided_slice %53 {offsets = [0, 0], sizes = [13, 32], strides = [1, 1]} : vector<16x32xf32> to vector<13x32xf32>
    %56 = tpu.concatenate %54, %55 in 0 : vector<3x32xf32>, vector<13x32xf32> -> vector<16x32xf32>
    %57 = arith.addf %52, %56 : vector<16x32xf32>
    %58 = vector.extract_strided_slice %46 {offsets = [0, 64], sizes = [16, 32], strides = [1, 1]} : vector<16x256xf32> to vector<16x32xf32>
    %cst_16 = arith.constant 0.000000e+00 : f32
    %59 = vector.broadcast %cst_16 : f32 to vector<2x32xf32>
    %60 = vector.extract_strided_slice %58 {offsets = [0, 0], sizes = [14, 32], strides = [1, 1]} : vector<16x32xf32> to vector<14x32xf32>
    %61 = tpu.concatenate %59, %60 in 0 : vector<2x32xf32>, vector<14x32xf32> -> vector<16x32xf32>
    %62 = arith.addf %57, %61 : vector<16x32xf32>
    %63 = vector.extract_strided_slice %46 {offsets = [0, 96], sizes = [16, 32], strides = [1, 1]} : vector<16x256xf32> to vector<16x32xf32>
    %cst_17 = arith.constant 0.000000e+00 : f32
    %64 = vector.broadcast %cst_17 : f32 to vector<1x32xf32>
    %65 = vector.extract_strided_slice %63 {offsets = [0, 0], sizes = [15, 32], strides = [1, 1]} : vector<16x32xf32> to vector<15x32xf32>
    %66 = tpu.concatenate %64, %65 in 0 : vector<1x32xf32>, vector<15x32xf32> -> vector<16x32xf32>
    %67 = arith.addf %62, %66 : vector<16x32xf32>
    %68 = vector.extract_strided_slice %46 {offsets = [0, 128], sizes = [16, 32], strides = [1, 1]} : vector<16x256xf32> to vector<16x32xf32>
    %69 = arith.addf %67, %68 : vector<16x32xf32>
    %70 = vector.extract_strided_slice %46 {offsets = [0, 160], sizes = [16, 32], strides = [1, 1]} : vector<16x256xf32> to vector<16x32xf32>
    %71 = vector.extract_strided_slice %70 {offsets = [1, 0], sizes = [15, 32], strides = [1, 1]} : vector<16x32xf32> to vector<15x32xf32>
    %cst_18 = arith.constant 0.000000e+00 : f32
    %72 = vector.broadcast %cst_18 : f32 to vector<1x32xf32>
    %73 = tpu.concatenate %71, %72 in 0 : vector<15x32xf32>, vector<1x32xf32> -> vector<16x32xf32>
    %74 = arith.addf %69, %73 : vector<16x32xf32>
    %75 = vector.extract_strided_slice %46 {offsets = [0, 192], sizes = [16, 32], strides = [1, 1]} : vector<16x256xf32> to vector<16x32xf32>
    %76 = vector.extract_strided_slice %75 {offsets = [2, 0], sizes = [14, 32], strides = [1, 1]} : vector<16x32xf32> to vector<14x32xf32>
    %cst_19 = arith.constant 0.000000e+00 : f32
    %77 = vector.broadcast %cst_19 : f32 to vector<2x32xf32>
    %78 = tpu.concatenate %76, %77 in 0 : vector<14x32xf32>, vector<2x32xf32> -> vector<16x32xf32>
    %79 = arith.addf %74, %78 : vector<16x32xf32>
    %80 = vector.extract_strided_slice %46 {offsets = [0, 224], sizes = [16, 32], strides = [1, 1]} : vector<16x256xf32> to vector<16x32xf32>
    %81 = vector.extract_strided_slice %80 {offsets = [3, 0], sizes = [13, 32], strides = [1, 1]} : vector<16x32xf32> to vector<13x32xf32>
    %cst_20 = arith.constant 0.000000e+00 : f32
    %82 = vector.broadcast %cst_20 : f32 to vector<3x32xf32>
    %83 = tpu.concatenate %81, %82 in 0 : vector<13x32xf32>, vector<3x32xf32> -> vector<16x32xf32>
    %84 = arith.addf %79, %83 : vector<16x32xf32>
    %85 = tpu.concatenate %45, %84 in 0 : vector<16x32xf32>, vector<16x32xf32> -> vector<32x32xf32>
    %c0_21 = arith.constant 0 : index
    %c0_22 = arith.constant 0 : index
    %86 = vector.load %arg6[%c0_21, %c0_22] : memref<18x32xf32, #tpu.memory_space<vmem>>, vector<1x32xf32>
    %87 = vector.broadcast %86 : vector<1x32xf32> to vector<32x32xf32>
    %88 = arith.addf %85, %87 : vector<32x32xf32>
    %cst_23 = arith.constant 5.000000e-01 : f32
    %89 = vector.broadcast %cst_23 : f32 to vector<32x32xf32>
    %90 = arith.mulf %89, %88 : vector<32x32xf32>
    %cst_24 = arith.constant 0.707106769 : f32
    %91 = vector.broadcast %cst_24 : f32 to vector<32x32xf32>
    %92 = arith.mulf %88, %91 : vector<32x32xf32>
    %93 = math.absf %92 : vector<32x32xf32>
    %cst_25 = arith.constant 0.327591091 : f32
    %94 = vector.broadcast %cst_25 : f32 to vector<32x32xf32>
    %95 = arith.mulf %94, %93 : vector<32x32xf32>
    %cst_26 = arith.constant 1.000000e+00 : f32
    %96 = vector.broadcast %cst_26 : f32 to vector<32x32xf32>
    %97 = arith.addf %96, %95 : vector<32x32xf32>
    %cst_27 = arith.constant 1.000000e+00 : f32
    %98 = vector.broadcast %cst_27 : f32 to vector<32x32xf32>
    %99 = arith.divf %98, %97 : vector<32x32xf32>
    %cst_28 = arith.constant 1.06140542 : f32
    %100 = vector.broadcast %cst_28 : f32 to vector<32x32xf32>
    %101 = arith.mulf %100, %99 : vector<32x32xf32>
    %cst_29 = arith.constant -1.45315206 : f32
    %102 = vector.broadcast %cst_29 : f32 to vector<32x32xf32>
    %103 = arith.addf %101, %102 : vector<32x32xf32>
    %104 = arith.mulf %103, %99 : vector<32x32xf32>
    %cst_30 = arith.constant 1.42141378 : f32
    %105 = vector.broadcast %cst_30 : f32 to vector<32x32xf32>
    %106 = arith.addf %104, %105 : vector<32x32xf32>
    %107 = arith.mulf %106, %99 : vector<32x32xf32>
    %cst_31 = arith.constant -0.284496725 : f32
    %108 = vector.broadcast %cst_31 : f32 to vector<32x32xf32>
    %109 = arith.addf %107, %108 : vector<32x32xf32>
    %110 = arith.mulf %109, %99 : vector<32x32xf32>
    %cst_32 = arith.constant 0.254829586 : f32
    %111 = vector.broadcast %cst_32 : f32 to vector<32x32xf32>
    %112 = arith.addf %110, %111 : vector<32x32xf32>
    %113 = arith.mulf %112, %99 : vector<32x32xf32>
    %cst_33 = arith.constant 0.000000e+00 : f32
    %114 = vector.broadcast %cst_33 : f32 to vector<32x32xf32>
    %115 = arith.subf %114, %93 : vector<32x32xf32>
    %116 = arith.mulf %115, %93 : vector<32x32xf32>
    %117 = math.exp %116 : vector<32x32xf32>
    %118 = arith.mulf %113, %117 : vector<32x32xf32>
    %cst_34 = arith.constant 1.000000e+00 : f32
    %119 = vector.broadcast %cst_34 : f32 to vector<32x32xf32>
    %120 = arith.subf %119, %118 : vector<32x32xf32>
    %cst_35 = arith.constant 0.000000e+00 : f32
    %121 = vector.broadcast %cst_35 : f32 to vector<32x32xf32>
    %122 = arith.cmpf oge, %92, %121 : vector<32x32xf32>
    %cst_36 = arith.constant 0.000000e+00 : f32
    %123 = vector.broadcast %cst_36 : f32 to vector<32x32xf32>
    %124 = arith.subf %123, %120 : vector<32x32xf32>
    %125 = arith.select %122, %120, %124 : vector<32x32xi1>, vector<32x32xf32>
    %cst_37 = arith.constant 1.000000e+00 : f32
    %126 = vector.broadcast %cst_37 : f32 to vector<32x32xf32>
    %127 = arith.addf %126, %125 : vector<32x32xf32>
    %128 = arith.mulf %90, %127 : vector<32x32xf32>
    %129 = arith.addf %3, %128 : vector<32x32xf32>
    %c1 = arith.constant 1 : index
    %c0_38 = arith.constant 0 : index
    %130 = vector.load %arg6[%c1, %c0_38] : memref<18x32xf32, #tpu.memory_space<vmem>>, vector<1x32xf32>
    %c2 = arith.constant 2 : index
    %c0_39 = arith.constant 0 : index
    %131 = vector.load %arg6[%c2, %c0_39] : memref<18x32xf32, #tpu.memory_space<vmem>>, vector<1x32xf32>
    %cst_40 = arith.constant dense<0.000000e+00> : vector<32xf32>
    %132 = vector.multi_reduction <add>, %129, %cst_40 [1] : vector<32x32xf32> to vector<32xf32>
    %133 = vector.shape_cast %132 : vector<32xf32> to vector<32x1xf32>
    %cst_41 = arith.constant 3.200000e+01 : f32
    %134 = vector.broadcast %cst_41 : f32 to vector<32x1xf32>
    %135 = arith.divf %133, %134 : vector<32x1xf32>
    %136 = vector.broadcast %135 : vector<32x1xf32> to vector<32x32xf32>
    %137 = arith.subf %129, %136 : vector<32x32xf32>
    %138 = arith.mulf %137, %137 : vector<32x32xf32>
    %cst_42 = arith.constant dense<0.000000e+00> : vector<32xf32>
    %139 = vector.multi_reduction <add>, %138, %cst_42 [1] : vector<32x32xf32> to vector<32xf32>
    %140 = vector.shape_cast %139 : vector<32xf32> to vector<32x1xf32>
    %cst_43 = arith.constant 3.200000e+01 : f32
    %141 = vector.broadcast %cst_43 : f32 to vector<32x1xf32>
    %142 = arith.divf %140, %141 : vector<32x1xf32>
    %cst_44 = arith.constant 9.99999974E-6 : f32
    %143 = vector.broadcast %cst_44 : f32 to vector<32x1xf32>
    %144 = arith.addf %142, %143 : vector<32x1xf32>
    %145 = math.rsqrt %144 : vector<32x1xf32>
    %146 = vector.broadcast %145 : vector<32x1xf32> to vector<32x32xf32>
    %147 = arith.mulf %137, %146 : vector<32x32xf32>
    %148 = vector.broadcast %130 : vector<1x32xf32> to vector<32x32xf32>
    %149 = arith.mulf %147, %148 : vector<32x32xf32>
    %150 = vector.broadcast %131 : vector<1x32xf32> to vector<32x32xf32>
    %151 = arith.addf %149, %150 : vector<32x32xf32>
    %c0_45 = arith.constant 0 : index
    %c256 = arith.constant 256 : index
    %152 = vector.load %arg3[%c0_45, %c256] : memref<32x960xbf16, #tpu.memory_space<vmem>>, vector<32x96xbf16>
    %c0_46 = arith.constant 0 : index
    %c352 = arith.constant 352 : index
    %153 = vector.load %arg3[%c0_46, %c352] : memref<32x960xbf16, #tpu.memory_space<vmem>>, vector<32x32xbf16>
    %c0_47 = arith.constant 0 : index
    %c384 = arith.constant 384 : index
    %154 = vector.load %arg3[%c0_47, %c384] : memref<32x960xbf16, #tpu.memory_space<vmem>>, vector<32x64xbf16>
    %c0_48 = arith.constant 0 : index
    %c0_49 = arith.constant 0 : index
    %155 = vector.load %arg4[%c0_48, %c0_49] : memref<64x64xbf16, #tpu.memory_space<vmem>>, vector<64x32xbf16>
    %c0_50 = arith.constant 0 : index
    %c0_51 = arith.constant 0 : index
    %156 = vector.load %arg7[%c0_50, %c0_51] : memref<2x160xf32, #tpu.memory_space<vmem>>, vector<1x96xf32>
    %c0_52 = arith.constant 0 : index
    %c96 = arith.constant 96 : index
    %157 = vector.load %arg7[%c0_52, %c96] : memref<2x160xf32, #tpu.memory_space<vmem>>, vector<1x64xf32>
    %c3 = arith.constant 3 : index
    %c0_53 = arith.constant 0 : index
    %158 = vector.load %arg6[%c3, %c0_53] : memref<18x32xf32, #tpu.memory_space<vmem>>, vector<1x32xf32>
    %c4 = arith.constant 4 : index
    %c0_54 = arith.constant 0 : index
    %159 = vector.load %arg6[%c4, %c0_54] : memref<18x32xf32, #tpu.memory_space<vmem>>, vector<1x32xf32>
    %c5 = arith.constant 5 : index
    %c0_55 = arith.constant 0 : index
    %160 = vector.load %arg6[%c5, %c0_55] : memref<18x32xf32, #tpu.memory_space<vmem>>, vector<1x32xf32>
    %c6 = arith.constant 6 : index
    %c0_56 = arith.constant 0 : index
    %161 = vector.load %arg6[%c6, %c0_56] : memref<18x32xf32, #tpu.memory_space<vmem>>, vector<1x32xf32>
    %c7 = arith.constant 7 : index
    %c0_57 = arith.constant 0 : index
    %162 = vector.load %arg6[%c7, %c0_57] : memref<18x32xf32, #tpu.memory_space<vmem>>, vector<1x32xf32>
    %c8 = arith.constant 8 : index
    %c0_58 = arith.constant 0 : index
    %163 = vector.load %arg6[%c8, %c0_58] : memref<18x32xf32, #tpu.memory_space<vmem>>, vector<1x32xf32>
    %164 = arith.truncf %151 : vector<32x32xf32> to vector<32x32xbf16>
    %cst_59 = arith.constant dense<0.000000e+00> : vector<32x96xf32>
    %165 = tpu.matmul %164, %152, %cst_59 {dimension_numbers = #tpu.dot_dimension_numbers<[1], [0], [0], [1], [0, 0, 1, 1], [], []>} : vector<32x32xbf16>, vector<32x96xbf16>, vector<32x96xf32> -> vector<32x96xf32>
    %166 = vector.broadcast %156 : vector<1x96xf32> to vector<32x96xf32>
    %167 = arith.addf %165, %166 : vector<32x96xf32>
    %168 = vector.extract_strided_slice %167 {offsets = [0, 0], sizes = [32, 32], strides = [1, 1]} : vector<32x96xf32> to vector<32x32xf32>
    %169 = vector.shape_cast %168 : vector<32x32xf32> to vector<32x4x8xf32>
    %170 = tpu.transpose %169, [1, 0, 2] : vector<32x4x8xf32> -> vector<4x32x8xf32>
    %171 = vector.extract_strided_slice %167 {offsets = [0, 32], sizes = [32, 32], strides = [1, 1]} : vector<32x96xf32> to vector<32x32xf32>
    %172 = vector.shape_cast %171 : vector<32x32xf32> to vector<32x4x8xf32>
    %173 = tpu.transpose %172, [1, 0, 2] : vector<32x4x8xf32> -> vector<4x32x8xf32>
    %174 = vector.extract_strided_slice %167 {offsets = [0, 64], sizes = [32, 32], strides = [1, 1]} : vector<32x96xf32> to vector<32x32xf32>
    %175 = vector.shape_cast %174 : vector<32x32xf32> to vector<32x4x8xf32>
    %176 = tpu.transpose %175, [1, 0, 2] : vector<32x4x8xf32> -> vector<4x32x8xf32>
    %177 = vector.extract_strided_slice %170 {offsets = [0, 0, 0], sizes = [4, 16, 8], strides = [1, 1, 1]} : vector<4x32x8xf32> to vector<4x16x8xf32>
    %178 = vector.extract_strided_slice %173 {offsets = [0, 0, 0], sizes = [4, 16, 8], strides = [1, 1, 1]} : vector<4x32x8xf32> to vector<4x16x8xf32>
    %179 = vector.extract_strided_slice %176 {offsets = [0, 0, 0], sizes = [4, 16, 8], strides = [1, 1, 1]} : vector<4x32x8xf32> to vector<4x16x8xf32>
    "tpu.trace_start"() <{level = 10 : i32, message = "htd,hsd->hts"}> : () -> ()
    %cst_60 = arith.constant dense<0.000000e+00> : vector<4x16x16xf32>
    %180 = tpu.matmul %177, %178, %cst_60 {dimension_numbers = #tpu.dot_dimension_numbers<[2], [2], [1], [1], [0, 0, 0, 1, 1, 1], [0], [0]>} : vector<4x16x8xf32>, vector<4x16x8xf32>, vector<4x16x16xf32> -> vector<4x16x16xf32>
    "tpu.trace_stop"() : () -> ()
    %cst_61 = arith.constant 0.353553385 : f32
    %181 = vector.broadcast %cst_61 : f32 to vector<4x16x16xf32>
    %182 = arith.mulf %180, %181 : vector<4x16x16xf32>
    %c0_62 = arith.constant 0 : index
    %c0_63 = arith.constant 0 : index
    %183 = vector.load %arg2[%c0_62, %c0_63] : memref<2x16xf32, #tpu.memory_space<vmem>>, vector<1x16xf32>
    %184 = vector.shape_cast %183 : vector<1x16xf32> to vector<1x1x16xf32>
    %185 = vector.broadcast %184 : vector<1x1x16xf32> to vector<4x16x16xf32>
    %186 = arith.addf %182, %185 : vector<4x16x16xf32>
    %cst_64 = arith.constant dense<0xFF800000> : vector<4x16xf32>
    %187 = vector.multi_reduction <maximumf>, %186, %cst_64 [2] : vector<4x16x16xf32> to vector<4x16xf32>
    %188 = vector.shape_cast %187 : vector<4x16xf32> to vector<4x16x1xf32>
    %189 = vector.broadcast %188 : vector<4x16x1xf32> to vector<4x16x16xf32>
    %190 = arith.subf %186, %189 : vector<4x16x16xf32>
    %191 = math.exp %190 : vector<4x16x16xf32>
    %cst_65 = arith.constant dense<0.000000e+00> : vector<4x16xf32>
    %192 = vector.multi_reduction <add>, %191, %cst_65 [2] : vector<4x16x16xf32> to vector<4x16xf32>
    %193 = vector.shape_cast %192 : vector<4x16xf32> to vector<4x16x1xf32>
    %194 = vector.broadcast %193 : vector<4x16x1xf32> to vector<4x16x16xf32>
    %195 = arith.divf %191, %194 : vector<4x16x16xf32>
    "tpu.trace_start"() <{level = 10 : i32, message = "hts,hsd->htd"}> : () -> ()
    %cst_66 = arith.constant dense<0.000000e+00> : vector<4x16x8xf32>
    %196 = tpu.matmul %195, %179, %cst_66 {dimension_numbers = #tpu.dot_dimension_numbers<[2], [1], [1], [2], [0, 0, 0, 1, 1, 2], [0], [0]>} : vector<4x16x16xf32>, vector<4x16x8xf32>, vector<4x16x8xf32> -> vector<4x16x8xf32>
    "tpu.trace_stop"() : () -> ()
    %197 = vector.extract_strided_slice %170 {offsets = [0, 16, 0], sizes = [4, 16, 8], strides = [1, 1, 1]} : vector<4x32x8xf32> to vector<4x16x8xf32>
    %198 = vector.extract_strided_slice %173 {offsets = [0, 16, 0], sizes = [4, 16, 8], strides = [1, 1, 1]} : vector<4x32x8xf32> to vector<4x16x8xf32>
    %199 = vector.extract_strided_slice %176 {offsets = [0, 16, 0], sizes = [4, 16, 8], strides = [1, 1, 1]} : vector<4x32x8xf32> to vector<4x16x8xf32>
    "tpu.trace_start"() <{level = 10 : i32, message = "htd,hsd->hts"}> : () -> ()
    %cst_67 = arith.constant dense<0.000000e+00> : vector<4x16x16xf32>
    %200 = tpu.matmul %197, %198, %cst_67 {dimension_numbers = #tpu.dot_dimension_numbers<[2], [2], [1], [1], [0, 0, 0, 1, 1, 1], [0], [0]>} : vector<4x16x8xf32>, vector<4x16x8xf32>, vector<4x16x16xf32> -> vector<4x16x16xf32>
    "tpu.trace_stop"() : () -> ()
    %cst_68 = arith.constant 0.353553385 : f32
    %201 = vector.broadcast %cst_68 : f32 to vector<4x16x16xf32>
    %202 = arith.mulf %200, %201 : vector<4x16x16xf32>
    %c1_69 = arith.constant 1 : index
    %c0_70 = arith.constant 0 : index
    %203 = vector.load %arg2[%c1_69, %c0_70] : memref<2x16xf32, #tpu.memory_space<vmem>>, vector<1x16xf32>
    %204 = vector.shape_cast %203 : vector<1x16xf32> to vector<1x1x16xf32>
    %205 = vector.broadcast %204 : vector<1x1x16xf32> to vector<4x16x16xf32>
    %206 = arith.addf %202, %205 : vector<4x16x16xf32>
    %cst_71 = arith.constant dense<0xFF800000> : vector<4x16xf32>
    %207 = vector.multi_reduction <maximumf>, %206, %cst_71 [2] : vector<4x16x16xf32> to vector<4x16xf32>
    %208 = vector.shape_cast %207 : vector<4x16xf32> to vector<4x16x1xf32>
    %209 = vector.broadcast %208 : vector<4x16x1xf32> to vector<4x16x16xf32>
    %210 = arith.subf %206, %209 : vector<4x16x16xf32>
    %211 = math.exp %210 : vector<4x16x16xf32>
    %cst_72 = arith.constant dense<0.000000e+00> : vector<4x16xf32>
    %212 = vector.multi_reduction <add>, %211, %cst_72 [2] : vector<4x16x16xf32> to vector<4x16xf32>
    %213 = vector.shape_cast %212 : vector<4x16xf32> to vector<4x16x1xf32>
    %214 = vector.broadcast %213 : vector<4x16x1xf32> to vector<4x16x16xf32>
    %215 = arith.divf %211, %214 : vector<4x16x16xf32>
    "tpu.trace_start"() <{level = 10 : i32, message = "hts,hsd->htd"}> : () -> ()
    %cst_73 = arith.constant dense<0.000000e+00> : vector<4x16x8xf32>
    %216 = tpu.matmul %215, %199, %cst_73 {dimension_numbers = #tpu.dot_dimension_numbers<[2], [1], [1], [2], [0, 0, 0, 1, 1, 2], [0], [0]>} : vector<4x16x16xf32>, vector<4x16x8xf32>, vector<4x16x8xf32> -> vector<4x16x8xf32>
    "tpu.trace_stop"() : () -> ()
    %217 = tpu.concatenate %196, %216 in 1 : vector<4x16x8xf32>, vector<4x16x8xf32> -> vector<4x32x8xf32>
    %218 = tpu.transpose %217, [1, 0, 2] : vector<4x32x8xf32> -> vector<32x4x8xf32>
    %219 = vector.shape_cast %218 : vector<32x4x8xf32> to vector<32x32xf32>
    %220 = arith.truncf %219 : vector<32x32xf32> to vector<32x32xbf16>
    %cst_74 = arith.constant dense<0.000000e+00> : vector<32x32xf32>
    %221 = tpu.matmul %220, %153, %cst_74 {dimension_numbers = #tpu.dot_dimension_numbers<[1], [0], [0], [1], [0, 0, 1, 1], [], []>} : vector<32x32xbf16>, vector<32x32xbf16>, vector<32x32xf32> -> vector<32x32xf32>
    %222 = vector.broadcast %158 : vector<1x32xf32> to vector<32x32xf32>
    %223 = arith.addf %221, %222 : vector<32x32xf32>
    %224 = arith.addf %151, %223 : vector<32x32xf32>
    %cst_75 = arith.constant dense<0.000000e+00> : vector<32xf32>
    %225 = vector.multi_reduction <add>, %224, %cst_75 [1] : vector<32x32xf32> to vector<32xf32>
    %226 = vector.shape_cast %225 : vector<32xf32> to vector<32x1xf32>
    %cst_76 = arith.constant 3.200000e+01 : f32
    %227 = vector.broadcast %cst_76 : f32 to vector<32x1xf32>
    %228 = arith.divf %226, %227 : vector<32x1xf32>
    %229 = vector.broadcast %228 : vector<32x1xf32> to vector<32x32xf32>
    %230 = arith.subf %224, %229 : vector<32x32xf32>
    %231 = arith.mulf %230, %230 : vector<32x32xf32>
    %cst_77 = arith.constant dense<0.000000e+00> : vector<32xf32>
    %232 = vector.multi_reduction <add>, %231, %cst_77 [1] : vector<32x32xf32> to vector<32xf32>
    %233 = vector.shape_cast %232 : vector<32xf32> to vector<32x1xf32>
    %cst_78 = arith.constant 3.200000e+01 : f32
    %234 = vector.broadcast %cst_78 : f32 to vector<32x1xf32>
    %235 = arith.divf %233, %234 : vector<32x1xf32>
    %cst_79 = arith.constant 9.99999974E-6 : f32
    %236 = vector.broadcast %cst_79 : f32 to vector<32x1xf32>
    %237 = arith.addf %235, %236 : vector<32x1xf32>
    %238 = math.rsqrt %237 : vector<32x1xf32>
    %239 = vector.broadcast %238 : vector<32x1xf32> to vector<32x32xf32>
    %240 = arith.mulf %230, %239 : vector<32x32xf32>
    %241 = vector.broadcast %159 : vector<1x32xf32> to vector<32x32xf32>
    %242 = arith.mulf %240, %241 : vector<32x32xf32>
    %243 = vector.broadcast %160 : vector<1x32xf32> to vector<32x32xf32>
    %244 = arith.addf %242, %243 : vector<32x32xf32>
    %245 = arith.truncf %244 : vector<32x32xf32> to vector<32x32xbf16>
    %cst_80 = arith.constant dense<0.000000e+00> : vector<32x64xf32>
    %246 = tpu.matmul %245, %154, %cst_80 {dimension_numbers = #tpu.dot_dimension_numbers<[1], [0], [0], [1], [0, 0, 1, 1], [], []>} : vector<32x32xbf16>, vector<32x64xbf16>, vector<32x64xf32> -> vector<32x64xf32>
    %247 = vector.broadcast %157 : vector<1x64xf32> to vector<32x64xf32>
    %248 = arith.addf %246, %247 : vector<32x64xf32>
    %cst_81 = arith.constant 0.000000e+00 : f32
    %249 = vector.broadcast %cst_81 : f32 to vector<32x64xf32>
    %250 = arith.maximumf %248, %249 : vector<32x64xf32>
    %251 = arith.truncf %250 : vector<32x64xf32> to vector<32x64xbf16>
    %cst_82 = arith.constant dense<0.000000e+00> : vector<32x32xf32>
    %252 = tpu.matmul %251, %155, %cst_82 {dimension_numbers = #tpu.dot_dimension_numbers<[1], [0], [0], [1], [0, 0, 1, 1], [], []>} : vector<32x64xbf16>, vector<64x32xbf16>, vector<32x32xf32> -> vector<32x32xf32>
    %253 = vector.broadcast %161 : vector<1x32xf32> to vector<32x32xf32>
    %254 = arith.addf %252, %253 : vector<32x32xf32>
    %255 = arith.addf %244, %254 : vector<32x32xf32>
    %cst_83 = arith.constant dense<0.000000e+00> : vector<32xf32>
    %256 = vector.multi_reduction <add>, %255, %cst_83 [1] : vector<32x32xf32> to vector<32xf32>
    %257 = vector.shape_cast %256 : vector<32xf32> to vector<32x1xf32>
    %cst_84 = arith.constant 3.200000e+01 : f32
    %258 = vector.broadcast %cst_84 : f32 to vector<32x1xf32>
    %259 = arith.divf %257, %258 : vector<32x1xf32>
    %260 = vector.broadcast %259 : vector<32x1xf32> to vector<32x32xf32>
    %261 = arith.subf %255, %260 : vector<32x32xf32>
    %262 = arith.mulf %261, %261 : vector<32x32xf32>
    %cst_85 = arith.constant dense<0.000000e+00> : vector<32xf32>
    %263 = vector.multi_reduction <add>, %262, %cst_85 [1] : vector<32x32xf32> to vector<32xf32>
    %264 = vector.shape_cast %263 : vector<32xf32> to vector<32x1xf32>
    %cst_86 = arith.constant 3.200000e+01 : f32
    %265 = vector.broadcast %cst_86 : f32 to vector<32x1xf32>
    %266 = arith.divf %264, %265 : vector<32x1xf32>
    %cst_87 = arith.constant 9.99999974E-6 : f32
    %267 = vector.broadcast %cst_87 : f32 to vector<32x1xf32>
    %268 = arith.addf %266, %267 : vector<32x1xf32>
    %269 = math.rsqrt %268 : vector<32x1xf32>
    %270 = vector.broadcast %269 : vector<32x1xf32> to vector<32x32xf32>
    %271 = arith.mulf %261, %270 : vector<32x32xf32>
    %272 = vector.broadcast %162 : vector<1x32xf32> to vector<32x32xf32>
    %273 = arith.mulf %271, %272 : vector<32x32xf32>
    %274 = vector.broadcast %163 : vector<1x32xf32> to vector<32x32xf32>
    %275 = arith.addf %273, %274 : vector<32x32xf32>
    %c0_88 = arith.constant 0 : index
    %c640 = arith.constant 640 : index
    %276 = vector.load %arg3[%c0_88, %c640] : memref<32x960xbf16, #tpu.memory_space<vmem>>, vector<32x256xbf16>
    %c0_89 = arith.constant 0 : index
    %c896 = arith.constant 896 : index
    %277 = vector.load %arg3[%c0_89, %c896] : memref<32x960xbf16, #tpu.memory_space<vmem>>, vector<32x32xbf16>
    %c0_90 = arith.constant 0 : index
    %c928 = arith.constant 928 : index
    %278 = vector.load %arg3[%c0_90, %c928] : memref<32x960xbf16, #tpu.memory_space<vmem>>, vector<32x32xbf16>
    %c15 = arith.constant 15 : index
    %c0_91 = arith.constant 0 : index
    %279 = vector.load %arg6[%c15, %c0_91] : memref<18x32xf32, #tpu.memory_space<vmem>>, vector<1x32xf32>
    %c16 = arith.constant 16 : index
    %c0_92 = arith.constant 0 : index
    %280 = vector.load %arg6[%c16, %c0_92] : memref<18x32xf32, #tpu.memory_space<vmem>>, vector<1x32xf32>
    %c17 = arith.constant 17 : index
    %c0_93 = arith.constant 0 : index
    %281 = vector.load %arg6[%c17, %c0_93] : memref<18x32xf32, #tpu.memory_space<vmem>>, vector<1x32xf32>
    %282 = vector.broadcast %0 : vector<32x1xf32> to vector<32x32xf32>
    %283 = arith.mulf %275, %282 : vector<32x32xf32>
    %284 = arith.truncf %283 : vector<32x32xf32> to vector<32x32xbf16>
    %cst_94 = arith.constant dense<0.000000e+00> : vector<32x256xf32>
    %285 = tpu.matmul %284, %276, %cst_94 {dimension_numbers = #tpu.dot_dimension_numbers<[1], [0], [0], [1], [0, 0, 1, 1], [], []>} : vector<32x32xbf16>, vector<32x256xbf16>, vector<32x256xf32> -> vector<32x256xf32>
    %286 = math.tanh %285 : vector<32x256xf32>
    %287 = arith.truncf %286 : vector<32x256xf32> to vector<32x256xbf16>
    %c0_95 = arith.constant 0 : index
    %c0_96 = arith.constant 0 : index
    %288 = vector.load %arg5[%c0_95, %c0_96] : memref<256x32xbf16, #tpu.memory_space<vmem>>, vector<256x32xbf16>
    %cst_97 = arith.constant dense<0.000000e+00> : vector<32x32xf32>
    %289 = tpu.matmul %287, %288, %cst_97 {dimension_numbers = #tpu.dot_dimension_numbers<[1], [0], [0], [1], [0, 0, 1, 1], [], []>} : vector<32x256xbf16>, vector<256x32xbf16>, vector<32x32xf32> -> vector<32x32xf32>
    %290 = vector.broadcast %0 : vector<32x1xf32> to vector<32x32xf32>
    %291 = arith.mulf %289, %290 : vector<32x32xf32>
    %cst_98 = arith.constant 1.000000e+00 : f32
    %292 = vector.broadcast %cst_98 : f32 to vector<32x1xf32>
    %293 = arith.subf %292, %0 : vector<32x1xf32>
    %cst_99 = arith.constant -1.000000e+03 : f32
    %294 = vector.broadcast %cst_99 : f32 to vector<32x1xf32>
    %295 = arith.mulf %293, %294 : vector<32x1xf32>
    %296 = vector.broadcast %295 : vector<32x1xf32> to vector<32x32xf32>
    %297 = arith.addf %291, %296 : vector<32x32xf32>
    %298 = vector.extract_strided_slice %297 {offsets = [0, 0], sizes = [16, 32], strides = [1, 1]} : vector<32x32xf32> to vector<16x32xf32>
    %299 = vector.extract_strided_slice %283 {offsets = [0, 0], sizes = [16, 32], strides = [1, 1]} : vector<32x32xf32> to vector<16x32xf32>
    %cst_100 = arith.constant dense<0xFF800000> : vector<32xf32>
    %300 = vector.multi_reduction <maximumf>, %298, %cst_100 [0] : vector<16x32xf32> to vector<32xf32>
    %301 = vector.shape_cast %300 : vector<32xf32> to vector<1x32xf32>
    %302 = vector.broadcast %301 : vector<1x32xf32> to vector<16x32xf32>
    %303 = arith.subf %298, %302 : vector<16x32xf32>
    %304 = math.exp %303 : vector<16x32xf32>
    %cst_101 = arith.constant dense<0.000000e+00> : vector<32xf32>
    %305 = vector.multi_reduction <add>, %304, %cst_101 [0] : vector<16x32xf32> to vector<32xf32>
    %306 = vector.shape_cast %305 : vector<32xf32> to vector<1x32xf32>
    %307 = vector.broadcast %306 : vector<1x32xf32> to vector<16x32xf32>
    %308 = arith.divf %304, %307 : vector<16x32xf32>
    %309 = arith.mulf %308, %299 : vector<16x32xf32>
    %310 = arith.mulf %308, %299 : vector<16x32xf32>
    %311 = arith.mulf %310, %299 : vector<16x32xf32>
    %312 = arith.mulf %309, %309 : vector<16x32xf32>
    %313 = arith.subf %311, %312 : vector<16x32xf32>
    %cst_102 = arith.constant 9.99999974E-6 : f32
    %314 = vector.broadcast %cst_102 : f32 to vector<16x32xf32>
    %315 = arith.addf %313, %314 : vector<16x32xf32>
    %316 = math.sqrt %315 : vector<16x32xf32>
    %317 = arith.truncf %309 : vector<16x32xf32> to vector<16x32xbf16>
    %cst_103 = arith.constant dense<0.000000e+00> : vector<16x32xf32>
    %318 = tpu.matmul %317, %277, %cst_103 {dimension_numbers = #tpu.dot_dimension_numbers<[1], [0], [0], [1], [0, 0, 1, 1], [], []>} : vector<16x32xbf16>, vector<32x32xbf16>, vector<16x32xf32> -> vector<16x32xf32>
    %319 = arith.truncf %316 : vector<16x32xf32> to vector<16x32xbf16>
    %cst_104 = arith.constant dense<0.000000e+00> : vector<16x32xf32>
    %320 = tpu.matmul %319, %278, %cst_104 {dimension_numbers = #tpu.dot_dimension_numbers<[1], [0], [0], [1], [0, 0, 1, 1], [], []>} : vector<16x32xbf16>, vector<32x32xbf16>, vector<16x32xf32> -> vector<16x32xf32>
    %321 = arith.addf %318, %320 : vector<16x32xf32>
    %322 = vector.broadcast %279 : vector<1x32xf32> to vector<16x32xf32>
    %323 = arith.addf %321, %322 : vector<16x32xf32>
    %cst_105 = arith.constant dense<0.000000e+00> : vector<16xf32>
    %324 = vector.multi_reduction <add>, %323, %cst_105 [1] : vector<16x32xf32> to vector<16xf32>
    %325 = vector.shape_cast %324 : vector<16xf32> to vector<16x1xf32>
    %cst_106 = arith.constant 3.200000e+01 : f32
    %326 = vector.broadcast %cst_106 : f32 to vector<16x1xf32>
    %327 = arith.divf %325, %326 : vector<16x1xf32>
    %328 = vector.broadcast %327 : vector<16x1xf32> to vector<16x32xf32>
    %329 = arith.subf %323, %328 : vector<16x32xf32>
    %330 = arith.mulf %329, %329 : vector<16x32xf32>
    %cst_107 = arith.constant dense<0.000000e+00> : vector<16xf32>
    %331 = vector.multi_reduction <add>, %330, %cst_107 [1] : vector<16x32xf32> to vector<16xf32>
    %332 = vector.shape_cast %331 : vector<16xf32> to vector<16x1xf32>
    %cst_108 = arith.constant 3.200000e+01 : f32
    %333 = vector.broadcast %cst_108 : f32 to vector<16x1xf32>
    %334 = arith.divf %332, %333 : vector<16x1xf32>
    %cst_109 = arith.constant 9.99999974E-6 : f32
    %335 = vector.broadcast %cst_109 : f32 to vector<16x1xf32>
    %336 = arith.addf %334, %335 : vector<16x1xf32>
    %337 = math.rsqrt %336 : vector<16x1xf32>
    %338 = vector.broadcast %337 : vector<16x1xf32> to vector<16x32xf32>
    %339 = arith.mulf %329, %338 : vector<16x32xf32>
    %340 = vector.broadcast %280 : vector<1x32xf32> to vector<16x32xf32>
    %341 = arith.mulf %339, %340 : vector<16x32xf32>
    %342 = vector.broadcast %281 : vector<1x32xf32> to vector<16x32xf32>
    %343 = arith.addf %341, %342 : vector<16x32xf32>
    %344 = vector.extract_strided_slice %297 {offsets = [16, 0], sizes = [16, 32], strides = [1, 1]} : vector<32x32xf32> to vector<16x32xf32>
    %345 = vector.extract_strided_slice %283 {offsets = [16, 0], sizes = [16, 32], strides = [1, 1]} : vector<32x32xf32> to vector<16x32xf32>
    %cst_110 = arith.constant dense<0xFF800000> : vector<32xf32>
    %346 = vector.multi_reduction <maximumf>, %344, %cst_110 [0] : vector<16x32xf32> to vector<32xf32>
    %347 = vector.shape_cast %346 : vector<32xf32> to vector<1x32xf32>
    %348 = vector.broadcast %347 : vector<1x32xf32> to vector<16x32xf32>
    %349 = arith.subf %344, %348 : vector<16x32xf32>
    %350 = math.exp %349 : vector<16x32xf32>
    %cst_111 = arith.constant dense<0.000000e+00> : vector<32xf32>
    %351 = vector.multi_reduction <add>, %350, %cst_111 [0] : vector<16x32xf32> to vector<32xf32>
    %352 = vector.shape_cast %351 : vector<32xf32> to vector<1x32xf32>
    %353 = vector.broadcast %352 : vector<1x32xf32> to vector<16x32xf32>
    %354 = arith.divf %350, %353 : vector<16x32xf32>
    %355 = arith.mulf %354, %345 : vector<16x32xf32>
    %356 = arith.mulf %354, %345 : vector<16x32xf32>
    %357 = arith.mulf %356, %345 : vector<16x32xf32>
    %358 = arith.mulf %355, %355 : vector<16x32xf32>
    %359 = arith.subf %357, %358 : vector<16x32xf32>
    %cst_112 = arith.constant 9.99999974E-6 : f32
    %360 = vector.broadcast %cst_112 : f32 to vector<16x32xf32>
    %361 = arith.addf %359, %360 : vector<16x32xf32>
    %362 = math.sqrt %361 : vector<16x32xf32>
    %363 = arith.truncf %355 : vector<16x32xf32> to vector<16x32xbf16>
    %cst_113 = arith.constant dense<0.000000e+00> : vector<16x32xf32>
    %364 = tpu.matmul %363, %277, %cst_113 {dimension_numbers = #tpu.dot_dimension_numbers<[1], [0], [0], [1], [0, 0, 1, 1], [], []>} : vector<16x32xbf16>, vector<32x32xbf16>, vector<16x32xf32> -> vector<16x32xf32>
    %365 = arith.truncf %362 : vector<16x32xf32> to vector<16x32xbf16>
    %cst_114 = arith.constant dense<0.000000e+00> : vector<16x32xf32>
    %366 = tpu.matmul %365, %278, %cst_114 {dimension_numbers = #tpu.dot_dimension_numbers<[1], [0], [0], [1], [0, 0, 1, 1], [], []>} : vector<16x32xbf16>, vector<32x32xbf16>, vector<16x32xf32> -> vector<16x32xf32>
    %367 = arith.addf %364, %366 : vector<16x32xf32>
    %368 = vector.broadcast %279 : vector<1x32xf32> to vector<16x32xf32>
    %369 = arith.addf %367, %368 : vector<16x32xf32>
    %cst_115 = arith.constant dense<0.000000e+00> : vector<16xf32>
    %370 = vector.multi_reduction <add>, %369, %cst_115 [1] : vector<16x32xf32> to vector<16xf32>
    %371 = vector.shape_cast %370 : vector<16xf32> to vector<16x1xf32>
    %cst_116 = arith.constant 3.200000e+01 : f32
    %372 = vector.broadcast %cst_116 : f32 to vector<16x1xf32>
    %373 = arith.divf %371, %372 : vector<16x1xf32>
    %374 = vector.broadcast %373 : vector<16x1xf32> to vector<16x32xf32>
    %375 = arith.subf %369, %374 : vector<16x32xf32>
    %376 = arith.mulf %375, %375 : vector<16x32xf32>
    %cst_117 = arith.constant dense<0.000000e+00> : vector<16xf32>
    %377 = vector.multi_reduction <add>, %376, %cst_117 [1] : vector<16x32xf32> to vector<16xf32>
    %378 = vector.shape_cast %377 : vector<16xf32> to vector<16x1xf32>
    %cst_118 = arith.constant 3.200000e+01 : f32
    %379 = vector.broadcast %cst_118 : f32 to vector<16x1xf32>
    %380 = arith.divf %378, %379 : vector<16x1xf32>
    %cst_119 = arith.constant 9.99999974E-6 : f32
    %381 = vector.broadcast %cst_119 : f32 to vector<16x1xf32>
    %382 = arith.addf %380, %381 : vector<16x1xf32>
    %383 = math.rsqrt %382 : vector<16x1xf32>
    %384 = vector.broadcast %383 : vector<16x1xf32> to vector<16x32xf32>
    %385 = arith.mulf %375, %384 : vector<16x32xf32>
    %386 = vector.broadcast %280 : vector<1x32xf32> to vector<16x32xf32>
    %387 = arith.mulf %385, %386 : vector<16x32xf32>
    %388 = vector.broadcast %281 : vector<1x32xf32> to vector<16x32xf32>
    %389 = arith.addf %387, %388 : vector<16x32xf32>
    %390 = tpu.concatenate %343, %389 in 0 : vector<16x32xf32>, vector<16x32xf32> -> vector<32x32xf32>
    %391 = arith.subf %275, %390 : vector<32x32xf32>
    %c0_120 = arith.constant 0 : index
    %c448 = arith.constant 448 : index
    %392 = vector.load %arg3[%c0_120, %c448] : memref<32x960xbf16, #tpu.memory_space<vmem>>, vector<32x96xbf16>
    %c0_121 = arith.constant 0 : index
    %c544 = arith.constant 544 : index
    %393 = vector.load %arg3[%c0_121, %c544] : memref<32x960xbf16, #tpu.memory_space<vmem>>, vector<32x32xbf16>
    %c0_122 = arith.constant 0 : index
    %c576 = arith.constant 576 : index
    %394 = vector.load %arg3[%c0_122, %c576] : memref<32x960xbf16, #tpu.memory_space<vmem>>, vector<32x64xbf16>
    %c0_123 = arith.constant 0 : index
    %c32 = arith.constant 32 : index
    %395 = vector.load %arg4[%c0_123, %c32] : memref<64x64xbf16, #tpu.memory_space<vmem>>, vector<64x32xbf16>
    %c1_124 = arith.constant 1 : index
    %c0_125 = arith.constant 0 : index
    %396 = vector.load %arg7[%c1_124, %c0_125] : memref<2x160xf32, #tpu.memory_space<vmem>>, vector<1x96xf32>
    %c1_126 = arith.constant 1 : index
    %c96_127 = arith.constant 96 : index
    %397 = vector.load %arg7[%c1_126, %c96_127] : memref<2x160xf32, #tpu.memory_space<vmem>>, vector<1x64xf32>
    %c9 = arith.constant 9 : index
    %c0_128 = arith.constant 0 : index
    %398 = vector.load %arg6[%c9, %c0_128] : memref<18x32xf32, #tpu.memory_space<vmem>>, vector<1x32xf32>
    %c10 = arith.constant 10 : index
    %c0_129 = arith.constant 0 : index
    %399 = vector.load %arg6[%c10, %c0_129] : memref<18x32xf32, #tpu.memory_space<vmem>>, vector<1x32xf32>
    %c11 = arith.constant 11 : index
    %c0_130 = arith.constant 0 : index
    %400 = vector.load %arg6[%c11, %c0_130] : memref<18x32xf32, #tpu.memory_space<vmem>>, vector<1x32xf32>
    %c12 = arith.constant 12 : index
    %c0_131 = arith.constant 0 : index
    %401 = vector.load %arg6[%c12, %c0_131] : memref<18x32xf32, #tpu.memory_space<vmem>>, vector<1x32xf32>
    %c13 = arith.constant 13 : index
    %c0_132 = arith.constant 0 : index
    %402 = vector.load %arg6[%c13, %c0_132] : memref<18x32xf32, #tpu.memory_space<vmem>>, vector<1x32xf32>
    %c14 = arith.constant 14 : index
    %c0_133 = arith.constant 0 : index
    %403 = vector.load %arg6[%c14, %c0_133] : memref<18x32xf32, #tpu.memory_space<vmem>>, vector<1x32xf32>
    %404 = arith.truncf %391 : vector<32x32xf32> to vector<32x32xbf16>
    %cst_134 = arith.constant dense<0.000000e+00> : vector<32x96xf32>
    %405 = tpu.matmul %404, %392, %cst_134 {dimension_numbers = #tpu.dot_dimension_numbers<[1], [0], [0], [1], [0, 0, 1, 1], [], []>} : vector<32x32xbf16>, vector<32x96xbf16>, vector<32x96xf32> -> vector<32x96xf32>
    %406 = vector.broadcast %396 : vector<1x96xf32> to vector<32x96xf32>
    %407 = arith.addf %405, %406 : vector<32x96xf32>
    %408 = vector.extract_strided_slice %407 {offsets = [0, 0], sizes = [32, 32], strides = [1, 1]} : vector<32x96xf32> to vector<32x32xf32>
    %409 = vector.shape_cast %408 : vector<32x32xf32> to vector<32x4x8xf32>
    %410 = tpu.transpose %409, [1, 0, 2] : vector<32x4x8xf32> -> vector<4x32x8xf32>
    %411 = vector.extract_strided_slice %407 {offsets = [0, 32], sizes = [32, 32], strides = [1, 1]} : vector<32x96xf32> to vector<32x32xf32>
    %412 = vector.shape_cast %411 : vector<32x32xf32> to vector<32x4x8xf32>
    %413 = tpu.transpose %412, [1, 0, 2] : vector<32x4x8xf32> -> vector<4x32x8xf32>
    %414 = vector.extract_strided_slice %407 {offsets = [0, 64], sizes = [32, 32], strides = [1, 1]} : vector<32x96xf32> to vector<32x32xf32>
    %415 = vector.shape_cast %414 : vector<32x32xf32> to vector<32x4x8xf32>
    %416 = tpu.transpose %415, [1, 0, 2] : vector<32x4x8xf32> -> vector<4x32x8xf32>
    %417 = vector.extract_strided_slice %410 {offsets = [0, 0, 0], sizes = [4, 16, 8], strides = [1, 1, 1]} : vector<4x32x8xf32> to vector<4x16x8xf32>
    %418 = vector.extract_strided_slice %413 {offsets = [0, 0, 0], sizes = [4, 16, 8], strides = [1, 1, 1]} : vector<4x32x8xf32> to vector<4x16x8xf32>
    %419 = vector.extract_strided_slice %416 {offsets = [0, 0, 0], sizes = [4, 16, 8], strides = [1, 1, 1]} : vector<4x32x8xf32> to vector<4x16x8xf32>
    "tpu.trace_start"() <{level = 10 : i32, message = "htd,hsd->hts"}> : () -> ()
    %cst_135 = arith.constant dense<0.000000e+00> : vector<4x16x16xf32>
    %420 = tpu.matmul %417, %418, %cst_135 {dimension_numbers = #tpu.dot_dimension_numbers<[2], [2], [1], [1], [0, 0, 0, 1, 1, 1], [0], [0]>} : vector<4x16x8xf32>, vector<4x16x8xf32>, vector<4x16x16xf32> -> vector<4x16x16xf32>
    "tpu.trace_stop"() : () -> ()
    %cst_136 = arith.constant 0.353553385 : f32
    %421 = vector.broadcast %cst_136 : f32 to vector<4x16x16xf32>
    %422 = arith.mulf %420, %421 : vector<4x16x16xf32>
    %c0_137 = arith.constant 0 : index
    %c0_138 = arith.constant 0 : index
    %423 = vector.load %arg2[%c0_137, %c0_138] : memref<2x16xf32, #tpu.memory_space<vmem>>, vector<1x16xf32>
    %424 = vector.shape_cast %423 : vector<1x16xf32> to vector<1x1x16xf32>
    %425 = vector.broadcast %424 : vector<1x1x16xf32> to vector<4x16x16xf32>
    %426 = arith.addf %422, %425 : vector<4x16x16xf32>
    %cst_139 = arith.constant dense<0xFF800000> : vector<4x16xf32>
    %427 = vector.multi_reduction <maximumf>, %426, %cst_139 [2] : vector<4x16x16xf32> to vector<4x16xf32>
    %428 = vector.shape_cast %427 : vector<4x16xf32> to vector<4x16x1xf32>
    %429 = vector.broadcast %428 : vector<4x16x1xf32> to vector<4x16x16xf32>
    %430 = arith.subf %426, %429 : vector<4x16x16xf32>
    %431 = math.exp %430 : vector<4x16x16xf32>
    %cst_140 = arith.constant dense<0.000000e+00> : vector<4x16xf32>
    %432 = vector.multi_reduction <add>, %431, %cst_140 [2] : vector<4x16x16xf32> to vector<4x16xf32>
    %433 = vector.shape_cast %432 : vector<4x16xf32> to vector<4x16x1xf32>
    %434 = vector.broadcast %433 : vector<4x16x1xf32> to vector<4x16x16xf32>
    %435 = arith.divf %431, %434 : vector<4x16x16xf32>
    "tpu.trace_start"() <{level = 10 : i32, message = "hts,hsd->htd"}> : () -> ()
    %cst_141 = arith.constant dense<0.000000e+00> : vector<4x16x8xf32>
    %436 = tpu.matmul %435, %419, %cst_141 {dimension_numbers = #tpu.dot_dimension_numbers<[2], [1], [1], [2], [0, 0, 0, 1, 1, 2], [0], [0]>} : vector<4x16x16xf32>, vector<4x16x8xf32>, vector<4x16x8xf32> -> vector<4x16x8xf32>
    "tpu.trace_stop"() : () -> ()
    %437 = vector.extract_strided_slice %410 {offsets = [0, 16, 0], sizes = [4, 16, 8], strides = [1, 1, 1]} : vector<4x32x8xf32> to vector<4x16x8xf32>
    %438 = vector.extract_strided_slice %413 {offsets = [0, 16, 0], sizes = [4, 16, 8], strides = [1, 1, 1]} : vector<4x32x8xf32> to vector<4x16x8xf32>
    %439 = vector.extract_strided_slice %416 {offsets = [0, 16, 0], sizes = [4, 16, 8], strides = [1, 1, 1]} : vector<4x32x8xf32> to vector<4x16x8xf32>
    "tpu.trace_start"() <{level = 10 : i32, message = "htd,hsd->hts"}> : () -> ()
    %cst_142 = arith.constant dense<0.000000e+00> : vector<4x16x16xf32>
    %440 = tpu.matmul %437, %438, %cst_142 {dimension_numbers = #tpu.dot_dimension_numbers<[2], [2], [1], [1], [0, 0, 0, 1, 1, 1], [0], [0]>} : vector<4x16x8xf32>, vector<4x16x8xf32>, vector<4x16x16xf32> -> vector<4x16x16xf32>
    "tpu.trace_stop"() : () -> ()
    %cst_143 = arith.constant 0.353553385 : f32
    %441 = vector.broadcast %cst_143 : f32 to vector<4x16x16xf32>
    %442 = arith.mulf %440, %441 : vector<4x16x16xf32>
    %c1_144 = arith.constant 1 : index
    %c0_145 = arith.constant 0 : index
    %443 = vector.load %arg2[%c1_144, %c0_145] : memref<2x16xf32, #tpu.memory_space<vmem>>, vector<1x16xf32>
    %444 = vector.shape_cast %443 : vector<1x16xf32> to vector<1x1x16xf32>
    %445 = vector.broadcast %444 : vector<1x1x16xf32> to vector<4x16x16xf32>
    %446 = arith.addf %442, %445 : vector<4x16x16xf32>
    %cst_146 = arith.constant dense<0xFF800000> : vector<4x16xf32>
    %447 = vector.multi_reduction <maximumf>, %446, %cst_146 [2] : vector<4x16x16xf32> to vector<4x16xf32>
    %448 = vector.shape_cast %447 : vector<4x16xf32> to vector<4x16x1xf32>
    %449 = vector.broadcast %448 : vector<4x16x1xf32> to vector<4x16x16xf32>
    %450 = arith.subf %446, %449 : vector<4x16x16xf32>
    %451 = math.exp %450 : vector<4x16x16xf32>
    %cst_147 = arith.constant dense<0.000000e+00> : vector<4x16xf32>
    %452 = vector.multi_reduction <add>, %451, %cst_147 [2] : vector<4x16x16xf32> to vector<4x16xf32>
    %453 = vector.shape_cast %452 : vector<4x16xf32> to vector<4x16x1xf32>
    %454 = vector.broadcast %453 : vector<4x16x1xf32> to vector<4x16x16xf32>
    %455 = arith.divf %451, %454 : vector<4x16x16xf32>
    "tpu.trace_start"() <{level = 10 : i32, message = "hts,hsd->htd"}> : () -> ()
    %cst_148 = arith.constant dense<0.000000e+00> : vector<4x16x8xf32>
    %456 = tpu.matmul %455, %439, %cst_148 {dimension_numbers = #tpu.dot_dimension_numbers<[2], [1], [1], [2], [0, 0, 0, 1, 1, 2], [0], [0]>} : vector<4x16x16xf32>, vector<4x16x8xf32>, vector<4x16x8xf32> -> vector<4x16x8xf32>
    "tpu.trace_stop"() : () -> ()
    %457 = tpu.concatenate %436, %456 in 1 : vector<4x16x8xf32>, vector<4x16x8xf32> -> vector<4x32x8xf32>
    %458 = tpu.transpose %457, [1, 0, 2] : vector<4x32x8xf32> -> vector<32x4x8xf32>
    %459 = vector.shape_cast %458 : vector<32x4x8xf32> to vector<32x32xf32>
    %460 = arith.truncf %459 : vector<32x32xf32> to vector<32x32xbf16>
    %cst_149 = arith.constant dense<0.000000e+00> : vector<32x32xf32>
    %461 = tpu.matmul %460, %393, %cst_149 {dimension_numbers = #tpu.dot_dimension_numbers<[1], [0], [0], [1], [0, 0, 1, 1], [], []>} : vector<32x32xbf16>, vector<32x32xbf16>, vector<32x32xf32> -> vector<32x32xf32>
    %462 = vector.broadcast %398 : vector<1x32xf32> to vector<32x32xf32>
    %463 = arith.addf %461, %462 : vector<32x32xf32>
    %464 = arith.addf %391, %463 : vector<32x32xf32>
    %cst_150 = arith.constant dense<0.000000e+00> : vector<32xf32>
    %465 = vector.multi_reduction <add>, %464, %cst_150 [1] : vector<32x32xf32> to vector<32xf32>
    %466 = vector.shape_cast %465 : vector<32xf32> to vector<32x1xf32>
    %cst_151 = arith.constant 3.200000e+01 : f32
    %467 = vector.broadcast %cst_151 : f32 to vector<32x1xf32>
    %468 = arith.divf %466, %467 : vector<32x1xf32>
    %469 = vector.broadcast %468 : vector<32x1xf32> to vector<32x32xf32>
    %470 = arith.subf %464, %469 : vector<32x32xf32>
    %471 = arith.mulf %470, %470 : vector<32x32xf32>
    %cst_152 = arith.constant dense<0.000000e+00> : vector<32xf32>
    %472 = vector.multi_reduction <add>, %471, %cst_152 [1] : vector<32x32xf32> to vector<32xf32>
    %473 = vector.shape_cast %472 : vector<32xf32> to vector<32x1xf32>
    %cst_153 = arith.constant 3.200000e+01 : f32
    %474 = vector.broadcast %cst_153 : f32 to vector<32x1xf32>
    %475 = arith.divf %473, %474 : vector<32x1xf32>
    %cst_154 = arith.constant 9.99999974E-6 : f32
    %476 = vector.broadcast %cst_154 : f32 to vector<32x1xf32>
    %477 = arith.addf %475, %476 : vector<32x1xf32>
    %478 = math.rsqrt %477 : vector<32x1xf32>
    %479 = vector.broadcast %478 : vector<32x1xf32> to vector<32x32xf32>
    %480 = arith.mulf %470, %479 : vector<32x32xf32>
    %481 = vector.broadcast %399 : vector<1x32xf32> to vector<32x32xf32>
    %482 = arith.mulf %480, %481 : vector<32x32xf32>
    %483 = vector.broadcast %400 : vector<1x32xf32> to vector<32x32xf32>
    %484 = arith.addf %482, %483 : vector<32x32xf32>
    %485 = arith.truncf %484 : vector<32x32xf32> to vector<32x32xbf16>
    %cst_155 = arith.constant dense<0.000000e+00> : vector<32x64xf32>
    %486 = tpu.matmul %485, %394, %cst_155 {dimension_numbers = #tpu.dot_dimension_numbers<[1], [0], [0], [1], [0, 0, 1, 1], [], []>} : vector<32x32xbf16>, vector<32x64xbf16>, vector<32x64xf32> -> vector<32x64xf32>
    %487 = vector.broadcast %397 : vector<1x64xf32> to vector<32x64xf32>
    %488 = arith.addf %486, %487 : vector<32x64xf32>
    %cst_156 = arith.constant 0.000000e+00 : f32
    %489 = vector.broadcast %cst_156 : f32 to vector<32x64xf32>
    %490 = arith.maximumf %488, %489 : vector<32x64xf32>
    %491 = arith.truncf %490 : vector<32x64xf32> to vector<32x64xbf16>
    %cst_157 = arith.constant dense<0.000000e+00> : vector<32x32xf32>
    %492 = tpu.matmul %491, %395, %cst_157 {dimension_numbers = #tpu.dot_dimension_numbers<[1], [0], [0], [1], [0, 0, 1, 1], [], []>} : vector<32x64xbf16>, vector<64x32xbf16>, vector<32x32xf32> -> vector<32x32xf32>
    %493 = vector.broadcast %401 : vector<1x32xf32> to vector<32x32xf32>
    %494 = arith.addf %492, %493 : vector<32x32xf32>
    %495 = arith.addf %484, %494 : vector<32x32xf32>
    %cst_158 = arith.constant dense<0.000000e+00> : vector<32xf32>
    %496 = vector.multi_reduction <add>, %495, %cst_158 [1] : vector<32x32xf32> to vector<32xf32>
    %497 = vector.shape_cast %496 : vector<32xf32> to vector<32x1xf32>
    %cst_159 = arith.constant 3.200000e+01 : f32
    %498 = vector.broadcast %cst_159 : f32 to vector<32x1xf32>
    %499 = arith.divf %497, %498 : vector<32x1xf32>
    %500 = vector.broadcast %499 : vector<32x1xf32> to vector<32x32xf32>
    %501 = arith.subf %495, %500 : vector<32x32xf32>
    %502 = arith.mulf %501, %501 : vector<32x32xf32>
    %cst_160 = arith.constant dense<0.000000e+00> : vector<32xf32>
    %503 = vector.multi_reduction <add>, %502, %cst_160 [1] : vector<32x32xf32> to vector<32xf32>
    %504 = vector.shape_cast %503 : vector<32xf32> to vector<32x1xf32>
    %cst_161 = arith.constant 3.200000e+01 : f32
    %505 = vector.broadcast %cst_161 : f32 to vector<32x1xf32>
    %506 = arith.divf %504, %505 : vector<32x1xf32>
    %cst_162 = arith.constant 9.99999974E-6 : f32
    %507 = vector.broadcast %cst_162 : f32 to vector<32x1xf32>
    %508 = arith.addf %506, %507 : vector<32x1xf32>
    %509 = math.rsqrt %508 : vector<32x1xf32>
    %510 = vector.broadcast %509 : vector<32x1xf32> to vector<32x32xf32>
    %511 = arith.mulf %501, %510 : vector<32x32xf32>
    %512 = vector.broadcast %402 : vector<1x32xf32> to vector<32x32xf32>
    %513 = arith.mulf %511, %512 : vector<32x32xf32>
    %514 = vector.broadcast %403 : vector<1x32xf32> to vector<32x32xf32>
    %515 = arith.addf %513, %514 : vector<32x32xf32>
    %c0_163 = arith.constant 0 : index
    %c0_164 = arith.constant 0 : index
    %c0_165 = arith.constant 0 : index
    %516 = vector.load %arg8[%c0_163, %c0_164, %c0_165] : memref<3x32x32xf32, #tpu.memory_space<vmem>>, vector<1x32x32xf32>
    %517 = vector.shape_cast %516 : vector<1x32x32xf32> to vector<32x32xf32>
    %518 = vector.shape_cast %390 : vector<32x32xf32> to vector<1x32x32xf32>
    tpu.vector_store %arg8[%c0_163, %c0_164, %c0_165], %518 {strides = array<i32>} : memref<3x32x32xf32, #tpu.memory_space<vmem>>, vector<1x32x32xf32>,
    %c1_166 = arith.constant 1 : index
    %c0_167 = arith.constant 0 : index
    %c0_168 = arith.constant 0 : index
    %519 = vector.load %arg8[%c1_166, %c0_167, %c0_168] : memref<3x32x32xf32, #tpu.memory_space<vmem>>, vector<1x32x32xf32>
    %520 = vector.shape_cast %519 : vector<1x32x32xf32> to vector<32x32xf32>
    %521 = vector.shape_cast %391 : vector<32x32xf32> to vector<1x32x32xf32>
    tpu.vector_store %arg8[%c1_166, %c0_167, %c0_168], %521 {strides = array<i32>} : memref<3x32x32xf32, #tpu.memory_space<vmem>>, vector<1x32x32xf32>,
    %c2_169 = arith.constant 2 : index
    %c0_170 = arith.constant 0 : index
    %c0_171 = arith.constant 0 : index
    %522 = vector.load %arg8[%c2_169, %c0_170, %c0_171] : memref<3x32x32xf32, #tpu.memory_space<vmem>>, vector<1x32x32xf32>
    %523 = vector.shape_cast %522 : vector<1x32x32xf32> to vector<32x32xf32>
    %524 = vector.shape_cast %515 : vector<32x32xf32> to vector<1x32x32xf32>
    tpu.vector_store %arg8[%c2_169, %c0_170, %c0_171], %524 {strides = array<i32>} : memref<3x32x32xf32, #tpu.memory_space<vmem>>, vector<1x32x32xf32>,
    return
  }
}

</mosaic_0001>

<bundles_post_ra>
// kernel: transformer_encoder_forward.1
= control target key start
LH: loop header
LB: loop body
LE: loop exit
PB: predicated region body
PF: predicated region fallthrough
CT: control target
= control target key end

     0   :  { %v11425_v0 = vmov 0   ;;  %vm88_vm0 = vcmask 261120   ;;  %vm159_vm1 = vcmask 1042432   ;;  %vm172_vm2 = vcmask 1041408   ;;  %s11427_s29 = smov 96   ;;  %s11428_s30 = smov 32   ;;  %s13711_s1 = inlined_call_operand.vmem [shape: f32[32,1], index: 1, kind: input, shape index: {}]   ;;  %s13712_s3 = inlined_call_operand.vmem [shape: bf16[32,960], index: 3, kind: input, shape index: {}]   ;;  %s13713_s0 = inlined_call_operand.vmem [shape: f32[32,32], index: 0, kind: input, shape index: {}]   ;;  %s13714_s6 = inlined_call_operand.vmem [shape: f32[18,32], index: 6, kind: input, shape index: {}]   ;;  %s13715_s7 = inlined_call_operand.vmem [shape: f32[2,160], index: 7, kind: input, shape index: {}]   ;;  %s13716_s2 = inlined_call_operand.vmem [shape: f32[2,16], index: 2, kind: input, shape index: {}]   ;;  %s13717_s4 = inlined_call_operand.vmem [shape: bf16[64,64], index: 4, kind: input, shape index: {}]   ;;  %s13718_s5 = inlined_call_operand.vmem [shape: bf16[256,32], index: 5, kind: input, shape index: {}]   ;;  %s13719_s8 = inlined_call_operand.vmem [shape: f32[3,32,32], index: 8, kind: output, shape index: {}]  }
   0x1   :  { %11108 = vset.pattern.permute.xlu1 %v11425_v0  ;;  %11107 = vset.pattern.permute.xlu0 %v11425_v0  ;;  %v32_v1 = vld [vmem:[%s13711_s1 + $0x10] sm:$0xff]  ;;  %v30_v2 = vld [vmem:[%s13711_s1] sm:$0xff]  ;;  %v33_v3 = vld [vmem:[%s13711_s1 + $0x18] sm:$0xff]  ;;  %vm185_vm3 = vcmask 1040384   ;;  %vm202_vm4 = vcmask 1046528   ;;  %vm217_vm5 = vcmask 1045504  }
   0x2   :  { %50 = vperm.xlu1 %11108, %v32_v1   ;;  %40 = vperm.xlu0 %11107, %v30_v2   ;;  %v31_v4 = vld [vmem:[%s13711_s1 + $0x8] sm:$0xff]  ;;  %v64_v5 = vld [vmem:[%s13712_s3] sm:$0xff]  ;;  %v36_v14 = vld [vmem:[%s13713_s0 + $0x10] sm:$0xff]  ;;  %vm232_vm6 = vcmask 1044480   ;;  %vm150_vm7 = vcmask 1043456   ;;  %s11429_s25 = smov 120  }
   0x3   :  { %v65_v6 = vld [vmem:[%s13712_s3 + $0x20] sm:$0xff]  ;;  %127 = vmatprep.mubr.bf16.mxu0 %v11425_v0  ;;  %137 = vmatprep.mubr.bf16.mxu1 %v11425_v0  ;;  %v37_v17 = vld [vmem:[%s13713_s0 + $0x18] sm:$0xff]  ;;  %v35_v18 = vld [vmem:[%s13713_s0 + $0x8] sm:$0xff]  ;;  %s11430_s26 = smov 112   ;;  %s11431_s27 = smov 104   ;;  %vm2396_vm12 = vcmask 64512  }
   0x4   :  { %v66_v7 = vld [vmem:[%s13712_s3 + $0x40] sm:$0xff]  ;;  %v10138_v8 = vcombine.high %v64_v5, %v65_v6  ;;  %v10137_v10 = vcombine.low %v64_v5, %v65_v6  ;;  %vm11916_vm13 = vmpackc.low %vm2396_vm12, %vm2396_vm12  ;;  %vm2766_vm14 = vcmask 130048   ;;  %s11434_s12 = smov 16   ;;  %s11435_s13 = smov 24   ;;  %vm4560_vm15 = vcmask 195584  }
   0x5   :  { %v67_v9 = vld [vmem:[%s13712_s3 + $0x60] sm:$0xff]  ;;  %s11436_s14 = smov 8  }
   0x6   :  { %v10140_v11 = vcombine.high %v66_v7, %v67_v9  ;;  %55 = vperm.xlu1 %11108, %v33_v3   ;;  %45 = vperm.xlu0 %11107, %v31_v4   ;;  %v10139_v12 = vcombine.low %v66_v7, %v67_v9  ;;  %v34_v16 = vld [vmem:[%s13713_s0] sm:$0xff]  ;;  %s11426_s0 = smov 64  }
   0x7   :  { %95 = vmatprep.subr.bf16.mxu0 %v10138_v8  ;;  %11089 = vmatprep.subr.bf16.mxu1 %v10138_v8 }
   0x8   :  { %96 = vmatpush1.bf16.msra.mxu0 %v10137_v10  ;;  %11091 = vmatpush1.bf16.msra.mxu1 %v10137_v10 }
   0x9   :  { %97 = vmatprep.subr.bf16.mxu0 %v10140_v11  ;;  %11090 = vmatprep.subr.bf16.mxu1 %v10140_v11 }
   0xc   :  { %98 = vmatpush1.bf16.msra.mxu0 %v10139_v12  ;;  %11092 = vmatpush1.bf16.msra.mxu1 %v10139_v12 }
  0x81   :  { %v11512_v13 = vpop.permute.xlu1 %50  ;;  %v11517_v15 = vpop.permute.xlu0 %40 }
  0x82   :  { %v11529_v19 = vmul.f32 %v11512_v13, %v36_v14  ;;  %v11536_v22 = vmul.f32 %v11517_v15, %v34_v16 }
  0x85   :  { %v11531_v20 = vpop.permute.xlu1 %55  ;;  %v11533_v21 = vpop.permute.xlu0 %45 }
  0x86   :  { %v11539_v23 = vmul.f32 %v11531_v20, %v37_v17  ;;  %v11542_v24 = vmul.f32 %v11533_v21, %v35_v18 }
  0x88   :  { %v62_v25 = vpack.c.bf16 %v11542_v24, %v11536_v22  ;;  %v63_v26 = vpack.c.bf16 %v11539_v23, %v11529_v19 }
  0x8a   :  { %10141 = vmatmul.mubr.msk.bf16.vlgmr.msra.gmra.mrb[0].mxu0 %vm88_vm0, %v62_v25  ;;  %10142 = vmatmul.mubr.msk.bf16.vlgmr.msra.gmra.mrb[0].mxu1 %vm88_vm0, %v63_v26 }
 0x15d   :  { %v11550_v27 = vpop.f32.mrb[0].mxu0  ;;  %v11552_v28 = vpop.f32.mrb[0].mxu1 }
 0x15e   :  { %v11554_v29 = vpop.f32.mrb[1].mxu0  ;;  %v11556_v30 = vpop.f32.mrb[1].mxu1  ;;  %v173_v31 = vrot.slane %v11550_v27, 6  ;;  %v160_v32 = vrot.slane %v11550_v27, 5  ;;  %v186_v35 = vrot.slane %v11550_v27, 7  ;;  %v257_v36 = vrot.slane %v11552_v28, 5 }
 0x15f   :  { %v133_v33 = vpop.f32.mrb[2].mxu0  ;;  %v143_v34 = vpop.f32.mrb[2].mxu1  ;;  %v203_v37 = vrot.slane %v11554_v29, 1  ;;  %v218_v38 = vrot.slane %v11554_v29, 2  ;;  %v297_v39 = vrot.slane %v11556_v30, 1  ;;  %v311_v43 = vrot.slane %v11556_v30, 2 }
 0x160   :  { %v161_v40 = vrot.slane %v133_v33, 5  ;;  %v11565_v41 = vpop.f32.mrb[3].mxu1  ;;  %176 = vrot.lane.b32.xlu1 %v173_v31, %s11426_s0  ;;  %163 = vrot.lane.b32.xlu0 %v160_v32, %s11427_s29  ;;  %v11569_v42 = vpop.f32.mrb[3].mxu0  ;;  %v174_v44 = vrot.slane %v133_v33, 6  ;;  %v187_v45 = vrot.slane %v133_v33, 7  ;;  %v258_v46 = vrot.slane %v143_v34, 5 }
 0x161   :  { %v270_v47 = vrot.slane %v143_v34, 6  ;;  %v282_v48 = vrot.slane %v143_v34, 7  ;;  %v269_v49 = vrot.slane %v11552_v28, 6  ;;  %v281_v51 = vrot.slane %v11552_v28, 7 }
 0x162   :  { %v162_v50 = vsel %vm159_vm1, %v160_v32, %v161_v40  ;;  %v175_v52 = vsel %vm172_vm2, %v173_v31, %v174_v44  ;;  %v259_v53 = vsel %vm159_vm1, %v257_v36, %v258_v46  ;;  %v188_v54 = vsel %vm185_vm3, %v186_v35, %v187_v45 }
 0x163   :  { %v271_v55 = vsel %vm172_vm2, %v269_v49, %v270_v47  ;;  %v204_v56 = vrot.slane %v11569_v42, 1  ;;  %v298_v57 = vrot.slane %v11565_v41, 1  ;;  %v219_v58 = vrot.slane %v11569_v42, 2 }
 0x164   :  { %189 = vrot.lane.b32.xlu1 %v186_v35, %s11428_s30  ;;  %260 = vrot.lane.b32.xlu0 %v257_v36, %s11427_s29  ;;  %v283_v59 = vsel %vm185_vm3, %v281_v51, %v282_v48  ;;  %v312_v60 = vrot.slane %v11565_v41, 2  ;;  %v234_v61 = vrot.slane %v11569_v42, 3  ;;  %v326_v62 = vrot.slane %v11565_v41, 3 }
 0x165   :  { %v233_v63 = vrot.slane %v11554_v29, 3  ;;  %v325_v1 = vrot.slane %v11556_v30, 3  ;;  %v205_v2 = vsel %vm202_vm4, %v203_v37, %v204_v56  ;;  %v299_v3 = vsel %vm202_vm4, %v297_v39, %v298_v57 }
 0x166   :  { %v152_v4 = vrot.slane %v133_v33, 4  ;;  %v250_v5 = vrot.slane %v143_v34, 4  ;;  %v220_v6 = vsel %vm217_vm5, %v218_v38, %v219_v58  ;;  %v313_v7 = vsel %vm217_vm5, %v311_v43, %v312_v60 }
 0x167   :  { %v235_v8 = vsel %vm232_vm6, %v233_v63, %v234_v61  ;;  %v327_v9 = vsel %vm232_vm6, %v325_v1, %v326_v62  ;;  %v151_v10 = vrot.slane %v11550_v27, 4  ;;  %v249_v11 = vrot.slane %v11552_v28, 4 }
 0x168   :  { %272 = vrot.lane.b32.xlu0 %v269_v49, %s11426_s0  ;;  %165 = vrot.lane.b32.xlu1 %v162_v50, %s11427_s29  ;;  %v207_v16 = vsel %vm202_vm4, %v204_v56, 0.0  ;;  %v301_v17 = vsel %vm202_vm4, %v298_v57, 0.0  ;;  %v222_v18 = vsel %vm217_vm5, %v219_v58, 0.0  ;;  %v315_v25 = vsel %vm217_vm5, %v312_v60, 0.0 }
 0x169   :  { %v153_v12 = vsel %vm150_vm7, %v151_v10, %v152_v4  ;;  %v251_v14 = vsel %vm150_vm7, %v249_v11, %v250_v5  ;;  %v237_v26 = vsel %vm232_vm6, %v234_v61, 0.0  ;;  %v329_v27 = vsel %vm232_vm6, %v326_v62, 0.0 }
 0x16a   :  { %v156_v32 = vsel %vm150_vm7, 0.0, %v151_v10  ;;  %v254_v47 = vsel %vm150_vm7, 0.0, %v249_v11 }
 0x16c   :  { %284 = vrot.lane.b32.xlu0 %v281_v51, %s11428_s30  ;;  %178 = vrot.lane.b32.xlu1 %v175_v52, %s11426_s0 }
 0x170   :  { %262 = vrot.lane.b32.xlu0 %v259_v53, %s11427_s29  ;;  %191 = vrot.lane.b32.xlu1 %v188_v54, %s11428_s30 }
 0x174   :  { %274 = vrot.lane.b32.xlu0 %v271_v55, %s11426_s0  ;;  %286 = vrot.lane.b32.xlu1 %v283_v59, %s11428_s30 }
 0x178   :  { %211 = vrot.lane.b32.xlu1 %v207_v16, %s11427_s29  ;;  %209 = vrot.lane.b32.xlu0 %v205_v2, %s11427_s29 }
 0x17c   :  { %305 = vrot.lane.b32.xlu1 %v301_v17, %s11427_s29  ;;  %303 = vrot.lane.b32.xlu0 %v299_v3, %s11427_s29 }
 0x180   :  { %226 = vrot.lane.b32.xlu1 %v222_v18, %s11426_s0  ;;  %224 = vrot.lane.b32.xlu0 %v220_v6, %s11426_s0 }
 0x184   :  { %319 = vrot.lane.b32.xlu1 %v315_v25, %s11426_s0  ;;  %317 = vrot.lane.b32.xlu0 %v313_v7, %s11426_s0 }
 0x188   :  { %241 = vrot.lane.b32.xlu1 %v237_v26, %s11428_s30  ;;  %239 = vrot.lane.b32.xlu0 %v235_v8, %s11428_s30 }
 0x18c   :  { %333 = vrot.lane.b32.xlu1 %v329_v27, %s11428_s30  ;;  %331 = vrot.lane.b32.xlu0 %v327_v9, %s11428_s30 }
 0x1d2   :  { %v177_v28 = vpop.permute.xlu1 %176  ;;  %v164_v31 = vpop.permute.xlu0 %163 }
 0x1d3   :  { %v169_v33 = vsel %vm159_vm1, 0.0, %v164_v31  ;;  %v182_v35 = vsel %vm172_vm2, 0.0, %v177_v28 }
 0x1d4   :  { %v170_v34 = vadd.f32 %v169_v33, %v156_v32 }
 0x1d6   :  { %v190_v36 = vpop.permute.xlu1 %189  ;;  %v183_v37 = vadd.f32 %v182_v35, %v170_v34  ;;  %v261_v38 = vpop.permute.xlu0 %260 }
 0x1d7   :  { %v195_v39 = vsel %vm185_vm3, 0.0, %v190_v36  ;;  %v266_v43 = vsel %vm159_vm1, 0.0, %v261_v38  ;;  %vm4834_vm1 = vcmask 523264  }
 0x1d8   :  { %v196_v40 = vadd.f32 %v195_v39, %v183_v37  ;;  %v267_v49 = vadd.f32 %v266_v43, %v254_v47 }
 0x1da   :  { %v273_v44 = vpop.permute.xlu0 %272  ;;  %v166_v45 = vpop.permute.xlu1 %165  ;;  %v198_v46 = vadd.f32 %v196_v40, %v11554_v29 }
 0x1db   :  { %v278_v48 = vsel %vm172_vm2, 0.0, %v273_v44  ;;  %v171_v53 = vadd.f32 %v166_v45, %v153_v12  ;;  %vm11438_vm2 = vmmov 0  }
 0x1dc   :  { %v279_v50 = vadd.f32 %v278_v48, %v267_v49 }
 0x1de   :  { %v285_v51 = vpop.permute.xlu0 %284  ;;  %v179_v52 = vpop.permute.xlu1 %178 }
 0x1df   :  { %v290_v54 = vsel %vm185_vm3, 0.0, %v285_v51  ;;  %v184_v56 = vadd.f32 %v179_v52, %v171_v53 }
 0x1e0   :  { %v291_v55 = vadd.f32 %v290_v54, %v279_v50 }
 0x1e2   :  { %v263_v57 = vpop.permute.xlu0 %262  ;;  %v192_v58 = vpop.permute.xlu1 %191  ;;  %v293_v59 = vadd.f32 %v291_v55, %v11556_v30 }
 0x1e3   :  { %v197_v60 = vadd.f32 %v192_v58, %v184_v56  ;;  %v268_v61 = vadd.f32 %v263_v57, %v251_v14 }
 0x1e5   :  { %v199_v29 = vadd.f32 %v197_v60, %v11569_v42  ;;  %v10143_v42 = vld [vmem:[%s13714_s6] ss:$0 sm:$0xff] }
 0x1e6   :  { %v275_v62 = vpop.permute.xlu0 %274  ;;  %v287_v63 = vpop.permute.xlu1 %286 }
 0x1e7   :  { %v280_v1 = vadd.f32 %v275_v62, %v268_v61 }
 0x1e9   :  { %v292_v2 = vadd.f32 %v287_v63, %v280_v1 }
 0x1ea   :  { %v212_v3 = vpop.permute.xlu1 %211  ;;  %v210_v4 = vpop.permute.xlu0 %209 }
 0x1eb   :  { %v294_v5 = vadd.f32 %v292_v2, %v11565_v41  ;;  %v216_v12 = vadd.f32 %v212_v3, %v199_v29  ;;  %v215_v30 = vadd.f32 %v210_v4, %v198_v46 }
 0x1ee   :  { %v306_v6 = vpop.permute.xlu1 %305  ;;  %v304_v7 = vpop.permute.xlu0 %303 }
 0x1ef   :  { %v310_v27 = vadd.f32 %v306_v6, %v294_v5  ;;  %v309_v41 = vadd.f32 %v304_v7, %v293_v59 }
 0x1f2   :  { %v227_v8 = vpop.permute.xlu1 %226  ;;  %v225_v9 = vpop.permute.xlu0 %224 }
 0x1f3   :  { %v231_v16 = vadd.f32 %v227_v8, %v216_v12  ;;  %v230_v14 = vadd.f32 %v225_v9, %v215_v30 }
 0x1f6   :  { %v320_v10 = vpop.permute.xlu1 %319  ;;  %v318_v11 = vpop.permute.xlu0 %317 }
 0x1f7   :  { %v324_v32 = vadd.f32 %v320_v10, %v310_v27  ;;  %v323_v33 = vadd.f32 %v318_v11, %v309_v41 }
 0x1fa   :  { %v242_v17 = vpop.permute.xlu1 %241  ;;  %v240_v18 = vpop.permute.xlu0 %239 }
 0x1fb   :  { %v246_v25 = vadd.f32 %v242_v17, %v231_v16  ;;  %v245_v26 = vadd.f32 %v240_v18, %v230_v14 }
 0x1fd   :  { %v11641_v28 = vadd.f32 %v10143_v42, %v246_v25  ;;  %v11643_v31 = vadd.f32 %v10143_v42, %v245_v26 }
 0x1fe   :  { %v334_v34 = vpop.permute.xlu1 %333  ;;  %v332_v35 = vpop.permute.xlu0 %331 }
 0x1ff   :  { %v11646_v36 = vmul.f32 0.70710677, %v11641_v28  ;;  %v11649_v37 = vmul.f32 0.70710677, %v11643_v31  ;;  %v338_v38 = vadd.f32 %v334_v34, %v324_v32  ;;  %v337_v39 = vadd.f32 %v332_v35, %v323_v33 }
 0x201   :  { %v357_v40 = vand.u32 2147483647, %v11646_v36  ;;  %v356_v43 = vand.u32 2147483647, %v11649_v37  ;;  %v11653_v44 = vadd.f32 %v10143_v42, %v338_v38  ;;  %v11655_v45 = vadd.f32 %v10143_v42, %v337_v39 }
 0x202   :  { %vm437_vm8 = vcmp.ge.f32.partialorder %v11646_v36, 0.0  ;;  %vm436_vm9 = vcmp.ge.f32.partialorder %v11649_v37, 0.0 }
 0x203   :  { %v361_v46 = vmul.f32 0.3275911, %v357_v40  ;;  %v360_v47 = vmul.f32 0.3275911, %v356_v43  ;;  %v11658_v48 = vmul.f32 0.70710677, %v11653_v44 }
 0x204   :  { %v11661_v49 = vmul.f32 0.70710677, %v11655_v45  ;;  %v413_v58 = vsub.f32 0.0, %v357_v40  ;;  %v412_v59 = vsub.f32 0.0, %v356_v43 }
 0x205   :  { %v365_v50 = vadd.f32 1.0, %v361_v46  ;;  %v364_v51 = vadd.f32 1.0, %v360_v47  ;;  %v359_v52 = vand.u32 2147483647, %v11658_v48  ;;  %vm439_vm10 = vcmp.ge.f32.partialorder %v11658_v48, 0.0 }
 0x206   :  { %v358_v53 = vand.u32 2147483647, %v11661_v49  ;;  %v417_v61 = vmul.f32 %v413_v58, %v357_v40  ;;  %v416_v62 = vmul.f32 %v412_v59, %v356_v43  ;;  %vm438_vm11 = vcmp.ge.f32.partialorder %v11661_v49, 0.0 }
 0x207   :  { %11193 = vrcp.f32 %v365_v50  ;;  %v363_v54 = vmul.f32 0.3275911, %v359_v52  ;;  %v415_v63 = vsub.f32 0.0, %v359_v52 }
 0x208   :  { %11195 = vrcp.f32 %v364_v51  ;;  %v362_v55 = vmul.f32 0.3275911, %v358_v53  ;;  %v414_v2 = vsub.f32 0.0, %v358_v53  ;;  %v422_v5 = vmul.f32 1.442695, %v417_v61 }
 0x209   :  { %v367_v56 = vadd.f32 1.0, %v363_v54  ;;  %v420_v8 = vmul.f32 1.442695, %v416_v62  ;;  %v419_v9 = vmul.f32 %v415_v63, %v359_v52 }
 0x20a   :  { %v366_v57 = vadd.f32 1.0, %v362_v55  ;;  %v418_v12 = vmul.f32 %v414_v2, %v358_v53 }
 0x20b   :  { %11197 = vrcp.f32 %v367_v56  ;;  %v426_v25 = vmul.f32 1.442695, %v419_v9 }
 0x20c   :  { %11199 = vrcp.f32 %v366_v57  ;;  %v424_v41 = vmul.f32 1.442695, %v418_v12 }
 0x20d   :  { %11201 = vpow2.f32 %v422_v5 }
 0x20e   :  { %11203 = vpow2.f32 %v420_v8 }
 0x20f   :  { %11205 = vpow2.f32 %v426_v25 }
 0x210   :  { %11207 = vpow2.f32 %v424_v41 }
 0x211   :  { %v11194_v60 = vpop.eup %11193 }
 0x212   :  { %v11196_v29 = vpop.eup %11195  ;;  %v377_v1 = vmul.f32 1.0614054, %v11194_v60 }
 0x213   :  { %v376_v3 = vmul.f32 1.0614054, %v11196_v29 }
 0x214   :  { %v381_v4 = vadd.f32 -1.4531521, %v377_v1 }
 0x215   :  { %v380_v6 = vadd.f32 -1.4531521, %v376_v3  ;;  %v11198_v7 = vpop.eup %11197 }
 0x216   :  { %v385_v10 = vmul.f32 %v11194_v60, %v381_v4  ;;  %v11200_v11 = vpop.eup %11199  ;;  %v379_v16 = vmul.f32 1.0614054, %v11198_v7 }
 0x217   :  { %v384_v30 = vmul.f32 %v11196_v29, %v380_v6  ;;  %v378_v42 = vmul.f32 1.0614054, %v11200_v11  ;;  %v11202_v56 = vpop.eup %11201 }
 0x218   :  { %v389_v14 = vadd.f32 1.4214138, %v385_v10  ;;  %v383_v18 = vadd.f32 -1.4531521, %v379_v16  ;;  %v11204_v59 = vpop.eup %11203  ;;  %v349_v16 = vmul.f32 0.5, %v11641_v28 }
 0x219   :  { %v388_v17 = vadd.f32 1.4214138, %v384_v30  ;;  %v382_v27 = vadd.f32 -1.4531521, %v378_v42  ;;  %v11206_v6 = vpop.eup %11205 }
 0x21a   :  { %v393_v26 = vmul.f32 %v11194_v60, %v389_v14  ;;  %v387_v33 = vmul.f32 %v11198_v7, %v383_v18  ;;  %v11208_v10 = vpop.eup %11207  ;;  %v348_v18 = vmul.f32 0.5, %v11643_v31  ;;  %v350_v31 = vmul.f32 0.5, %v11655_v45 }
 0x21b   :  { %v392_v32 = vmul.f32 %v11196_v29, %v388_v17  ;;  %v386_v35 = vmul.f32 %v11200_v11, %v382_v27 }
 0x21c   :  { %v397_v34 = vadd.f32 -0.28449672, %v393_v26  ;;  %v391_v39 = vadd.f32 1.4214138, %v387_v33 }
 0x21d   :  { %v396_v38 = vadd.f32 -0.28449672, %v392_v32  ;;  %v390_v43 = vadd.f32 1.4214138, %v386_v35 }
 0x21e   :  { %v401_v40 = vmul.f32 %v11194_v60, %v397_v34  ;;  %v395_v47 = vmul.f32 %v11198_v7, %v391_v39  ;;  %v351_v34 = vmul.f32 0.5, %v11653_v44 }
 0x21f   :  { %v400_v46 = vmul.f32 %v11196_v29, %v396_v38  ;;  %v394_v51 = vmul.f32 %v11200_v11, %v390_v43 }
 0x220   :  { %v405_v50 = vadd.f32 0.2548296, %v401_v40  ;;  %v399_v53 = vadd.f32 -0.28449672, %v395_v47 }
 0x221   :  { %v404_v52 = vadd.f32 0.2548296, %v400_v46  ;;  %v398_v55 = vadd.f32 -0.28449672, %v394_v51 }
 0x222   :  { %v409_v54 = vmul.f32 %v11194_v60, %v405_v50  ;;  %v403_v58 = vmul.f32 %v11198_v7, %v399_v53 }
 0x223   :  { %v408_v57 = vmul.f32 %v11196_v29, %v404_v52  ;;  %v402_v62 = vmul.f32 %v11200_v11, %v398_v55 }
 0x224   :  { %v429_v61 = vmul.f32 %v11202_v56, %v409_v54  ;;  %v407_v1 = vadd.f32 0.2548296, %v403_v58 }
 0x225   :  { %v428_v63 = vmul.f32 %v11204_v59, %v408_v57  ;;  %v406_v3 = vadd.f32 0.2548296, %v402_v62 }
 0x226   :  { %v433_v2 = vsub.f32 1.0, %v429_v61  ;;  %v411_v5 = vmul.f32 %v11198_v7, %v407_v1 }
 0x227   :  { %v432_v4 = vsub.f32 1.0, %v428_v63  ;;  %v410_v9 = vmul.f32 %v11200_v11, %v406_v3  ;;  %v532_v3 = vld [vmem:[%s13712_s3 + $0x28] sm:$0xf] }
 0x228   :  { %v441_v8 = vsub.f32 0.0, %v433_v2  ;;  %v431_v12 = vmul.f32 %v11206_v6, %v411_v5  ;;  %v533_v5 = vld [vmem:[%s13712_s3 + $0x48] sm:$0xf] }
 0x229   :  { %v440_v60 = vsub.f32 0.0, %v432_v4  ;;  %v430_v30 = vmul.f32 %v11208_v10, %v410_v9  ;;  %v534_v6 = vld [vmem:[%s13712_s3 + $0x68] sm:$0xf] }
 0x22a   :  { %v445_v29 = vsel %vm437_vm8, %v433_v2, %v441_v8  ;;  %v435_v17 = vsub.f32 1.0, %v431_v12  ;;  %v531_v2 = vld [vmem:[%s13712_s3 + $0x8] sm:$0xf]  ;;  %v11699_v8 = vcombine.low %v533_v5, %v534_v6 }
 0x22b   :  { %v444_v14 = vsel %vm436_vm9, %v432_v4, %v440_v60  ;;  %v449_v42 = vadd.f32 1.0, %v445_v29  ;;  %v434_v25 = vsub.f32 1.0, %v430_v30  ;;  %v11691_v4 = vcombine.low %v531_v2, %v532_v3 }
 0x22c   :  { %v448_v7 = vadd.f32 1.0, %v444_v14  ;;  %v443_v11 = vsub.f32 0.0, %v435_v17 }
 0x22d   :  { %v453_v26 = vmul.f32 %v449_v42, %v349_v16  ;;  %v442_v27 = vsub.f32 0.0, %v434_v25  ;;  %10601 = vmatprep.subr.bf16.mxu1 %v11691_v4 }
 0x22e   :  { %v452_v36 = vmul.f32 %v448_v7, %v348_v18  ;;  %v447_v41 = vsel %vm439_vm10, %v435_v17, %v443_v11  ;;  %10602 = vmatpush3.bf16.msra.mxu1 %v11691_v4 }
 0x22f   :  { %v457_v37 = vadd.f32 %v453_v26, %v11542_v24  ;;  %v446_v32 = vsel %vm438_vm11, %v434_v25, %v442_v27  ;;  %v451_v33 = vadd.f32 1.0, %v447_v41  ;;  %10603 = vmatprep.subr.bf16.mxu1 %v11699_v8  ;;  %v10144_v26 = vld [vmem:[%s13714_s6 + $0x1] ss:$0 sm:$0xff]  ;;  %v10145_v27 = vld [vmem:[%s13714_s6 + $0x2] ss:$0 sm:$0xff] }
 0x230   :  { %v456_v28 = vadd.f32 %v452_v36, %v11536_v22  ;;  %v450_v38 = vadd.f32 1.0, %v446_v32 }
 0x231   :  { %v465_v35 = vsel %vm88_vm0, %v457_v37, 0.0  ;;  %v455_v49 = vmul.f32 %v451_v33, %v351_v34 }
 0x232   :  { %v462_v48 = vsel %vm88_vm0, %v456_v28, 0.0  ;;  %466 = vadd.xlane.f32.xlu1 %v465_v35  ;;  %v454_v39 = vmul.f32 %v450_v38, %v350_v31  ;;  %10604 = vmatpush3.bf16.msra.mxu1 %v11699_v8 }
 0x233   :  { %463 = vadd.xlane.f32.xlu0 %v462_v48  ;;  %v459_v22 = vadd.f32 %v455_v49, %v11539_v23 }
 0x234   :  { %v458_v24 = vadd.f32 %v454_v39, %v11529_v19 }
 0x235   :  { %v471_v44 = vsel %vm88_vm0, %v459_v22, 0.0 }
 0x236   :  { %v468_v40 = vsel %vm88_vm0, %v458_v24, 0.0 }
 0x237   :  { %469 = vadd.xlane.f32.xlu0 %v468_v40 }
 0x23b   :  { %472 = vadd.xlane.f32.xlu0 %v471_v44  ;;  %v10146_v44 = vld [vmem:[%s13715_s7] ss:$0 sm:$0xff] }
 0x2bf   :  { %v467_v45 = vpop.xlane.xlu1 %466 }
 0x2c0   :  { %v464_v43 = vpop.xlane.xlu0 %463  ;;  %v476_v46 = vmul.f32 0.03125, %v467_v45 }
 0x2c1   :  { %v475_v47 = vmul.f32 0.03125, %v464_v43 }
 0x2c2   :  { %v480_v50 = vsub.f32 %v457_v37, %v476_v46 }
 0x2c3   :  { %v479_v51 = vsub.f32 %v456_v28, %v475_v47 }
 0x2c4   :  { %v484_v52 = vmul.f32 %v480_v50, %v480_v50  ;;  %v470_v53 = vpop.xlane.xlu0 %469 }
 0x2c5   :  { %v483_v54 = vmul.f32 %v479_v51, %v479_v51  ;;  %v477_v55 = vmul.f32 0.03125, %v470_v53 }
 0x2c6   :  { %v490_v19 = vsel %vm88_vm0, %v484_v52, 0.0 }
 0x2c7   :  { %v487_v56 = vsel %vm88_vm0, %v483_v54, 0.0  ;;  %491 = vadd.xlane.f32.xlu0 %v490_v19  ;;  %v481_v23 = vsub.f32 %v458_v24, %v477_v55  ;;  %v11432_v54 = vmov 1983009808   ;;  %v673_v19 = vlaneseq }
 0x2c8   :  { %488 = vadd.xlane.f32.xlu1 %v487_v56  ;;  %v473_v57 = vpop.xlane.xlu0 %472  ;;  %v671_v55 = vunpack.c.l.s4 %v11432_v54 }
 0x2c9   :  { %v478_v58 = vmul.f32 0.03125, %v473_v57  ;;  %v485_v59 = vmul.f32 %v481_v23, %v481_v23 }
 0x2cb   :  { %v482_v61 = vsub.f32 %v459_v22, %v478_v58  ;;  %v493_v62 = vsel %vm88_vm0, %v485_v59, 0.0  ;;  %v672_v58 = vunpack.c.0.s8 %v671_v55  ;;  %v11756_v59 = vshrl.u32 %v673_v19, 7 }
 0x2cc   :  { %494 = vadd.xlane.f32.xlu1 %v493_v62 }
 0x2cd   :  { %v486_v63 = vmul.f32 %v482_v61, %v482_v61 }
 0x2cf   :  { %v496_v1 = vsel %vm88_vm0, %v486_v63, 0.0 }
 0x2d0   :  { %497 = vadd.xlane.f32.xlu0 %v496_v1  ;;  %v11763_v1 = vsub.s32 %v672_v58, %v11756_v59 }
 0x354   :  { %v492_v9 = vpop.xlane.xlu0 %491 }
 0x355   :  { %v500_v10 = vmul.f32 0.03125, %v492_v9  ;;  %v489_v60 = vpop.xlane.xlu1 %488 }
 0x356   :  { %v499_v12 = vmul.f32 0.03125, %v489_v60 }
 0x357   :  { %v504_v29 = vadd.f32 1e-05, %v500_v10 }
 0x358   :  { %v503_v30 = vadd.f32 1e-05, %v499_v12 }
 0x359   :  { %11209 = vrsqrt.f32 %v504_v29  ;;  %v495_v16 = vpop.xlane.xlu1 %494 }
 0x35a   :  { %11211 = vrsqrt.f32 %v503_v30  ;;  %v501_v14 = vmul.f32 0.03125, %v495_v16 }
 0x35c   :  { %v505_v42 = vadd.f32 1e-05, %v501_v14 }
 0x35d   :  { %v498_v17 = vpop.xlane.xlu0 %497 }
 0x35e   :  { %11213 = vrsqrt.f32 %v505_v42  ;;  %v502_v18 = vmul.f32 0.03125, %v498_v17 }
 0x360   :  { %v506_v7 = vadd.f32 1e-05, %v502_v18 }
 0x362   :  { %11215 = vrsqrt.f32 %v506_v7 }
 0x363   :  { %v11210_v25 = vpop.eup %11209 }
 0x364   :  { %v11212_v11 = vpop.eup %11211  ;;  %v512_v36 = vmul.f32 %v11210_v25, %v480_v50 }
 0x365   :  { %v511_v37 = vmul.f32 %v11212_v11, %v479_v51 }
 0x366   :  { %v520_v41 = vmul.f32 %v10144_v26, %v512_v36 }
 0x367   :  { %v519_v28 = vmul.f32 %v10144_v26, %v511_v37 }
 0x368   :  { %v11711_v32 = vadd.f32 %v10145_v27, %v520_v41  ;;  %v11214_v33 = vpop.eup %11213 }
 0x369   :  { %v11713_v34 = vadd.f32 %v10145_v27, %v519_v28  ;;  %v513_v31 = vmul.f32 %v11214_v33, %v481_v23  ;;  %v11433_v23 = vmov 1934713408  }
 0x36a   :  { %v703_v57 = vunpack.c.l.s4 %v11433_v23 }
 0x36b   :  { %v555_v35 = vpack.c.bf16 %v11711_v32, %v11713_v34  ;;  %v521_v39 = vmul.f32 %v10144_v26, %v513_v31 }
 0x36c   :  { %v11216_v38 = vpop.eup %11215  ;;  %v704_v63 = vunpack.c.0.s8 %v703_v57 }
 0x36d   :  { %10605 = vmatprep.mubr.msk.bf16.mxu1 %vm88_vm0, %v555_v35  ;;  %v514_v48 = vmul.f32 %v11216_v38, %v482_v61  ;;  %v11718_v24 = vadd.f32 %v10145_v27, %v521_v39 }
 0x36e   :  { %v11771_v10 = vsub.s32 %v704_v63, %v11756_v59 }
 0x36f   :  { %v522_v49 = vmul.f32 %v10144_v26, %v514_v48 }
 0x371   :  { %v11720_v40 = vadd.f32 %v10145_v27, %v522_v49 }
 0x373   :  { %v556_v22 = vpack.c.bf16 %v11720_v40, %v11718_v24 }
 0x375   :  { %10606 = vmatmul.mubr.msk.bf16.vlgmr.msra.gmra.mrb[4].mxu1 %vm88_vm0, %v556_v22 }
 0x448   :  { %v10607_v45 = vpop.f32.mrb[4].mxu1 }
 0x449   :  { %v11728_v43 = vadd.f32 %v10607_v45, %v10146_v44  ;;  %v613_v46 = vpop.f32.mrb[5].mxu1 }
 0x44a   :  { %v11730_v47 = vadd.f32 %v10146_v44, %v613_v46  ;;  %v10608_v50 = vpop.f32.mrb[6].mxu1 }
 0x44b   :  { %v11732_v51 = vadd.f32 %v10608_v50, %v10146_v44  ;;  %v616_v52 = vpop.f32.mrb[7].mxu1 }
 0x44c   :  { %v11734_v53 = vadd.f32 %v10146_v44, %v616_v52  ;;  %632 = vrot.lane.b32.xlu1 %v11730_v47, %s11429_s25 }
 0x44e   :  { %634 = vrot.lane.b32.xlu0 %v11734_v53, %s11429_s25 }
 0x450   :  { %644 = vrot.lane.b32.xlu1 %v11730_v47, %s11430_s26 }
 0x452   :  { %656 = vrot.lane.b32.xlu0 %v11730_v47, %s11431_s27 }
 0x454   :  { %646 = vrot.lane.b32.xlu1 %v11734_v53, %s11430_s26 }
 0x456   :  { %1212 = vrot.lane.b32.xlu0 %v11730_v47, %s11427_s29 }
 0x458   :  { %658 = vrot.lane.b32.xlu1 %v11734_v53, %s11431_s27 }
 0x45c   :  { %1214 = vrot.lane.b32.xlu1 %v11734_v53, %s11427_s29 }
 0x4be   :  { %v11752_v56 = vpop.permute.xlu1 %632 }
 0x4bf   :  { %1220 = vrot.lane.b32.xlu0 %v11752_v56, %s11427_s29 }
 0x4c0   :  { %v11758_v61 = vpop.permute.xlu0 %634 }
 0x4c1   :  { %1222 = vrot.lane.b32.xlu1 %v11758_v61, %s11427_s29 }
 0x4c2   :  { %v645_v62 = vpop.permute.xlu1 %644 }
 0x4c3   :  { %v668_v2 = vcombine.low %v11730_v47, %v645_v62  ;;  %v669_v3 = vcombine.high %v11730_v47, %v645_v62  ;;  %1228 = vrot.lane.b32.xlu0 %v645_v62, %s11427_s29 }
 0x4c4   :  { %v657_v5 = vpop.permute.xlu0 %656 }
 0x4c5   :  { %v684_v6 = vcombine.low %v11752_v56, %v657_v5  ;;  %v685_v9 = vcombine.high %v11752_v56, %v657_v5  ;;  %v676_v12 = vrot.slane %v668_v2, %v11763_v1  ;;  %v683_v29 = vrot.slane %v669_v3, %v11763_v1 }
 0x4c6   :  { %v11773_v60 = vpop.permute.xlu1 %646 }
 0x4c7   :  { %v692_v30 = vrot.slane %v684_v6, %v11763_v1  ;;  %v699_v16 = vrot.slane %v685_v9, %v11763_v1  ;;  %1236 = vrot.lane.b32.xlu0 %v657_v5, %s11427_s29  ;;  %1230 = vrot.lane.b32.xlu1 %v11773_v60, %s11427_s29  ;;  %v736_v63 = vcombine.low %v11734_v53, %v11773_v60 }
 0x4c8   :  { %v1213_v19 = vpop.permute.xlu0 %1212  ;;  %v737_v2 = vcombine.high %v11734_v53, %v11773_v60 }
 0x4c9   :  { %v700_v14 = vcombine.low %v676_v12, %v692_v30  ;;  %v701_v42 = vcombine.high %v676_v12, %v692_v30  ;;  %v716_v17 = vcombine.low %v683_v29, %v699_v16  ;;  %v717_v18 = vcombine.high %v683_v29, %v699_v16 }
 0x4ca   :  { %v11782_v7 = vpop.permute.xlu1 %658 }
 0x4cb   :  { %v708_v25 = vrot.slane %v700_v14, %v11771_v10  ;;  %v715_v26 = vrot.slane %v701_v42, %v11771_v10  ;;  %v724_v11 = vrot.slane %v716_v17, %v11771_v10  ;;  %v731_v36 = vrot.slane %v717_v18, %v11771_v10  ;;  %638 = vrot.lane.b32.xlu0 %v11732_v51, %s11429_s25 }
 0x4cc   :  { %1238 = vrot.lane.b32.xlu1 %v11782_v7, %s11427_s29  ;;  %v752_v57 = vcombine.low %v11758_v61, %v11782_v7  ;;  %v753_v3 = vcombine.high %v11758_v61, %v11782_v7  ;;  %v744_v14 = vrot.slane %v736_v63, %v11763_v1  ;;  %v751_v42 = vrot.slane %v737_v2, %v11763_v1 }
 0x4cd   :  { %v940_v27 = vcombine.low %v708_v25, %v715_v26  ;;  %v10151_v37 = vcombine.high %v708_v25, %v715_v26  ;;  %v956_v41 = vcombine.low %v724_v11, %v731_v36  ;;  %v10152_v28 = vcombine.high %v724_v11, %v731_v36 }
 0x4ce   :  { %v1215_v23 = vpop.permute.xlu1 %1214  ;;  %v760_v9 = vrot.slane %v752_v57, %v11763_v1  ;;  %v767_v17 = vrot.slane %v753_v3, %v11763_v1 }
 0x4cf   :  { %660 = vrot.lane.b32.xlu0 %v11728_v43, %s11431_s27  ;;  %v947_v33 = vrot.slane %v940_v27, %v11763_v1  ;;  %v955_v31 = vrot.slane %v10151_v37, %v11763_v1  ;;  %v963_v35 = vrot.slane %v956_v41, %v11763_v1  ;;  %v971_v38 = vrot.slane %v10152_v28, %v11763_v1 }
 0x4d0   :  { %636 = vrot.lane.b32.xlu1 %v11728_v43, %s11429_s25  ;;  %v768_v11 = vcombine.low %v744_v14, %v760_v9  ;;  %v769_v36 = vcombine.high %v744_v14, %v760_v9 }
 0x4d1   :  { %v972_v48 = vcombine.low %v947_v33, %v955_v31  ;;  %v988_v39 = vcombine.low %v963_v35, %v971_v38  ;;  %v973_v49 = vcombine.high %v947_v33, %v955_v31  ;;  %v989_v22 = vcombine.high %v963_v35, %v971_v38 }
 0x4d3   :  { %1804 = vrot.lane.b32.xlu0 %v11730_v47, %s11426_s0  ;;  %v980_v44 = vrot.slane %v972_v48, %v11771_v10  ;;  %v996_v45 = vrot.slane %v988_v39, %v11771_v10  ;;  %v11805_v46 = vrot.slane %v973_v49, %v11771_v10  ;;  %v11808_v50 = vrot.slane %v989_v22, %v11771_v10 }
 0x4d4   :  { %648 = vrot.lane.b32.xlu1 %v11728_v43, %s11430_s26  ;;  %v784_v48 = vcombine.low %v751_v42, %v767_v17  ;;  %v785_v39 = vcombine.high %v751_v42, %v767_v17 }
 0x4d5   :  { %v1004_v52 = vcombine.low %v980_v44, %v996_v45  ;;  %v1005_v54 = vcombine.high %v980_v44, %v996_v45  ;;  %v1006_v55 = vcombine.low %v11805_v46, %v11808_v50  ;;  %v1007_v47 = vcombine.high %v11805_v46, %v11808_v50 }
 0x4d7   :  { %10613 = vmatprep.mubr.msk.f32.mxu1 %vm2396_vm12, %v1004_v52  ;;  %10620 = vmatprep.mubr.msk.f32.mxu0 %vm2396_vm12, %v1005_v54 }
 0x4d8   :  { %1812 = vrot.lane.b32.xlu0 %v11752_v56, %s11426_s0  ;;  %650 = vrot.lane.b32.xlu1 %v11732_v51, %s11430_s26 }
 0x4dc   :  { %1820 = vrot.lane.b32.xlu0 %v645_v62, %s11426_s0  ;;  %662 = vrot.lane.b32.xlu1 %v11732_v51, %s11431_s27 }
 0x4e0   :  { %1828 = vrot.lane.b32.xlu0 %v657_v5, %s11426_s0  ;;  %1806 = vrot.lane.b32.xlu1 %v11734_v53, %s11426_s0 }
 0x4e4   :  { %1218 = vrot.lane.b32.xlu0 %v11732_v51, %s11427_s29  ;;  %1216 = vrot.lane.b32.xlu1 %v11728_v43, %s11427_s29 }
 0x531   :  { %v1221_v56 = vpop.permute.xlu0 %1220 }
 0x533   :  { %v1223_v62 = vpop.permute.xlu1 %1222 }
 0x535   :  { %v1229_v58 = vpop.permute.xlu0 %1228 }
 0x536   :  { %v1260_v5 = vcombine.low %v1213_v19, %v1229_v58  ;;  %v1261_v6 = vcombine.high %v1213_v19, %v1229_v58 }
 0x538   :  { %v1268_v18 = vrot.slane %v1260_v5, %v11763_v1  ;;  %v1275_v53 = vrot.slane %v1261_v6, %v11763_v1 }
 0x539   :  { %v1237_v12 = vpop.permute.xlu0 %1236  ;;  %v1231_v16 = vpop.permute.xlu1 %1230 }
 0x53a   :  { %v1276_v29 = vcombine.low %v1221_v56, %v1237_v12  ;;  %v1277_v30 = vcombine.high %v1221_v56, %v1237_v12  ;;  %v1328_v27 = vcombine.low %v1215_v23, %v1231_v16  ;;  %v1329_v37 = vcombine.high %v1215_v23, %v1231_v16 }
 0x53c   :  { %v1284_v25 = vrot.slane %v1276_v29, %v11763_v1  ;;  %v1291_v26 = vrot.slane %v1277_v30, %v11763_v1  ;;  %v1336_v19 = vrot.slane %v1328_v27, %v11763_v1  ;;  %v1343_v56 = vrot.slane %v1329_v37, %v11763_v1 }
 0x53d   :  { %v11848_v41 = vpop.permute.xlu0 %638  ;;  %v776_v27 = vrot.slane %v768_v11, %v11771_v10  ;;  %v783_v37 = vrot.slane %v769_v36, %v11771_v10 }
 0x53e   :  { %v1292_v28 = vcombine.low %v1268_v18, %v1284_v25  ;;  %v1293_v33 = vcombine.high %v1268_v18, %v1284_v25  ;;  %v1308_v31 = vcombine.low %v1275_v53, %v1291_v26  ;;  %v1309_v35 = vcombine.high %v1275_v53, %v1291_v26  ;;  %v1239_v38 = vpop.permute.xlu1 %1238 }
 0x53f   :  { %v1344_v49 = vcombine.low %v1223_v62, %v1239_v38  ;;  %v1345_v22 = vcombine.high %v1223_v62, %v1239_v38 }
 0x540   :  { %v1300_v44 = vrot.slane %v1292_v28, %v11771_v10  ;;  %v1307_v45 = vrot.slane %v1293_v33, %v11771_v10  ;;  %v1316_v52 = vrot.slane %v1308_v31, %v11771_v10  ;;  %v1323_v54 = vrot.slane %v1309_v35, %v11771_v10 }
 0x541   :  { %v1352_v23 = vrot.slane %v1344_v49, %v11763_v1  ;;  %v1359_v57 = vrot.slane %v1345_v22, %v11763_v1  ;;  %v11858_v58 = vpop.permute.xlu0 %660  ;;  %v792_v28 = vrot.slane %v784_v48, %v11771_v10  ;;  %v799_v33 = vrot.slane %v785_v39, %v11771_v10 }
 0x542   :  { %v1532_v63 = vcombine.low %v1300_v44, %v1307_v45  ;;  %v10159_v62 = vcombine.high %v1300_v44, %v1307_v45  ;;  %v1548_v2 = vcombine.low %v1316_v52, %v1323_v54  ;;  %v10160_v3 = vcombine.high %v1316_v52, %v1323_v54  ;;  %v11860_v5 = vpop.permute.xlu1 %636 }
 0x543   :  { %v1360_v6 = vcombine.low %v1336_v19, %v1352_v23  ;;  %v1361_v9 = vcombine.high %v1336_v19, %v1352_v23  ;;  %v1376_v12 = vcombine.low %v1343_v56, %v1359_v57  ;;  %v1377_v29 = vcombine.high %v1343_v56, %v1359_v57  ;;  %1224 = vrot.lane.b32.xlu1 %v11860_v5, %s11427_s29 }
 0x544   :  { %v11865_v30 = vrot.slane %v1532_v63, %v11763_v1  ;;  %v11868_v16 = vrot.slane %v10159_v62, %v11763_v1  ;;  %v11871_v14 = vrot.slane %v1548_v2, %v11763_v1  ;;  %v11874_v42 = vrot.slane %v10160_v3, %v11763_v1 }
 0x545   :  { %v1368_v17 = vrot.slane %v1360_v6, %v11771_v10  ;;  %v1375_v18 = vrot.slane %v1361_v9, %v11771_v10  ;;  %v1384_v53 = vrot.slane %v1376_v12, %v11771_v10  ;;  %v1391_v25 = vrot.slane %v1377_v29, %v11771_v10  ;;  %v1805_v26 = vpop.permute.xlu0 %1804 }
 0x546   :  { %v1564_v22 = vcombine.low %v11865_v30, %v11868_v16  ;;  %v1580_v44 = vcombine.low %v11871_v14, %v11874_v42  ;;  %v1008_v45 = vcombine.low %v776_v27, %v783_v37  ;;  %v10153_v54 = vcombine.high %v776_v27, %v783_v37 }
 0x547   :  { %v1600_v31 = vcombine.low %v1368_v17, %v1375_v18  ;;  %v10161_v35 = vcombine.high %v1368_v17, %v1375_v18  ;;  %v1616_v38 = vcombine.low %v1384_v53, %v1391_v25  ;;  %v10162_v49 = vcombine.high %v1384_v53, %v1391_v25  ;;  %1814 = vrot.lane.b32.xlu1 %v11758_v61, %s11426_s0 }
 0x548   :  { %v1024_v19 = vcombine.low %v792_v28, %v799_v33  ;;  %v10154_v56 = vcombine.high %v792_v28, %v799_v33  ;;  %v1572_v57 = vrot.slane %v1564_v22, %v11771_v10  ;;  %v1588_v63 = vrot.slane %v1580_v44, %v11771_v10 }
 0x549   :  { %v1607_v11 = vrot.slane %v1600_v31, %v11763_v1  ;;  %v1615_v36 = vrot.slane %v10161_v35, %v11763_v1  ;;  %v1623_v48 = vrot.slane %v1616_v38, %v11763_v1  ;;  %v1631_v39 = vrot.slane %v10162_v49, %v11763_v1 }
 0x54a   :  { %v1813_v52 = vpop.permute.xlu0 %1812  ;;  %v11902_v3 = vrot.slane %v1008_v45, %v11763_v1  ;;  %v11905_v6 = vrot.slane %v10153_v54, %v11763_v1  ;;  %v11911_v9 = vrot.slane %v10154_v56, %v11763_v1  ;;  %v1596_v17 = vcombine.low %v1572_v57, %v1588_v63 }
 0x54b   :  { %1822 = vrot.lane.b32.xlu1 %v11773_v60, %s11426_s0  ;;  %v1632_v61 = vcombine.low %v1607_v11, %v1615_v36  ;;  %v1648_v23 = vcombine.low %v1623_v48, %v1631_v39  ;;  %v11908_v60 = vrot.slane %v1024_v19, %v11763_v1  ;;  %v1565_v22 = vcombine.high %v11865_v30, %v11868_v16 }
 0x54c   :  { %v1040_v28 = vcombine.low %v11902_v3, %v11905_v6  ;;  %v1581_v44 = vcombine.high %v11871_v14, %v11874_v42  ;;  %v1041_v14 = vcombine.high %v11902_v3, %v11905_v6 }
 0x54d   :  { %v1640_v2 = vrot.slane %v1632_v61, %v11771_v10  ;;  %v1656_v12 = vrot.slane %v1648_v23, %v11771_v10  ;;  %v1056_v33 = vcombine.low %v11908_v60, %v11911_v9  ;;  %v1579_v23 = vrot.slane %v1565_v22, %v11771_v10 }
 0x54e   :  { %v1821_v62 = vpop.permute.xlu0 %1820  ;;  %v1048_v30 = vrot.slane %v1040_v28, %v11771_v10  ;;  %v1057_v22 = vcombine.high %v11908_v60, %v11911_v9  ;;  %v1055_v46 = vrot.slane %v1041_v14, %v11771_v10 }
 0x54f   :  { %1830 = vrot.lane.b32.xlu1 %v11782_v7, %s11426_s0  ;;  %v1852_v29 = vcombine.low %v1805_v26, %v1821_v62  ;;  %v1853_v18 = vcombine.high %v1805_v26, %v1821_v62  ;;  %v1664_v25 = vcombine.low %v1640_v2, %v1656_v12  ;;  %v1597_v7 = vcombine.high %v1572_v57, %v1588_v63 }
 0x550   :  { %v1665_v27 = vcombine.high %v1640_v2, %v1656_v12  ;;  %v1064_v16 = vrot.slane %v1056_v33, %v11771_v10  ;;  %v1595_v57 = vrot.slane %v1581_v44, %v11771_v10  ;;  %v1633_v63 = vcombine.high %v1607_v11, %v1615_v36 }
 0x551   :  { %v10929_v38 = vpack.c.bf16 %v1664_v25, %v1596_v17  ;;  %v1860_v49 = vrot.slane %v1852_v29, %v11763_v1  ;;  %v1867_v45 = vrot.slane %v1853_v18, %v11763_v1  ;;  %v1649_v62 = vcombine.high %v1623_v48, %v1631_v39 }
 0x552   :  { %v1829_v53 = vpop.permute.xlu0 %1828  ;;  %v10935_v26 = vpack.c.bf16 %v1665_v27, %v1597_v7  ;;  %v1647_v6 = vrot.slane %v1633_v63, %v11771_v10  ;;  %v1072_v18 = vcombine.low %v1048_v30, %v1064_v16  ;;  %v1598_v11 = vcombine.low %v1579_v23, %v1595_v57 }
 0x553   :  { %v1868_v31 = vcombine.low %v1813_v52, %v1829_v53  ;;  %v1869_v35 = vcombine.high %v1813_v52, %v1829_v53  ;;  %10931 = vmatprep.subr.msk.bf16.mxu1 %vm11916_vm13, %v10929_v38  ;;  %v1663_v17 = vrot.slane %v1649_v62, %v11771_v10  ;;  %v1073_v53 = vcombine.high %v1048_v30, %v1064_v16 }
 0x554   :  { %10937 = vmatprep.subr.msk.bf16.mxu0 %vm11916_vm13, %v10935_v26  ;;  %10934 = vmatpush3.bf16.xpose.msk.msra.mxu1 %vm11916_vm13, %v10929_v38  ;;  %v1599_v48 = vcombine.high %v1579_v23, %v1595_v57  ;;  %v1071_v50 = vrot.slane %v1057_v22, %v11771_v10 }
 0x555   :  { %v1876_v54 = vrot.slane %v1868_v31, %v11763_v1  ;;  %v1883_v19 = vrot.slane %v1869_v35, %v11763_v1  ;;  %10940 = vmatpush3.bf16.xpose.msk.msra.mxu0 %vm11916_vm13, %v10935_v26  ;;  %v1666_v36 = vcombine.low %v1647_v6, %v1663_v17  ;;  %v1667_v39 = vcombine.high %v1647_v6, %v1663_v17 }
 0x556   :  { %v1074_v9 = vcombine.low %v1055_v46, %v1071_v50 }
 0x557   :  { %v1884_v42 = vcombine.low %v1860_v49, %v1876_v54  ;;  %v1885_v52 = vcombine.high %v1860_v49, %v1876_v54  ;;  %v1900_v56 = vcombine.low %v1867_v45, %v1883_v19  ;;  %v1901_v61 = vcombine.high %v1867_v45, %v1883_v19  ;;  %v11985_v19 = vpop.permute.xlu1 %648 }
 0x558   :  { %v10941_v26 = vpack.c.bf16 %v1666_v36, %v1598_v11  ;;  %v10947_v49 = vpack.c.bf16 %v1667_v39, %v1599_v48  ;;  %v1075_v54 = vcombine.high %v1055_v46, %v1071_v50 }
 0x559   :  { %v1892_v2 = vrot.slane %v1884_v42, %v11771_v10  ;;  %v1899_v12 = vrot.slane %v1885_v52, %v11771_v10  ;;  %v1908_v29 = vrot.slane %v1900_v56, %v11771_v10  ;;  %v1915_v3 = vrot.slane %v1901_v61, %v11771_v10 }
 0x55a   :  { %10943 = vmatprep.subr.msk.bf16.mxu1 %vm11916_vm13, %v10941_v26  ;;  %10949 = vmatprep.subr.msk.bf16.mxu0 %vm11916_vm13, %v10947_v49 }
 0x55b   :  { %v2124_v25 = vcombine.low %v1892_v2, %v1899_v12  ;;  %v10167_v7 = vcombine.high %v1892_v2, %v1899_v12  ;;  %v2140_v27 = vcombine.low %v1908_v29, %v1915_v3  ;;  %v10168_v28 = vcombine.high %v1908_v29, %v1915_v3  ;;  %10614 = vmatmul.mubr.msk.f32.vlgmr.msra.gmra.mrb[8].mxu1 %vm2396_vm12, %v1072_v18  ;;  %v11987_v30 = vpop.permute.xlu1 %650 }
 0x55c   :  { %10621 = vmatmul.mubr.msk.f32.vlgmr.msra.gmra.mrb[4].mxu0 %vm2396_vm12, %v1073_v53  ;;  %10627 = vmatprep.mubr.msk.f32.mxu1 %vm2396_vm12, %v1006_v55 }
 0x55d   :  { %v2131_v33 = vrot.slane %v2124_v25, %v11763_v1  ;;  %v2139_v31 = vrot.slane %v10167_v7, %v11763_v1  ;;  %v2147_v35 = vrot.slane %v2140_v27, %v11763_v1  ;;  %v2155_v38 = vrot.slane %v10168_v28, %v11763_v1  ;;  %10634 = vmatprep.mubr.msk.f32.mxu0 %vm2396_vm12, %v1007_v47 }
 0x55e   :  { %10946 = vmatpush3.bf16.xpose.msk.msra.mxu1 %vm11916_vm13, %v10941_v26  ;;  %10952 = vmatpush3.bf16.xpose.msk.msra.mxu0 %vm11916_vm13, %v10947_v49 }
 0x55f   :  { %v2157_v44 = vcombine.high %v2131_v33, %v2139_v31  ;;  %v2173_v45 = vcombine.high %v2147_v35, %v2155_v38  ;;  %v11989_v16 = vpop.permute.xlu1 %662  ;;  %v2156_v36 = vcombine.low %v2131_v33, %v2139_v31  ;;  %v2172_v48 = vcombine.low %v2147_v35, %v2155_v38 }
 0x561   :  { %v11977_v55 = vrot.slane %v2157_v44, %v11771_v10  ;;  %v2187_v47 = vrot.slane %v2173_v45, %v11771_v10 }
 0x563   :  { %v2191_v60 = vcombine.high %v11977_v55, %v2187_v47  ;;  %v1807_v42 = vpop.permute.xlu1 %1806 }
 0x565   :  { %10628 = vmatmul.mubr.msk.f32.vlgmr.msra.gmra.mrb[10].mxu1 %vm2396_vm12, %v1074_v9  ;;  %10635 = vmatmul.mubr.msk.f32.vlgmr.msra.gmra.mrb[6].mxu0 %vm2396_vm12, %v1075_v54  ;;  %v2164_v9 = vrot.slane %v2156_v36, %v11771_v10  ;;  %v2180_v54 = vrot.slane %v2172_v48, %v11771_v10 }
 0x567   :  { %v11991_v14 = vpop.permute.xlu1 %1216 }
 0x5b5   :  { %v11993_v52 = vpop.permute.xlu1 %1224 }
 0x5b9   :  { %v1815_v56 = vpop.permute.xlu1 %1814 }
 0x5bd   :  { %v1823_v61 = vpop.permute.xlu1 %1822 }
 0x5be   :  { %v1920_v23 = vcombine.low %v1807_v42, %v1823_v61  ;;  %v1921_v57 = vcombine.high %v1807_v42, %v1823_v61 }
 0x5c0   :  { %v1928_v12 = vrot.slane %v1920_v23, %v11763_v1  ;;  %v1935_v29 = vrot.slane %v1921_v57, %v11763_v1  ;;  %v2188_v57 = vcombine.low %v2164_v9, %v2180_v54 }
 0x5c1   :  { %v1831_v63 = vpop.permute.xlu1 %1830 }
 0x5c2   :  { %v1936_v62 = vcombine.low %v1815_v56, %v1831_v63  ;;  %v1937_v2 = vcombine.high %v1815_v56, %v1831_v63  ;;  %v2190_v63 = vcombine.low %v11977_v55, %v2187_v47  ;;  %v10191_v55 = vld [vmem:[%s13716_s2] ss:$0 sm:$0xff] }
 0x5c4   :  { %v1944_v3 = vrot.slane %v1936_v62, %v11763_v1  ;;  %v1951_v6 = vrot.slane %v1937_v2, %v11763_v1 }
 0x5c6   :  { %v1952_v17 = vcombine.low %v1928_v12, %v1944_v3  ;;  %v1953_v18 = vcombine.high %v1928_v12, %v1944_v3  ;;  %v1968_v53 = vcombine.low %v1935_v29, %v1951_v6  ;;  %v1969_v25 = vcombine.high %v1935_v29, %v1951_v6 }
 0x5c8   :  { %v1960_v7 = vrot.slane %v1952_v17, %v11771_v10  ;;  %v1967_v27 = vrot.slane %v1953_v18, %v11771_v10  ;;  %v1976_v28 = vrot.slane %v1968_v53, %v11771_v10  ;;  %v1983_v11 = vrot.slane %v1969_v25, %v11771_v10 }
 0x5c9   :  { %v2189_v17 = vcombine.high %v2164_v9, %v2180_v54 }
 0x5ca   :  { %v2192_v39 = vcombine.low %v1960_v7, %v1967_v27  ;;  %v10169_v26 = vcombine.high %v1960_v7, %v1967_v27  ;;  %v2208_v49 = vcombine.low %v1976_v28, %v1983_v11  ;;  %v10170_v22 = vcombine.high %v1976_v28, %v1983_v11 }
 0x5cc   :  { %v2199_v44 = vrot.slane %v2192_v39, %v11763_v1  ;;  %v2207_v45 = vrot.slane %v10169_v26, %v11763_v1  ;;  %v2215_v46 = vrot.slane %v2208_v49, %v11763_v1  ;;  %v2223_v50 = vrot.slane %v10170_v22, %v11763_v1 }
 0x5ce   :  { %v2224_v42 = vcombine.low %v2199_v44, %v2207_v45  ;;  %v2240_v56 = vcombine.low %v2215_v46, %v2223_v50  ;;  %v2225_v33 = vcombine.high %v2199_v44, %v2207_v45  ;;  %v2241_v31 = vcombine.high %v2215_v46, %v2223_v50 }
 0x5d0   :  { %v2232_v35 = vrot.slane %v2224_v42, %v11771_v10  ;;  %v2248_v38 = vrot.slane %v2240_v56, %v11771_v10  ;;  %v2239_v61 = vrot.slane %v2225_v33, %v11771_v10  ;;  %v2255_v23 = vrot.slane %v2241_v31, %v11771_v10 }
 0x5d2   :  { %v2256_v62 = vcombine.low %v2232_v35, %v2248_v38  ;;  %v2258_v2 = vcombine.low %v2239_v61, %v2255_v23  ;;  %v2257_v12 = vcombine.high %v2232_v35, %v2248_v38  ;;  %v2259_v29 = vcombine.high %v2239_v61, %v2255_v23 }
 0x5d4   :  { %v10953_v3 = vpack.c.bf16 %v2256_v62, %v2188_v57  ;;  %v10961_v6 = vpack.c.bf16 %v2258_v2, %v2190_v63  ;;  %v12014_v18 = vpack.c.bf16 %v2259_v29, %v2191_v60  ;;  %v12016_v53 = vpack.c.bf16 %v2257_v12, %v2189_v17  ;;  %v12036_v29 = vpop.permute.xlu0 %1218 }
 0x5d6   :  { %10954 = vmatprep.subr.bf16.mxu1 %v10953_v3  ;;  %10962 = vmatprep.subr.bf16.mxu0 %v10961_v6 }
 0x5d7   :  { %10956 = vmatpush3.bf16.msra.mxu1 %v10953_v3  ;;  %10964 = vmatpush3.bf16.msra.mxu0 %v10961_v6 }
 0x5d8   :  { %10958 = vmatprep.subr.bf16.mxu1 %v12016_v53 }
 0x62e   :  { %v10615_v25 = vpop.f32.mrb[8].mxu1 }
 0x62f   :  { %v2746_v47 = vmul.f32 0.35355338, %v10615_v25  ;;  %v10622_v7 = vpop.f32.mrb[4].mxu0  ;;  %v2475_v27 = vpop.f32.mrb[9].mxu1 }
 0x630   :  { %v2748_v28 = vmul.f32 0.35355338, %v10622_v7  ;;  %v2745_v11 = vmul.f32 0.35355338, %v2475_v27  ;;  %v2562_v60 = vpop.f32.mrb[5].mxu0 }
 0x631   :  { %v2759_v36 = vadd.f32 %v10191_v55, %v2746_v47  ;;  %v2747_v26 = vmul.f32 0.35355338, %v2562_v60 }
 0x632   :  { %v2761_v48 = vadd.f32 %v10191_v55, %v2748_v28  ;;  %v2758_v22 = vadd.f32 %v10191_v55, %v2745_v11 }
 0x633   :  { %v2770_v39 = vsel %vm2766_vm14, %v2759_v36, -inf  ;;  %v2760_v45 = vadd.f32 %v10191_v55, %v2747_v26 }
 0x634   :  { %v2776_v49 = vsel %vm2766_vm14, %v2761_v48, -inf  ;;  %2771 = vmax.xlane.f32.xlu1 %v2770_v39  ;;  %v2767_v44 = vsel %vm2766_vm14, %v2758_v22, -inf }
 0x635   :  { %2777 = vmax.xlane.f32.xlu0 %v2776_v49  ;;  %v2773_v33 = vsel %vm2766_vm14, %v2760_v45, -inf }
 0x638   :  { %v10629_v46 = vpop.f32.mrb[10].mxu1  ;;  %v10636_v50 = vpop.f32.mrb[6].mxu0 }
 0x639   :  { %2768 = vmax.xlane.f32.xlu0 %v2767_v44  ;;  %v2752_v9 = vmul.f32 0.35355338, %v10636_v50  ;;  %v2649_v54 = vpop.f32.mrb[11].mxu1  ;;  %v2736_v42 = vpop.f32.mrb[7].mxu0  ;;  %v2750_v23 = vmul.f32 0.35355338, %v10629_v46 }
 0x63a   :  { %v2751_v56 = vmul.f32 0.35355338, %v2736_v42  ;;  %v2749_v57 = vmul.f32 0.35355338, %v2649_v54 }
 0x63b   :  { %v2765_v31 = vadd.f32 %v10191_v55, %v2752_v9  ;;  %v2763_v63 = vadd.f32 %v10191_v55, %v2750_v23 }
 0x63c   :  { %v2764_v38 = vadd.f32 %v10191_v55, %v2751_v56  ;;  %v2762_v2 = vadd.f32 %v10191_v55, %v2749_v57 }
 0x63d   :  { %2774 = vmax.xlane.f32.xlu0 %v2773_v33  ;;  %v2788_v35 = vsel %vm2766_vm14, %v2765_v31, -inf  ;;  %v2782_v62 = vsel %vm2766_vm14, %v2763_v63, -inf }
 0x63e   :  { %v2785_v61 = vsel %vm2766_vm14, %v2764_v38, -inf  ;;  %v2779_v12 = vsel %vm2766_vm14, %v2762_v2, -inf }
 0x641   :  { %2789 = vmax.xlane.f32.xlu0 %v2788_v35 }
 0x645   :  { %2786 = vmax.xlane.f32.xlu0 %v2785_v61  ;;  %1226 = vrot.lane.b32.xlu1 %v11848_v41, %s11427_s29 }
 0x65b   :  { %1232 = vrot.lane.b32.xlu0 %v11985_v19, %s11427_s29 }
 0x669   :  { %2783 = vmax.xlane.f32.xlu1 %v2782_v62 }
 0x66d   :  { %2780 = vmax.xlane.f32.xlu1 %v2779_v12 }
 0x67e   :  { %1234 = vrot.lane.b32.xlu1 %v11987_v30, %s11427_s29 }
 0x6c1   :  { %v2772_v3 = vpop.xlane.xlu1 %2771 }
 0x6c2   :  { %v2778_v6 = vpop.xlane.xlu0 %2777  ;;  %v2792_v17 = vsub.f32 %v2759_v36, %v2772_v3 }
 0x6c3   :  { %v2794_v25 = vsub.f32 %v2761_v48, %v2778_v6 }
 0x6c4   :  { %v2801_v47 = vmul.f32 1.442695, %v2792_v17 }
 0x6c5   :  { %v2805_v7 = vmul.f32 1.442695, %v2794_v25  ;;  %v12046_v33 = vpop.permute.xlu1 %1226 }
 0x6c6   :  { %11217 = vpow2.f32 %v2801_v47  ;;  %v2769_v27 = vpop.xlane.xlu0 %2768 }
 0x6c7   :  { %v2791_v28 = vsub.f32 %v2758_v22, %v2769_v27  ;;  %11219 = vpow2.f32 %v2805_v7 }
 0x6c9   :  { %v2799_v55 = vmul.f32 1.442695, %v2791_v28 }
 0x6ca   :  { %v2775_v11 = vpop.xlane.xlu0 %2774 }
 0x6cb   :  { %11221 = vpow2.f32 %v2799_v55  ;;  %v2793_v60 = vsub.f32 %v2760_v45, %v2775_v11 }
 0x6cd   :  { %v2803_v39 = vmul.f32 1.442695, %v2793_v60 }
 0x6ce   :  { %v2790_v26 = vpop.xlane.xlu0 %2789 }
 0x6cf   :  { %11223 = vpow2.f32 %v2803_v39  ;;  %v2798_v49 = vsub.f32 %v2765_v31, %v2790_v26 }
 0x6d0   :  { %v11218_v44 = vpop.eup %11217 }
 0x6d1   :  { %v2813_v46 = vmul.f32 1.442695, %v2798_v49  ;;  %v2818_v50 = vsel %vm2766_vm14, %v11218_v44, 0.0  ;;  %v11220_v36 = vpop.eup %11219 }
 0x6d2   :  { %2819 = vadd.xlane.f32.xlu1 %v2818_v50  ;;  %v2824_v9 = vsel %vm2766_vm14, %v11220_v36, 0.0  ;;  %v2787_v31 = vpop.xlane.xlu0 %2786 }
 0x6d3   :  { %11225 = vpow2.f32 %v2813_v46  ;;  %v2797_v23 = vsub.f32 %v2764_v38, %v2787_v31 }
 0x6d5   :  { %v11222_v48 = vpop.eup %11221  ;;  %v2811_v3 = vmul.f32 1.442695, %v2797_v23 }
 0x6d6   :  { %v2815_v22 = vsel %vm2766_vm14, %v11222_v48, 0.0  ;;  %2825 = vadd.xlane.f32.xlu1 %v2824_v9  ;;  %v12066_v28 = vpop.permute.xlu0 %1232 }
 0x6d7   :  { %2816 = vadd.xlane.f32.xlu0 %v2815_v22 }
 0x6d9   :  { %v11224_v54 = vpop.eup %11223 }
 0x6da   :  { %v2821_v45 = vsel %vm2766_vm14, %v11224_v54, 0.0 }
 0x6db   :  { %2822 = vadd.xlane.f32.xlu0 %v2821_v45 }
 0x6dd   :  { %v12042_v42 = vpop.eup %11225 }
 0x6de   :  { %v2836_v56 = vsel %vm2766_vm14, %v12042_v42, 0.0 }
 0x6df   :  { %2837 = vadd.xlane.f32.xlu0 %v2836_v56  ;;  %v805_v56 = vcombine.high %v11728_v43, %v11985_v19 }
 0x6e1   :  { %v819_v31 = vrot.slane %v805_v56, %v11763_v1 }
 0x6f6   :  { %v2784_v35 = vpop.xlane.xlu1 %2783 }
 0x6f7   :  { %v2796_v61 = vsub.f32 %v2763_v63, %v2784_v35 }
 0x6f9   :  { %v2809_v57 = vmul.f32 1.442695, %v2796_v61 }
 0x6fa   :  { %v2781_v62 = vpop.xlane.xlu1 %2780 }
 0x6fb   :  { %11227 = vpow2.f32 %v2809_v57  ;;  %v2795_v12 = vsub.f32 %v2762_v2, %v2781_v62 }
 0x6fd   :  { %v2807_v6 = vmul.f32 1.442695, %v2795_v12 }
 0x6fe   :  { %v12064_v7 = vpop.permute.xlu1 %1234 }
 0x6ff   :  { %11229 = vpow2.f32 %v2807_v6 }
 0x700   :  { %11231 = vpow2.f32 %v2811_v3 }
 0x705   :  { %v12048_v17 = vpop.eup %11227 }
 0x706   :  { %v2830_v25 = vsel %vm2766_vm14, %v12048_v17, 0.0 }
 0x707   :  { %2831 = vadd.xlane.f32.xlu1 %v2830_v25 }
 0x709   :  { %v12052_v47 = vpop.eup %11229 }
 0x70a   :  { %v2827_v63 = vsel %vm2766_vm14, %v12052_v47, 0.0  ;;  %v12056_v38 = vpop.eup %11231 }
 0x70b   :  { %2828 = vadd.xlane.f32.xlu0 %v2827_v63  ;;  %v2833_v2 = vsel %vm2766_vm14, %v12056_v38, 0.0 }
 0x70f   :  { %2834 = vadd.xlane.f32.xlu0 %v2833_v2  ;;  %v888_v2 = vcombine.low %v11848_v41, %v11989_v16 }
 0x718   :  { %1242 = vrot.lane.b32.xlu1 %v11989_v16, %s11427_s29 }
 0x725   :  { %1240 = vrot.lane.b32.xlu0 %v11858_v58, %s11427_s29 }
 0x75f   :  { %v2820_v27 = vpop.xlane.xlu1 %2819 }
 0x760   :  { %11233 = vrcp.f32 %v2820_v27 }
 0x763   :  { %v2826_v11 = vpop.xlane.xlu1 %2825 }
 0x764   :  { %v2817_v55 = vpop.xlane.xlu0 %2816 }
 0x765   :  { %11235 = vrcp.f32 %v2817_v55 }
 0x766   :  { %11237 = vrcp.f32 %v2826_v11  ;;  %v872_v11 = vcombine.low %v11732_v51, %v11987_v30 }
 0x768   :  { %v2823_v60 = vpop.xlane.xlu0 %2822  ;;  %v880_v56 = vrot.slane %v872_v11, %v11763_v1 }
 0x769   :  { %11239 = vrcp.f32 %v2823_v60  ;;  %v889_v60 = vcombine.high %v11848_v41, %v11989_v16 }
 0x76a   :  { %v11234_v39 = vpop.eup %11233 }
 0x76b   :  { %v2842_v46 = vmul.f32 %v11234_v39, %v11218_v44  ;;  %v804_v44 = vcombine.low %v11728_v43, %v11985_v19 }
 0x76c   :  { %v2838_v39 = vpop.xlane.xlu0 %2837 }
 0x76f   :  { %v11236_v26 = vpop.eup %11235 }
 0x770   :  { %v2840_v49 = vmul.f32 %v11236_v26, %v11222_v48  ;;  %v11238_v50 = vpop.eup %11237  ;;  %v820_v48 = vcombine.low %v11860_v5, %v11858_v58 }
 0x771   :  { %v2846_v45 = vmul.f32 %v11238_v50, %v11220_v36  ;;  %v812_v36 = vrot.slane %v804_v44, %v11763_v1  ;;  %v873_v50 = vcombine.high %v11732_v51, %v11987_v30  ;;  %v1464_v44 = vcombine.low %v12036_v29, %v12064_v7 }
 0x772   :  { %10641 = vmatprep.mubr.msk.f32.mxu1 %vm2766_vm14, %v2840_v49 }
 0x773   :  { %v11240_v9 = vpop.eup %11239  ;;  %10642 = vmatmul.mubr.msk.f32.vlgmr.msra.gmra.mrb[12].mxu1 %vm2766_vm14, %v2842_v46 }
 0x774   :  { %10960 = vmatpush3.bf16.msra.mxu1 %v12016_v53  ;;  %v2844_v22 = vmul.f32 %v11240_v9, %v11224_v54  ;;  %v821_v53 = vcombine.high %v11860_v5, %v11858_v58  ;;  %v828_v54 = vrot.slane %v820_v48, %v11763_v1  ;;  %v896_v9 = vrot.slane %v888_v2, %v11763_v1 }
 0x775   :  { %10966 = vmatprep.subr.bf16.mxu1 %v12014_v18  ;;  %v1465_v48 = vcombine.high %v12036_v29, %v12064_v7  ;;  %v1472_v7 = vrot.slane %v1464_v44, %v11763_v1 }
 0x776   :  { %10648 = vmatprep.mubr.msk.f32.mxu1 %vm2766_vm14, %v2844_v22  ;;  %v836_v35 = vcombine.low %v812_v36, %v828_v54  ;;  %v837_v61 = vcombine.high %v812_v36, %v828_v54 }
 0x777   :  { %10649 = vmatmul.mubr.msk.f32.vlgmr.msra.gmra.mrb[14].mxu1 %vm2766_vm14, %v2846_v45 }
 0x778   :  { %10968 = vmatpush3.bf16.msra.mxu1 %v12014_v18  ;;  %v835_v18 = vrot.slane %v821_v53, %v11763_v1  ;;  %v844_v62 = vrot.slane %v836_v35, %v11771_v10  ;;  %v851_v12 = vrot.slane %v837_v61, %v11771_v10  ;;  %v903_v53 = vrot.slane %v889_v60, %v11763_v1 }
 0x779   :  { %v887_v61 = vrot.slane %v873_v50, %v11763_v1  ;;  %v1396_v60 = vcombine.low %v11991_v14, %v12066_v28 }
 0x77a   :  { %v852_v23 = vcombine.low %v819_v31, %v835_v18  ;;  %v853_v57 = vcombine.high %v819_v31, %v835_v18  ;;  %v1076_v25 = vcombine.low %v844_v62, %v851_v12  ;;  %v10155_v63 = vcombine.high %v844_v62, %v851_v12 }
 0x77b   :  { %v1479_v62 = vrot.slane %v1465_v48, %v11763_v1 }
 0x77c   :  { %v860_v3 = vrot.slane %v852_v23, %v11771_v10  ;;  %v867_v6 = vrot.slane %v853_v57, %v11771_v10  ;;  %v12098_v49 = vrot.slane %v1076_v25, %v11763_v1  ;;  %v12101_v46 = vrot.slane %v10155_v63, %v11763_v1 }
 0x77d   :  { %v904_v23 = vcombine.low %v880_v56, %v896_v9  ;;  %v905_v57 = vcombine.high %v880_v56, %v896_v9  ;;  %v921_v25 = vcombine.high %v887_v61, %v903_v53 }
 0x77e   :  { %v1092_v27 = vcombine.low %v860_v3, %v867_v6  ;;  %v10156_v55 = vcombine.high %v860_v3, %v867_v6  ;;  %v1108_v31 = vcombine.low %v12098_v49, %v12101_v46  ;;  %v920_v6 = vcombine.low %v887_v61, %v903_v53 }
 0x77f   :  { %v12144_v56 = vrot.slane %v904_v23, %v11771_v10  ;;  %v1404_v23 = vrot.slane %v1396_v60, %v11763_v1 }
 0x780   :  { %v12107_v22 = vrot.slane %v1092_v27, %v11763_v1  ;;  %v12110_v45 = vrot.slane %v10156_v55, %v11763_v1 }
 0x782   :  { %v1124_v29 = vcombine.low %v12107_v22, %v12110_v45 }
 0x784   :  { %v12137_v50 = vrot.slane %v1124_v29, %v11771_v10 }
 0x794   :  { %v2832_v26 = vpop.xlane.xlu1 %2831 }
 0x795   :  { %11241 = vrcp.f32 %v2832_v26  ;;  %v1397_v26 = vcombine.high %v11991_v14, %v12066_v28 }
 0x798   :  { %v2829_v36 = vpop.xlane.xlu0 %2828  ;;  %v1243_v54 = vpop.permute.xlu1 %1242 }
 0x799   :  { %11243 = vrcp.f32 %v2829_v36  ;;  %v1480_v18 = vcombine.low %v12046_v33, %v1243_v54  ;;  %v1481_v35 = vcombine.high %v12046_v33, %v1243_v54  ;;  %v12130_v33 = vrot.slane %v1108_v31, %v11771_v10 }
 0x79a   :  { %11245 = vrcp.f32 %v2838_v39 }
 0x79b   :  { %v1488_v12 = vrot.slane %v1480_v18, %v11763_v1  ;;  %v1495_v3 = vrot.slane %v1481_v35, %v11763_v1  ;;  %v919_v18 = vrot.slane %v905_v57, %v11771_v10  ;;  %v12148_v35 = vrot.slane %v920_v6, %v11771_v10 }
 0x79c   :  { %v2835_v63 = vpop.xlane.xlu0 %2834 }
 0x79d   :  { %v1496_v2 = vcombine.low %v1472_v7, %v1488_v12  ;;  %v1497_v27 = vcombine.high %v1472_v7, %v1488_v12  ;;  %v1512_v55 = vcombine.low %v1479_v62, %v1495_v3  ;;  %v1513_v11 = vcombine.high %v1479_v62, %v1495_v3 }
 0x79e   :  { %11247 = vrcp.f32 %v2835_v63  ;;  %v935_v62 = vrot.slane %v921_v25, %v11771_v10  ;;  %v1411_v12 = vrot.slane %v1397_v26, %v11763_v1  ;;  %v1140_v3 = vcombine.low %v12130_v33, %v12137_v50 }
 0x79f   :  { %v1504_v39 = vrot.slane %v1496_v2, %v11771_v10  ;;  %v1511_v9 = vrot.slane %v1497_v27, %v11771_v10  ;;  %v1520_v44 = vrot.slane %v1512_v55, %v11771_v10  ;;  %v1527_v48 = vrot.slane %v1513_v11, %v11771_v10  ;;  %v11242_v36 = vpop.eup %11241 }
 0x7a0   :  { %v1241_v53 = vpop.permute.xlu0 %1240  ;;  %v2850_v2 = vmul.f32 %v11242_v36, %v12048_v17  ;;  %v1160_v17 = vcombine.low %v12148_v35, %v935_v62 }
 0x7a1   :  { %v1736_v54 = vcombine.low %v1504_v39, %v1511_v9  ;;  %v10165_v31 = vcombine.high %v1504_v39, %v1511_v9  ;;  %v1752_v14 = vcombine.low %v1520_v44, %v1527_v48  ;;  %v10166_v28 = vcombine.high %v1520_v44, %v1527_v48 }
 0x7a2   :  { %v1412_v61 = vcombine.low %v11993_v52, %v1241_v53  ;;  %v1413_v29 = vcombine.high %v11993_v52, %v1241_v53  ;;  %v1144_v44 = vcombine.low %v12144_v56, %v919_v18 }
 0x7a3   :  { %v11244_v7 = vpop.eup %11243  ;;  %v1743_v52 = vrot.slane %v1736_v54, %v11763_v1  ;;  %v1751_v27 = vrot.slane %v10165_v31, %v11763_v1  ;;  %v1759_v25 = vrot.slane %v1752_v14, %v11763_v1  ;;  %v1767_v55 = vrot.slane %v10166_v28, %v11763_v1 }
 0x7a4   :  { %v1420_v63 = vrot.slane %v1412_v61, %v11763_v1  ;;  %v1427_v57 = vrot.slane %v1413_v29, %v11763_v1  ;;  %v2848_v6 = vmul.f32 %v11244_v7, %v12052_v47  ;;  %v11246_v11 = vpop.eup %11245  ;;  %v10157_v47 = vcombine.high %v12144_v56, %v919_v18 }
 0x7a5   :  { %v2854_v28 = vmul.f32 %v11246_v11, %v12042_v42  ;;  %v1768_v56 = vcombine.low %v1743_v52, %v1751_v27  ;;  %v1784_v18 = vcombine.low %v1759_v25, %v1767_v55 }
 0x7a6   :  { %v1428_v60 = vcombine.low %v1404_v23, %v1420_v63  ;;  %v1429_v26 = vcombine.high %v1404_v23, %v1420_v63  ;;  %v1444_v39 = vcombine.low %v1411_v12, %v1427_v57  ;;  %v1445_v9 = vcombine.high %v1411_v12, %v1427_v57  ;;  %10655 = vmatprep.mubr.msk.f32.mxu0 %vm2766_vm14, %v2848_v6 }
 0x7a7   :  { %10656 = vmatmul.mubr.msk.f32.vlgmr.msra.gmra.mrb[8].mxu0 %vm2766_vm14, %v2850_v2  ;;  %v10158_v12 = vcombine.high %v12148_v35, %v935_v62  ;;  %v1141_v63 = vcombine.high %v12130_v33, %v12137_v50  ;;  %v1769_v57 = vcombine.high %v1743_v52, %v1751_v27  ;;  %v1785_v6 = vcombine.high %v1759_v25, %v1767_v55 }
 0x7a8   :  { %v11248_v48 = vpop.eup %11247  ;;  %v1436_v53 = vrot.slane %v1428_v60, %v11771_v10  ;;  %v1443_v36 = vrot.slane %v1429_v26, %v11771_v10  ;;  %v1452_v54 = vrot.slane %v1444_v39, %v11771_v10  ;;  %v1459_v31 = vrot.slane %v1445_v9, %v11771_v10  ;;  %10669 = vmatprep.mubr.msk.f32.mxu0 %vm2396_vm12, %v1140_v3 }
 0x7a9   :  { %v2852_v14 = vmul.f32 %v11248_v48, %v12056_v38  ;;  %v1776_v35 = vrot.slane %v1768_v56, %v11771_v10  ;;  %v1792_v62 = vrot.slane %v1784_v18, %v11771_v10  ;;  %v1151_v33 = vrot.slane %v1144_v44, %v11763_v1 }
 0x7aa   :  { %v1668_v61 = vcombine.low %v1436_v53, %v1443_v36  ;;  %v10163_v29 = vcombine.high %v1436_v53, %v1443_v36  ;;  %v1684_v7 = vcombine.low %v1452_v54, %v1459_v31  ;;  %v10164_v23 = vcombine.high %v1452_v54, %v1459_v31 }
 0x7ab   :  { %10662 = vmatprep.mubr.msk.f32.mxu1 %vm2766_vm14, %v2852_v14  ;;  %v1159_v50 = vrot.slane %v10157_v47, %v11763_v1  ;;  %v1783_v11 = vrot.slane %v1769_v57, %v11771_v10  ;;  %v1799_v60 = vrot.slane %v1785_v6, %v11771_v10  ;;  %v1167_v26 = vrot.slane %v1160_v17, %v11763_v1 }
 0x7ac   :  { %v1675_v3 = vrot.slane %v1668_v61, %v11763_v1  ;;  %v1683_v38 = vrot.slane %v10163_v29, %v11763_v1  ;;  %v1691_v42 = vrot.slane %v1684_v7, %v11763_v1  ;;  %v1699_v2 = vrot.slane %v10164_v23, %v11763_v1  ;;  %10663 = vmatmul.mubr.msk.f32.vlgmr.msra.gmra.mrb[16].mxu1 %vm2766_vm14, %v2854_v28 }
 0x7ad   :  { %10676 = vmatprep.mubr.msk.f32.mxu1 %vm2396_vm12, %v1141_v63  ;;  %v1175_v39 = vrot.slane %v10158_v12, %v11763_v1  ;;  %v1800_v53 = vcombine.low %v1776_v35, %v1792_v62  ;;  %v1801_v36 = vcombine.high %v1776_v35, %v1792_v62  ;;  %v1176_v56 = vcombine.low %v1151_v33, %v1159_v50 }
 0x7ae   :  { %v1700_v52 = vcombine.low %v1675_v3, %v1683_v38  ;;  %v1716_v27 = vcombine.low %v1691_v42, %v1699_v2  ;;  %v1701_v25 = vcombine.high %v1675_v3, %v1683_v38  ;;  %v1717_v55 = vcombine.high %v1691_v42, %v1699_v2 }
 0x7af   :  { %v1192_v18 = vcombine.low %v1167_v26, %v1175_v39  ;;  %v1802_v29 = vcombine.low %v1783_v11, %v1799_v60  ;;  %v1803_v7 = vcombine.high %v1783_v11, %v1799_v60  ;;  %v1109_v23 = vcombine.high %v12098_v49, %v12101_v46 }
 0x7b0   :  { %v1708_v9 = vrot.slane %v1700_v52, %v11771_v10  ;;  %v1724_v48 = vrot.slane %v1716_v27, %v11771_v10  ;;  %v1715_v44 = vrot.slane %v1701_v25, %v11771_v10  ;;  %v1731_v47 = vrot.slane %v1717_v55, %v11771_v10 }
 0x7b1   :  { %v1125_v12 = vcombine.high %v12107_v22, %v12110_v45  ;;  %v1184_v49 = vrot.slane %v1176_v56, %v11771_v10  ;;  %v1200_v46 = vrot.slane %v1192_v18, %v11771_v10  ;;  %v1123_v22 = vrot.slane %v1109_v23, %v11771_v10 }
 0x7b2   :  { %v1732_v54 = vcombine.low %v1708_v9, %v1724_v48  ;;  %v1733_v31 = vcombine.high %v1708_v9, %v1724_v48  ;;  %v1734_v14 = vcombine.low %v1715_v44, %v1731_v47  ;;  %v1735_v28 = vcombine.high %v1715_v44, %v1731_v47 }
 0x7b3   :  { %v1139_v45 = vrot.slane %v1125_v12, %v11771_v10  ;;  %v1208_v6 = vcombine.low %v1184_v49, %v1200_v46  ;;  %v1209_v3 = vcombine.high %v1184_v49, %v1200_v46  ;;  %v1177_v38 = vcombine.high %v1151_v33, %v1159_v50 }
 0x7b4   :  { %v10969_v61 = vpack.c.bf16 %v1800_v53, %v1732_v54  ;;  %v10975_v17 = vpack.c.bf16 %v1801_v36, %v1733_v31  ;;  %v10981_v63 = vpack.c.bf16 %v1802_v29, %v1734_v14  ;;  %v10987_v57 = vpack.c.bf16 %v1803_v7, %v1735_v28 }
 0x7b5   :  { %v1193_v42 = vcombine.high %v1167_v26, %v1175_v39  ;;  %v1142_v2 = vcombine.low %v1123_v22, %v1139_v45  ;;  %v1143_v35 = vcombine.high %v1123_v22, %v1139_v45  ;;  %v1191_v62 = vrot.slane %v1177_v38, %v11771_v10 }
 0x7b6   :  { %10971 = vmatprep.subr.msk.bf16.mxu0 %vm11916_vm13, %v10969_v61  ;;  %10977 = vmatprep.subr.msk.bf16.mxu1 %vm11916_vm13, %v10975_v17 }
 0x7b7   :  { %10974 = vmatpush3.bf16.xpose.msk.msra.mxu0 %vm11916_vm13, %v10969_v61  ;;  %10980 = vmatpush3.bf16.xpose.msk.msra.mxu1 %vm11916_vm13, %v10975_v17  ;;  %v1207_v33 = vrot.slane %v1193_v42, %v11771_v10 }
 0x7b8   :  { %10983 = vmatprep.subr.msk.bf16.mxu0 %vm11916_vm13, %v10981_v63  ;;  %10989 = vmatprep.subr.msk.bf16.mxu1 %vm11916_vm13, %v10987_v57 }
 0x7b9   :  { %v1210_v50 = vcombine.low %v1191_v62, %v1207_v33  ;;  %v1211_v52 = vcombine.high %v1191_v62, %v1207_v33 }
 0x7be   :  { %10670 = vmatmul.mubr.msk.f32.vlgmr.msra.gmra.mrb[10].mxu0 %vm2396_vm12, %v1208_v6  ;;  %10677 = vmatmul.mubr.msk.f32.vlgmr.msra.gmra.mrb[18].mxu1 %vm2396_vm12, %v1209_v3 }
 0x7bf   :  { %10986 = vmatpush3.bf16.xpose.msk.msra.mxu0 %vm11916_vm13, %v10981_v63  ;;  %10683 = vmatprep.mubr.msk.f32.mxu0 %vm2396_vm12, %v1142_v2 }
 0x7c0   :  { %10992 = vmatpush3.bf16.xpose.msk.msra.mxu1 %vm11916_vm13, %v10987_v57  ;;  %10690 = vmatprep.mubr.msk.f32.mxu1 %vm2396_vm12, %v1143_v35 }
 0x7c6   :  { %10684 = vmatmul.mubr.msk.f32.vlgmr.msra.gmra.mrb[12].mxu0 %vm2396_vm12, %v1210_v50 }
 0x7c7   :  { %10691 = vmatmul.mubr.msk.f32.vlgmr.msra.gmra.mrb[20].mxu1 %vm2396_vm12, %v1211_v52 }
 0x846   :  { %v10643_v27 = vpop.f32.mrb[12].mxu1 }
 0x847   :  { %v2927_v25 = vpop.f32.mrb[13].mxu1 }
 0x84a   :  { %v10650_v55 = vpop.f32.mrb[14].mxu1 }
 0x84b   :  { %v3008_v11 = vpop.f32.mrb[15].mxu1 }
 0x87a   :  { %v10657_v60 = vpop.f32.mrb[8].mxu0 }
 0x87b   :  { %v4028_v26 = vcombine.low %v10643_v27, %v10657_v60  ;;  %v4029_v39 = vcombine.high %v10643_v27, %v10657_v60  ;;  %v3089_v9 = vpop.f32.mrb[9].mxu0 }
 0x87c   :  { %v3960_v48 = vcombine.low %v2927_v25, %v3089_v9  ;;  %v3961_v44 = vcombine.high %v2927_v25, %v3089_v9 }
 0x87d   :  { %v4036_v28 = vrot.slane %v4028_v26, %v11763_v1  ;;  %v4043_v56 = vrot.slane %v4029_v39, %v11763_v1 }
 0x87e   :  { %v3968_v17 = vrot.slane %v3960_v48, %v11763_v1  ;;  %v3975_v29 = vrot.slane %v3961_v44, %v11763_v1 }
 0x87f   :  { %v10664_v47 = vpop.f32.mrb[16].mxu1 }
 0x880   :  { %v4044_v53 = vcombine.low %v10650_v55, %v10664_v47  ;;  %v4045_v36 = vcombine.high %v10650_v55, %v10664_v47  ;;  %v3170_v54 = vpop.f32.mrb[17].mxu1 }
 0x881   :  { %v3976_v31 = vcombine.low %v3008_v11, %v3170_v54  ;;  %v3977_v14 = vcombine.high %v3008_v11, %v3170_v54 }
 0x882   :  { %v4052_v18 = vrot.slane %v4044_v53, %v11763_v1  ;;  %v4059_v61 = vrot.slane %v4045_v36, %v11763_v1 }
 0x883   :  { %v3984_v7 = vrot.slane %v3976_v31, %v11763_v1  ;;  %v3991_v23 = vrot.slane %v3977_v14, %v11763_v1 }
 0x884   :  { %v4060_v12 = vcombine.low %v4036_v28, %v4052_v18  ;;  %v4061_v63 = vcombine.high %v4036_v28, %v4052_v18  ;;  %v4076_v57 = vcombine.low %v4043_v56, %v4059_v61  ;;  %v4077_v49 = vcombine.high %v4043_v56, %v4059_v61 }
 0x885   :  { %v3992_v46 = vcombine.low %v3968_v17, %v3984_v7  ;;  %v3993_v22 = vcombine.high %v3968_v17, %v3984_v7  ;;  %v4008_v45 = vcombine.low %v3975_v29, %v3991_v23  ;;  %v4009_v6 = vcombine.high %v3975_v29, %v3991_v23 }
 0x886   :  { %v4068_v3 = vrot.slane %v4060_v12, %v11771_v10  ;;  %v4075_v38 = vrot.slane %v4061_v63, %v11771_v10  ;;  %v4084_v42 = vrot.slane %v4076_v57, %v11771_v10  ;;  %v4091_v2 = vrot.slane %v4077_v49, %v11771_v10 }
 0x887   :  { %v4000_v35 = vrot.slane %v3992_v46, %v11771_v10  ;;  %v4007_v62 = vrot.slane %v3993_v22, %v11771_v10  ;;  %v4016_v33 = vrot.slane %v4008_v45, %v11771_v10  ;;  %v4023_v50 = vrot.slane %v4009_v6, %v11771_v10 }
 0x888   :  { %v4300_v52 = vcombine.low %v4068_v3, %v4075_v38  ;;  %v10227_v27 = vcombine.high %v4068_v3, %v4075_v38  ;;  %v4316_v25 = vcombine.low %v4084_v42, %v4091_v2  ;;  %v10228_v55 = vcombine.high %v4084_v42, %v4091_v2 }
 0x889   :  { %v4232_v11 = vcombine.low %v4000_v35, %v4007_v62  ;;  %v10225_v60 = vcombine.high %v4000_v35, %v4007_v62  ;;  %v4248_v26 = vcombine.low %v4016_v33, %v4023_v50  ;;  %v10226_v39 = vcombine.high %v4016_v33, %v4023_v50  ;;  %v10216_v62 = vld [vmem:[%s13716_s2 + $0x1] ss:$0 sm:$0xff] }
 0x88a   :  { %v4307_v9 = vrot.slane %v4300_v52, %v11763_v1  ;;  %v4315_v48 = vrot.slane %v10227_v27, %v11763_v1  ;;  %v4323_v44 = vrot.slane %v4316_v25, %v11763_v1  ;;  %v4331_v47 = vrot.slane %v10228_v55, %v11763_v1 }
 0x88b   :  { %v4239_v53 = vrot.slane %v4232_v11, %v11763_v1  ;;  %v4247_v36 = vrot.slane %v10225_v60, %v11763_v1  ;;  %v4255_v54 = vrot.slane %v4248_v26, %v11763_v1  ;;  %v4263_v31 = vrot.slane %v10226_v39, %v11763_v1 }
 0x88c   :  { %v4333_v14 = vcombine.high %v4307_v9, %v4315_v48  ;;  %v4349_v28 = vcombine.high %v4323_v44, %v4331_v47  ;;  %v4332_v56 = vcombine.low %v4307_v9, %v4315_v48  ;;  %v4348_v18 = vcombine.low %v4323_v44, %v4331_v47 }
 0x88d   :  { %v4265_v61 = vcombine.high %v4239_v53, %v4247_v36  ;;  %v4281_v17 = vcombine.high %v4255_v54, %v4263_v31  ;;  %v4264_v29 = vcombine.low %v4239_v53, %v4247_v36  ;;  %v4280_v7 = vcombine.low %v4255_v54, %v4263_v31 }
 0x88e   :  { %v4347_v23 = vrot.slane %v4333_v14, %v11771_v10  ;;  %v4363_v12 = vrot.slane %v4349_v28, %v11771_v10  ;;  %v12258_v63 = vrot.slane %v4332_v56, %v11771_v10  ;;  %v12261_v57 = vrot.slane %v4348_v18, %v11771_v10 }
 0x88f   :  { %v4279_v49 = vrot.slane %v4265_v61, %v11771_v10  ;;  %v4295_v46 = vrot.slane %v4281_v17, %v11771_v10  ;;  %v12266_v22 = vrot.slane %v4264_v29, %v11771_v10  ;;  %v12269_v45 = vrot.slane %v4280_v7, %v11771_v10 }
 0x890   :  { %v4366_v6 = vcombine.low %v4347_v23, %v4363_v12  ;;  %v4367_v3 = vcombine.high %v4347_v23, %v4363_v12  ;;  %v4365_v38 = vcombine.high %v12258_v63, %v12261_v57  ;;  %v4364_v42 = vcombine.low %v12258_v63, %v12261_v57 }
 0x891   :  { %v10671_v2 = vpop.f32.mrb[10].mxu0  ;;  %v10678_v35 = vpop.f32.mrb[18].mxu1  ;;  %v4298_v33 = vcombine.low %v4279_v49, %v4295_v46  ;;  %v4299_v50 = vcombine.high %v4279_v49, %v4295_v46  ;;  %v4297_v52 = vcombine.high %v12266_v22, %v12269_v45  ;;  %v4296_v27 = vcombine.low %v12266_v22, %v12269_v45 }
 0x892   :  { %v3528_v25 = vmul.f32 0.35355338, %v10671_v2  ;;  %v3257_v55 = vpop.f32.mrb[11].mxu0  ;;  %v3344_v11 = vpop.f32.mrb[19].mxu1  ;;  %v3530_v53 = vmul.f32 0.35355338, %v10678_v35 }
 0x893   :  { %v3527_v60 = vmul.f32 0.35355338, %v3257_v55  ;;  %v3529_v26 = vmul.f32 0.35355338, %v3344_v11  ;;  %v12282_v39 = vpack.i.bf16 %v4366_v6, %v4298_v33  ;;  %v12284_v9 = vpack.i.bf16 %v4367_v3, %v4299_v50 }
 0x894   :  { %v3541_v48 = vadd.f32 %v10216_v62, %v3528_v25  ;;  %v12286_v44 = vpack.i.bf16 %v4365_v38, %v4297_v52  ;;  %v3543_v61 = vadd.f32 %v10216_v62, %v3530_v53 }
 0x895   :  { %v3542_v47 = vadd.f32 %v10216_v62, %v3529_v26  ;;  %v3540_v54 = vadd.f32 %v10216_v62, %v3527_v60 }
 0x896   :  { %v3551_v36 = vsel %vm2766_vm14, %v3541_v48, -inf  ;;  %v3557_v46 = vsel %vm2766_vm14, %v3543_v61, -inf }
 0x897   :  { %3552 = vmax.xlane.f32.xlu0 %v3551_v36  ;;  %v3554_v31 = vsel %vm2766_vm14, %v3542_v47, -inf  ;;  %v3548_v18 = vsel %vm2766_vm14, %v3540_v54, -inf }
 0x898   :  { %3555 = vmax.xlane.f32.xlu1 %v3554_v31 }
 0x899   :  { %v10685_v14 = vpop.f32.mrb[12].mxu0 }
 0x89a   :  { %v10692_v28 = vpop.f32.mrb[20].mxu1  ;;  %v3431_v56 = vpop.f32.mrb[13].mxu0  ;;  %v3532_v17 = vmul.f32 0.35355338, %v10685_v14 }
 0x89b   :  { %v3531_v29 = vmul.f32 0.35355338, %v3431_v56  ;;  %v3518_v7 = vpop.f32.mrb[21].mxu1  ;;  %3549 = vmax.xlane.f32.xlu0 %v3548_v18  ;;  %v3534_v49 = vmul.f32 0.35355338, %v10692_v28 }
 0x89c   :  { %v3533_v23 = vmul.f32 0.35355338, %v3518_v7  ;;  %v3545_v38 = vadd.f32 %v10216_v62, %v3532_v17 }
 0x89d   :  { %v3544_v12 = vadd.f32 %v10216_v62, %v3531_v29  ;;  %v3547_v35 = vadd.f32 %v10216_v62, %v3534_v49 }
 0x89e   :  { %v3546_v6 = vadd.f32 %v10216_v62, %v3533_v23  ;;  %v3563_v33 = vsel %vm2766_vm14, %v3545_v38, -inf }
 0x89f   :  { %3558 = vmax.xlane.f32.xlu0 %v3557_v46  ;;  %v3560_v3 = vsel %vm2766_vm14, %v3544_v12, -inf  ;;  %v3569_v50 = vsel %vm2766_vm14, %v3547_v35, -inf }
 0x8a0   :  { %3561 = vmax.xlane.f32.xlu1 %v3560_v3  ;;  %v3566_v2 = vsel %vm2766_vm14, %v3546_v6, -inf }
 0x8a3   :  { %3567 = vmax.xlane.f32.xlu0 %v3566_v2 }
 0x8a4   :  { %3564 = vmax.xlane.f32.xlu1 %v3563_v33 }
 0x8a7   :  { %3570 = vmax.xlane.f32.xlu0 %v3569_v50 }
 0x8b5   :  { %1808 = vrot.lane.b32.xlu1 %v11728_v43, %s11426_s0 }
 0x8b9   :  { %1816 = vrot.lane.b32.xlu1 %v11860_v5, %s11426_s0 }
 0x8bd   :  { %1810 = vrot.lane.b32.xlu0 %v11732_v51, %s11426_s0  ;;  %1818 = vrot.lane.b32.xlu1 %v11848_v41, %s11426_s0 }
 0x8c1   :  { %1824 = vrot.lane.b32.xlu0 %v11985_v19, %s11426_s0  ;;  %1826 = vrot.lane.b32.xlu1 %v11987_v30, %s11426_s0 }
 0x8c5   :  { %1832 = vrot.lane.b32.xlu0 %v11858_v58, %s11426_s0  ;;  %1834 = vrot.lane.b32.xlu1 %v11989_v16, %s11426_s0 }
 0x924   :  { %v3553_v43 = vpop.xlane.xlu0 %3552 }
 0x925   :  { %v3573_v5 = vsub.f32 %v3541_v48, %v3553_v43  ;;  %v3556_v52 = vpop.xlane.xlu1 %3555 }
 0x926   :  { %v3574_v41 = vsub.f32 %v3542_v47, %v3556_v52 }
 0x927   :  { %v3582_v62 = vmul.f32 1.442695, %v3573_v5 }
 0x928   :  { %v3550_v51 = vpop.xlane.xlu0 %3549  ;;  %v3584_v30 = vmul.f32 1.442695, %v3574_v41 }
 0x929   :  { %11249 = vpow2.f32 %v3582_v62  ;;  %v3572_v25 = vsub.f32 %v3540_v54, %v3550_v51 }
 0x92b   :  { %v3580_v55 = vmul.f32 1.442695, %v3572_v25 }
 0x92c   :  { %v3559_v11 = vpop.xlane.xlu0 %3558 }
 0x92d   :  { %11251 = vpow2.f32 %v3580_v55  ;;  %v3575_v19 = vsub.f32 %v3543_v61, %v3559_v11  ;;  %v3562_v60 = vpop.xlane.xlu1 %3561 }
 0x92e   :  { %v3576_v53 = vsub.f32 %v3544_v12, %v3562_v60 }
 0x92f   :  { %v3586_v26 = vmul.f32 1.442695, %v3575_v19 }
 0x930   :  { %v3568_v58 = vpop.xlane.xlu0 %3567  ;;  %v3588_v14 = vmul.f32 1.442695, %v3576_v53 }
 0x931   :  { %11253 = vpow2.f32 %v3586_v26  ;;  %v3578_v36 = vsub.f32 %v3546_v6, %v3568_v58  ;;  %v3565_v16 = vpop.xlane.xlu1 %3564 }
 0x932   :  { %v3577_v31 = vsub.f32 %v3545_v38, %v3565_v16  ;;  %11255 = vpow2.f32 %v3584_v30 }
 0x933   :  { %v12312_v48 = vpop.eup %11249  ;;  %v3592_v28 = vmul.f32 1.442695, %v3578_v36 }
 0x934   :  { %v3571_v54 = vpop.xlane.xlu0 %3570  ;;  %v3599_v47 = vsel %vm2766_vm14, %v12312_v48, 0.0  ;;  %v3590_v56 = vmul.f32 1.442695, %v3577_v31 }
 0x935   :  { %11257 = vpow2.f32 %v3592_v28  ;;  %v3579_v18 = vsub.f32 %v3547_v35, %v3571_v54  ;;  %3600 = vadd.xlane.f32.xlu1 %v3599_v47  ;;  %v1809_v61 = vpop.permute.xlu1 %1808 }
 0x936   :  { %11259 = vpow2.f32 %v3588_v14 }
 0x937   :  { %v12316_v17 = vpop.eup %11251  ;;  %v3594_v29 = vmul.f32 1.442695, %v3579_v18  ;;  %11261 = vpow2.f32 %v3590_v56 }
 0x938   :  { %v1811_v7 = vpop.permute.xlu0 %1810  ;;  %v3596_v23 = vsel %vm2766_vm14, %v12316_v17, 0.0 }
 0x939   :  { %3597 = vadd.xlane.f32.xlu1 %v3596_v23  ;;  %v1817_v12 = vpop.permute.xlu1 %1816  ;;  %11263 = vpow2.f32 %v3594_v29 }
 0x93b   :  { %v12320_v49 = vpop.eup %11253 }
 0x93c   :  { %v1825_v46 = vpop.permute.xlu0 %1824  ;;  %v3605_v6 = vsel %vm2766_vm14, %v12320_v49, 0.0  ;;  %v12324_v3 = vpop.eup %11255 }
 0x93d   :  { %3606 = vadd.xlane.f32.xlu0 %v3605_v6  ;;  %v1819_v38 = vpop.permute.xlu1 %1818  ;;  %v1988_v35 = vcombine.low %v1809_v61, %v1825_v46  ;;  %v1989_v33 = vcombine.high %v1809_v61, %v1825_v46  ;;  %v3602_v43 = vsel %vm2766_vm14, %v12324_v3, 0.0 }
 0x93f   :  { %v12326_v2 = vpop.eup %11257  ;;  %v1996_v11 = vrot.slane %v1988_v35, %v11763_v1  ;;  %v2003_v19 = vrot.slane %v1989_v33, %v11763_v1 }
 0x940   :  { %v1833_v50 = vpop.permute.xlu0 %1832  ;;  %v3614_v5 = vsel %vm2766_vm14, %v12326_v2, 0.0  ;;  %v12332_v62 = vpop.eup %11259 }
 0x941   :  { %v2004_v52 = vcombine.low %v1817_v12, %v1833_v50  ;;  %v2005_v51 = vcombine.high %v1817_v12, %v1833_v50  ;;  %3603 = vadd.xlane.f32.xlu0 %v3602_v43  ;;  %3615 = vadd.xlane.f32.xlu1 %v3614_v5  ;;  %v1827_v25 = vpop.permute.xlu1 %1826  ;;  %v12334_v55 = vpop.eup %11261  ;;  %v3608_v53 = vsel %vm2766_vm14, %v12332_v62, 0.0 }
 0x942   :  { %v2056_v41 = vcombine.low %v1811_v7, %v1827_v25  ;;  %v2057_v26 = vcombine.high %v1811_v7, %v1827_v25  ;;  %v3611_v18 = vsel %vm2766_vm14, %v12334_v55, 0.0 }
 0x943   :  { %v2012_v60 = vrot.slane %v2004_v52, %v11763_v1  ;;  %v2019_v30 = vrot.slane %v2005_v51, %v11763_v1  ;;  %v12342_v58 = vpop.eup %11263 }
 0x944   :  { %v2064_v54 = vrot.slane %v2056_v41, %v11763_v1  ;;  %v2071_v12 = vrot.slane %v2057_v26, %v11763_v1 }
 0x945   :  { %v2020_v36 = vcombine.low %v1996_v11, %v2012_v60  ;;  %v2021_v16 = vcombine.high %v1996_v11, %v2012_v60  ;;  %v2036_v31 = vcombine.low %v2003_v19, %v2019_v30  ;;  %v2037_v14 = vcombine.high %v2003_v19, %v2019_v30  ;;  %3609 = vadd.xlane.f32.xlu0 %v3608_v53  ;;  %v1835_v28 = vpop.permute.xlu1 %1834 }
 0x946   :  { %v2072_v47 = vcombine.low %v1819_v38, %v1835_v28  ;;  %v2073_v56 = vcombine.high %v1819_v38, %v1835_v28  ;;  %v3617_v38 = vsel %vm2766_vm14, %v12342_v58, 0.0 }
 0x947   :  { %v2028_v61 = vrot.slane %v2020_v36, %v11771_v10  ;;  %v2035_v29 = vrot.slane %v2021_v16, %v11771_v10  ;;  %v2044_v7 = vrot.slane %v2036_v31, %v11771_v10  ;;  %v2051_v23 = vrot.slane %v2037_v14, %v11771_v10 }
 0x948   :  { %v2080_v46 = vrot.slane %v2072_v47, %v11763_v1  ;;  %v2087_v6 = vrot.slane %v2073_v56, %v11763_v1 }
 0x949   :  { %v2260_v35 = vcombine.low %v2028_v61, %v2035_v29  ;;  %v10171_v33 = vcombine.high %v2028_v61, %v2035_v29  ;;  %v2276_v50 = vcombine.low %v2044_v7, %v2051_v23  ;;  %v10172_v43 = vcombine.high %v2044_v7, %v2051_v23  ;;  %3612 = vadd.xlane.f32.xlu0 %v3611_v18 }
 0x94a   :  { %v2088_v5 = vcombine.low %v2064_v54, %v2080_v46  ;;  %v2089_v52 = vcombine.high %v2064_v54, %v2080_v46  ;;  %v2104_v51 = vcombine.low %v2071_v12, %v2087_v6  ;;  %v2105_v25 = vcombine.high %v2071_v12, %v2087_v6 }
 0x94b   :  { %v2267_v41 = vrot.slane %v2260_v35, %v11763_v1  ;;  %v2275_v11 = vrot.slane %v10171_v33, %v11763_v1  ;;  %v2283_v19 = vrot.slane %v2276_v50, %v11763_v1  ;;  %v2291_v60 = vrot.slane %v10172_v43, %v11763_v1 }
 0x94c   :  { %v2096_v30 = vrot.slane %v2088_v5, %v11771_v10  ;;  %v2103_v26 = vrot.slane %v2089_v52, %v11771_v10  ;;  %v2112_v53 = vrot.slane %v2104_v51, %v11771_v10  ;;  %v2119_v36 = vrot.slane %v2105_v25, %v11771_v10 }
 0x94d   :  { %3618 = vadd.xlane.f32.xlu0 %v3617_v38  ;;  %v2292_v16 = vcombine.low %v2267_v41, %v2275_v11  ;;  %v2308_v31 = vcombine.low %v2283_v19, %v2291_v60  ;;  %v2293_v56 = vcombine.high %v2267_v41, %v2275_v11  ;;  %v2309_v18 = vcombine.high %v2283_v19, %v2291_v60 }
 0x94e   :  { %v2328_v14 = vcombine.low %v2096_v30, %v2103_v26  ;;  %v10173_v28 = vcombine.high %v2096_v30, %v2103_v26  ;;  %v2344_v54 = vcombine.low %v2112_v53, %v2119_v36  ;;  %v10174_v47 = vcombine.high %v2112_v53, %v2119_v36 }
 0x94f   :  { %v2300_v12 = vrot.slane %v2292_v16, %v11771_v10  ;;  %v2316_v46 = vrot.slane %v2308_v31, %v11771_v10  ;;  %v2307_v50 = vrot.slane %v2293_v56, %v11771_v10  ;;  %v2323_v43 = vrot.slane %v2309_v18, %v11771_v10 }
 0x950   :  { %v2335_v61 = vrot.slane %v2328_v14, %v11763_v1  ;;  %v2343_v29 = vrot.slane %v10173_v28, %v11763_v1  ;;  %v2351_v7 = vrot.slane %v2344_v54, %v11763_v1  ;;  %v2359_v23 = vrot.slane %v10174_v47, %v11763_v1 }
 0x951   :  { %v2324_v41 = vcombine.low %v2300_v12, %v2316_v46  ;;  %v2325_v11 = vcombine.high %v2300_v12, %v2316_v46  ;;  %v2326_v36 = vcombine.low %v2307_v50, %v2323_v43  ;;  %v2327_v16 = vcombine.high %v2307_v50, %v2323_v43 }
 0x952   :  { %4571 = vrot.lane.b32.xlu1 %v11691_v4, %s11428_s30  ;;  %v2360_v6 = vcombine.low %v2335_v61, %v2343_v29  ;;  %v2376_v38 = vcombine.low %v2351_v7, %v2359_v23  ;;  %v2361_v35 = vcombine.high %v2335_v61, %v2343_v29  ;;  %v2377_v33 = vcombine.high %v2351_v7, %v2359_v23 }
 0x954   :  { %v2368_v5 = vrot.slane %v2360_v6, %v11771_v10  ;;  %v2384_v52 = vrot.slane %v2376_v38, %v11771_v10  ;;  %v2375_v51 = vrot.slane %v2361_v35, %v11771_v10  ;;  %v2391_v25 = vrot.slane %v2377_v33, %v11771_v10 }
 0x956   :  { %11115 = vrot.lane.b32.xlu1 %v12282_v39, %s11434_s12  ;;  %v2392_v4 = vcombine.low %v2368_v5, %v2384_v52  ;;  %v2393_v19 = vcombine.high %v2368_v5, %v2384_v52  ;;  %v2394_v60 = vcombine.low %v2375_v51, %v2391_v25  ;;  %v2395_v30 = vcombine.high %v2375_v51, %v2391_v25 }
 0x958   :  { %v10993_v26 = vpack.c.bf16 %v2392_v4, %v2324_v41  ;;  %v10997_v53 = vpack.c.bf16 %v2393_v19, %v2325_v11  ;;  %v11001_v31 = vpack.c.bf16 %v2394_v60, %v2326_v36  ;;  %v11005_v14 = vpack.c.bf16 %v2395_v30, %v2327_v16 }
 0x95a   :  { %11120 = vrot.lane.b32.xlu1 %v12284_v9, %s11435_s13  ;;  %10994 = vmatprep.subr.bf16.mxu0 %v10993_v26 }
 0x95b   :  { %10998 = vmatprep.subr.bf16.mxu1 %v10997_v53  ;;  %10996 = vmatpush3.bf16.msra.mxu0 %v10993_v26 }
 0x95c   :  { %11000 = vmatpush3.bf16.msra.mxu1 %v10997_v53  ;;  %11002 = vmatprep.subr.bf16.mxu0 %v11001_v31 }
 0x95d   :  { %11006 = vmatprep.subr.bf16.mxu1 %v11005_v14 }
 0x963   :  { %11110 = vrot.lane.b32.xlu0 %v12286_v44, %s11436_s14 }
 0x9c2   :  { %v3601_v39 = vpop.xlane.xlu1 %3600 }
 0x9c3   :  { %11265 = vrcp.f32 %v3601_v39 }
 0x9c6   :  { %v3598_v28 = vpop.xlane.xlu1 %3597 }
 0x9c7   :  { %11267 = vrcp.f32 %v3598_v28 }
 0x9ca   :  { %v3607_v54 = vpop.xlane.xlu0 %3606 }
 0x9cb   :  { %11269 = vrcp.f32 %v3607_v54 }
 0x9cd   :  { %v11266_v56 = vpop.eup %11265 }
 0x9ce   :  { %v3604_v47 = vpop.xlane.xlu0 %3603  ;;  %v3616_v9 = vpop.xlane.xlu1 %3615  ;;  %v3623_v23 = vmul.f32 %v11266_v56, %v12312_v48 }
 0x9cf   :  { %11271 = vrcp.f32 %v3604_v47 }
 0x9d0   :  { %11273 = vrcp.f32 %v3616_v9 }
 0x9d1   :  { %v11268_v18 = vpop.eup %11267 }
 0x9d2   :  { %v3610_v61 = vpop.xlane.xlu0 %3609  ;;  %v4572_v29 = vpop.permute.xlu1 %4571  ;;  %v3621_v7 = vmul.f32 %v11268_v18, %v12316_v17 }
 0x9d3   :  { %11275 = vrcp.f32 %v3610_v61 }
 0x9d4   :  { %10697 = vmatprep.mubr.msk.f32.mxu0 %vm2766_vm14, %v3621_v7 }
 0x9d5   :  { %10698 = vmatmul.mubr.msk.f32.vlgmr.msra.gmra.mrb[14].mxu0 %vm2766_vm14, %v3623_v23  ;;  %v11270_v12 = vpop.eup %11269 }
 0x9d6   :  { %11004 = vmatpush3.bf16.msra.mxu0 %v11001_v31  ;;  %v3613_v44 = vpop.xlane.xlu0 %3612  ;;  %v11116_v46 = vpop.permute.xlu1 %11115  ;;  %v3627_v17 = vmul.f32 %v11270_v12, %v12320_v49 }
 0x9d7   :  { %11277 = vrcp.f32 %v3613_v44  ;;  %10721 = vmatprep.subr.bf16.mxu0 %v4572_v29  ;;  %v11117_v41 = vunpack.i.l.bf16 %v11116_v46 }
 0x9d9   :  { %v11272_v6 = vpop.eup %11271 }
 0x9da   :  { %v11274_v38 = vpop.eup %11273  ;;  %v3619_v35 = vpop.xlane.xlu0 %3618  ;;  %v3625_v33 = vmul.f32 %v11272_v6, %v12324_v3  ;;  %v11118_v3 = vunpack.i.h.bf16 %v11116_v46 }
 0x9db   :  { %11279 = vrcp.f32 %v3619_v35  ;;  %v3633_v48 = vmul.f32 %v11274_v38, %v12326_v2  ;;  %v11121_v43 = vpop.permute.xlu1 %11120 }
 0x9dc   :  { %10704 = vmatprep.mubr.msk.f32.mxu1 %vm2766_vm14, %v3625_v33  ;;  %v11123_v4 = vunpack.i.h.bf16 %v11121_v43  ;;  %v11122_v2 = vunpack.i.l.bf16 %v11121_v43 }
 0x9dd   :  { %v11276_v50 = vpop.eup %11275  ;;  %10705 = vmatmul.mubr.msk.f32.vlgmr.msra.gmra.mrb[22].mxu1 %vm2766_vm14, %v3627_v17 }
 0x9de   :  { %11008 = vmatpush3.bf16.msra.mxu1 %v11005_v14  ;;  %v11111_v5 = vpop.permute.xlu0 %11110  ;;  %10718 = vmatprep.mubr.msk.f32.mxu1 %vm2766_vm14, %v3633_v48  ;;  %v3629_v52 = vmul.f32 %v11276_v50, %v12332_v62 }
 0x9df   :  { %v11113_v51 = vunpack.i.h.bf16 %v11111_v5  ;;  %v11112_v25 = vunpack.i.l.bf16 %v11111_v5 }
 0x9e0   :  { %10711 = vmatprep.mubr.msk.f32.mxu0 %vm2766_vm14, %v3629_v52 }
 0x9e1   :  { %v11278_v49 = vpop.eup %11277  ;;  %v4553_v11 = vsel %vm2396_vm12, %v4364_v42, %v11113_v51  ;;  %v4552_v62 = vsel %vm2396_vm12, %v4296_v27, %v11112_v25 }
 0x9e2   :  { %v4556_v19 = vsel %vm2766_vm14, %v4552_v62, %v11117_v41  ;;  %v4557_v60 = vsel %vm2766_vm14, %v4553_v11, %v11118_v3  ;;  %v3631_v30 = vmul.f32 %v11278_v49, %v12334_v55 }
 0x9e3   :  { %v4561_v26 = vsel %vm4560_vm15, %v4556_v19, %v11122_v2  ;;  %v4562_v53 = vsel %vm4560_vm15, %v4557_v60, %v11123_v4 }
 0x9e4   :  { %10712 = vmatmul.mubr.msk.f32.vlgmr.msra.gmra.mrb[16].mxu0 %vm2766_vm14, %v3631_v30  ;;  %v4565_v63 = vpack.c.bf16 %v4562_v53, %v4561_v26 }
 0x9e5   :  { %v11280_v57 = vpop.eup %11279  ;;  %10722 = vmatpush3.bf16.msra.mxu0 %v4572_v29 }
 0x9e6   :  { %10725 = vmatprep.mubr.msk.bf16.mxu0 %vm88_vm0, %v4565_v63  ;;  %v3635_v22 = vmul.f32 %v11280_v57, %v12342_v58 }
 0x9e8   :  { %10719 = vmatmul.mubr.msk.f32.vlgmr.msra.gmra.mrb[24].mxu1 %vm2766_vm14, %v3635_v22 }
 0xaa8   :  { %v10699_v45 = vpop.f32.mrb[14].mxu0 }
 0xaa9   :  { %v3708_v42 = vpop.f32.mrb[15].mxu0 }
 0xab0   :  { %v10706_v27 = vpop.f32.mrb[22].mxu1 }
 0xab1   :  { %v3789_v36 = vpop.f32.mrb[23].mxu1 }
 0xab7   :  { %v10713_v55 = vpop.f32.mrb[16].mxu0 }
 0xab8   :  { %v4164_v16 = vcombine.low %v10699_v45, %v10713_v55  ;;  %v4165_v31 = vcombine.high %v10699_v45, %v10713_v55  ;;  %v3870_v14 = vpop.f32.mrb[17].mxu0 }
 0xab9   :  { %v4096_v39 = vcombine.low %v3708_v42, %v3870_v14  ;;  %v4097_v28 = vcombine.high %v3708_v42, %v3870_v14 }
 0xaba   :  { %v4172_v58 = vrot.slane %v4164_v16, %v11763_v1  ;;  %v4179_v29 = vrot.slane %v4165_v31, %v11763_v1 }
 0xabb   :  { %v10720_v54 = vpop.f32.mrb[24].mxu1  ;;  %v4104_v44 = vrot.slane %v4096_v39, %v11763_v1  ;;  %v4111_v12 = vrot.slane %v4097_v28, %v11763_v1 }
 0xabc   :  { %v4180_v47 = vcombine.low %v10706_v27, %v10720_v54  ;;  %v4181_v9 = vcombine.high %v10706_v27, %v10720_v54  ;;  %v3951_v56 = vpop.f32.mrb[25].mxu1 }
 0xabd   :  { %v4112_v18 = vcombine.low %v3789_v36, %v3951_v56  ;;  %v4113_v61 = vcombine.high %v3789_v36, %v3951_v56 }
 0xabe   :  { %v4188_v7 = vrot.slane %v4180_v47, %v11763_v1  ;;  %v4195_v23 = vrot.slane %v4181_v9, %v11763_v1 }
 0xabf   :  { %v4120_v46 = vrot.slane %v4112_v18, %v11763_v1  ;;  %v4127_v6 = vrot.slane %v4113_v61, %v11763_v1 }
 0xac0   :  { %v4196_v38 = vcombine.low %v4172_v58, %v4188_v7  ;;  %v4197_v35 = vcombine.high %v4172_v58, %v4188_v7  ;;  %v4212_v33 = vcombine.low %v4179_v29, %v4195_v23  ;;  %v4213_v17 = vcombine.high %v4179_v29, %v4195_v23 }
 0xac1   :  { %v4128_v48 = vcombine.low %v4104_v44, %v4120_v46  ;;  %v4129_v50 = vcombine.high %v4104_v44, %v4120_v46  ;;  %v4144_v43 = vcombine.low %v4111_v12, %v4127_v6  ;;  %v4145_v5 = vcombine.high %v4111_v12, %v4127_v6 }
 0xac2   :  { %v4204_v52 = vrot.slane %v4196_v38, %v11771_v10  ;;  %v4211_v51 = vrot.slane %v4197_v35, %v11771_v10  ;;  %v4220_v25 = vrot.slane %v4212_v33, %v11771_v10  ;;  %v4227_v3 = vrot.slane %v4213_v17, %v11771_v10 }
 0xac3   :  { %v4136_v41 = vrot.slane %v4128_v48, %v11771_v10  ;;  %v4143_v49 = vrot.slane %v4129_v50, %v11771_v10  ;;  %v4152_v4 = vrot.slane %v4144_v43, %v11771_v10  ;;  %v4159_v2 = vrot.slane %v4145_v5, %v11771_v10 }
 0xac4   :  { %v4436_v11 = vcombine.low %v4204_v52, %v4211_v51  ;;  %v10231_v62 = vcombine.high %v4204_v52, %v4211_v51  ;;  %v4452_v19 = vcombine.low %v4220_v25, %v4227_v3  ;;  %v10232_v60 = vcombine.high %v4220_v25, %v4227_v3 }
 0xac5   :  { %v4368_v30 = vcombine.low %v4136_v41, %v4143_v49  ;;  %v10229_v26 = vcombine.high %v4136_v41, %v4143_v49  ;;  %v4384_v53 = vcombine.low %v4152_v4, %v4159_v2  ;;  %v10230_v63 = vcombine.high %v4152_v4, %v4159_v2 }
 0xac6   :  { %v4443_v57 = vrot.slane %v4436_v11, %v11763_v1  ;;  %v4451_v22 = vrot.slane %v10231_v62, %v11763_v1  ;;  %v4459_v45 = vrot.slane %v4452_v19, %v11763_v1  ;;  %v4467_v42 = vrot.slane %v10232_v60, %v11763_v1 }
 0xac7   :  { %v4375_v27 = vrot.slane %v4368_v30, %v11763_v1  ;;  %v4383_v36 = vrot.slane %v10229_v26, %v11763_v1  ;;  %v4391_v55 = vrot.slane %v4384_v53, %v11763_v1  ;;  %v4399_v16 = vrot.slane %v10230_v63, %v11763_v1 }
 0xac8   :  { %v4469_v31 = vcombine.high %v4443_v57, %v4451_v22  ;;  %v4485_v14 = vcombine.high %v4459_v45, %v4467_v42  ;;  %v4468_v39 = vcombine.low %v4443_v57, %v4451_v22  ;;  %v4484_v28 = vcombine.low %v4459_v45, %v4467_v42  ;;  %v10233_v22 = vld [vmem:[%s13714_s6 + $0x3] ss:$0 sm:$0xff] }
 0xac9   :  { %v4401_v54 = vcombine.high %v4375_v27, %v4383_v36  ;;  %v4417_v47 = vcombine.high %v4391_v55, %v4399_v16  ;;  %v4400_v9 = vcombine.low %v4375_v27, %v4383_v36  ;;  %v4416_v56 = vcombine.low %v4391_v55, %v4399_v16 }
 0xaca   :  { %v4483_v18 = vrot.slane %v4469_v31, %v11771_v10  ;;  %v4499_v61 = vrot.slane %v4485_v14, %v11771_v10  ;;  %v4476_v58 = vrot.slane %v4468_v39, %v11771_v10  ;;  %v4492_v29 = vrot.slane %v4484_v28, %v11771_v10 }
 0xacb   :  { %v4415_v7 = vrot.slane %v4401_v54, %v11771_v10  ;;  %v4431_v23 = vrot.slane %v4417_v47, %v11771_v10  ;;  %v4408_v44 = vrot.slane %v4400_v9, %v11771_v10  ;;  %v4424_v12 = vrot.slane %v4416_v56, %v11771_v10 }
 0xacc   :  { %v4502_v46 = vcombine.low %v4483_v18, %v4499_v61  ;;  %v4501_v6 = vcombine.high %v4476_v58, %v4492_v29  ;;  %v4503_v38 = vcombine.high %v4483_v18, %v4499_v61  ;;  %v4500_v35 = vcombine.low %v4476_v58, %v4492_v29 }
 0xacd   :  { %v4434_v33 = vcombine.low %v4415_v7, %v4431_v23  ;;  %v4433_v17 = vcombine.high %v4408_v44, %v4424_v12  ;;  %v4435_v48 = vcombine.high %v4415_v7, %v4431_v23  ;;  %v4432_v50 = vcombine.low %v4408_v44, %v4424_v12 }
 0xacf   :  { %v11129_v43 = vpack.i.bf16 %v4502_v46, %v4434_v33  ;;  %v11124_v5 = vpack.i.bf16 %v4501_v6, %v4433_v17  ;;  %v11134_v52 = vpack.i.bf16 %v4503_v38, %v4435_v48 }
 0xad1   :  { %11130 = vrot.lane.b32.xlu0 %v11129_v43, %s11434_s12  ;;  %11125 = vrot.lane.b32.xlu1 %v11124_v5, %s11436_s14 }
 0xad5   :  { %4573 = vrot.lane.b32.xlu0 %v11699_v8, %s11428_s30  ;;  %11135 = vrot.lane.b32.xlu1 %v11134_v52, %s11435_s13  ;;  %v535_v52 = vld [vmem:[%s13712_s3 + $0xc] sm:$0xf] }
 0xb43   :  { %v11131_v51 = vpop.permute.xlu0 %11130  ;;  %v11126_v25 = vpop.permute.xlu1 %11125 }
 0xb44   :  { %v11128_v3 = vunpack.i.h.bf16 %v11126_v25  ;;  %v11127_v41 = vunpack.i.l.bf16 %v11126_v25  ;;  %v11133_v49 = vunpack.i.h.bf16 %v11131_v51  ;;  %v11132_v4 = vunpack.i.l.bf16 %v11131_v51  ;;  %v536_v51 = vld [vmem:[%s13712_s3 + $0x2c] sm:$0xf] }
 0xb45   :  { %v10238_v25 = vcombine.low %v535_v52, %v536_v51 }
 0xb46   :  { %v4555_v2 = vsel %vm2396_vm12, %v4500_v35, %v11128_v3  ;;  %v4554_v11 = vsel %vm2396_vm12, %v4432_v50, %v11127_v41  ;;  %v537_v3 = vld [vmem:[%s13712_s3 + $0x4c] sm:$0xf] }
 0xb47   :  { %v4574_v62 = vpop.permute.xlu0 %4573  ;;  %v11136_v19 = vpop.permute.xlu1 %11135  ;;  %v4558_v26 = vsel %vm2766_vm14, %v4554_v11, %v11132_v4  ;;  %v4559_v8 = vsel %vm2766_vm14, %v4555_v2, %v11133_v49  ;;  %v538_v41 = vld [vmem:[%s13712_s3 + $0x6c] sm:$0xf]  ;;  %10729 = vmatprep.subr.bf16.mxu1 %v10238_v25  ;;  %v548_v4 = vld [vmem:[%s13715_s7] sm:$0x5]  ;;  %v12500_v2 = vsub.s32 0, %v11756_v59  ;;  %v4713_v11 = vsub.s32 2, %v11756_v59 }
 0xb48   :  { %v11138_v60 = vunpack.i.h.bf16 %v11136_v19  ;;  %v11137_v30 = vunpack.i.l.bf16 %v11136_v19  ;;  %10723 = vmatprep.subr.bf16.mxu0 %v4574_v62  ;;  %v10239_v49 = vcombine.low %v537_v3, %v538_v41  ;;  %10730 = vmatpush3.bf16.msra.mxu1 %v10238_v25  ;;  %v11192_v59 = vld [vmem:[%s13717_s4 + $0x18] sm:$0xff]  }
 0xb49   :  { %10724 = vmatpush3.bf16.msra.mxu0 %v4574_v62  ;;  %v11169_v62 = vld [vmem:[%s13717_s4] sm:$0xff]   ;;  %v4710_v19 = vrot.slane %v548_v4, %v12500_v2 }
 0xb4a   :  { %v4563_v53 = vsel %vm4560_vm15, %v4558_v26, %v11137_v30  ;;  %v4564_v63 = vsel %vm4560_vm15, %v4559_v8, %v11138_v60  ;;  %10731 = vmatprep.subr.bf16.mxu1 %v10239_v49  ;;  %v4714_v60 = vrot.slane %v548_v4, %v4713_v11  ;;  %v11170_v30 = vld [vmem:[%s13717_s4 + $0x8] sm:$0xff]   ;;  %10737 = vmatprep.subr.bf16.mxu0 %v11169_v62 }
 0xb4b   :  { %v4566_v57 = vpack.c.bf16 %v4564_v63, %v4563_v53  ;;  %v4720_v26 = vrot.slane %v4710_v19, %v12500_v2 }
 0xb4c   :  { %10732 = vmatpush3.bf16.msra.mxu1 %v10239_v49  ;;  %v4724_v8 = vrot.slane %v4714_v60, %v12500_v2 }
 0xb4d   :  { %10726 = vmatmul.mubr.msk.bf16.vlgmr.msra.gmra.mrb[20].mxu0 %vm88_vm0, %v4566_v57 }
 0xb4e   :  { %10738 = vmatpush3.bf16.msra.mxu0 %v11169_v62 }
 0xb4f   :  { %10739 = vmatprep.subr.bf16.mxu0 %v11170_v30 }
 0xb52   :  { %10740 = vmatpush3.bf16.msra.mxu0 %v11170_v30 }
 0xc20   :  { %v10727_v45 = vpop.f32.mrb[20].mxu0 }
 0xc21   :  { %v4617_v42 = vpop.f32.mrb[21].mxu0  ;;  %v4626_v27 = vadd.f32 %v10727_v45, %v10233_v22 }
 0xc22   :  { %v4618_v36 = vadd.f32 %v10233_v22, %v4617_v42  ;;  %v10728_v55 = vpop.f32.mrb[22].mxu0 }
 0xc23   :  { %v4620_v16 = vpop.f32.mrb[23].mxu0  ;;  %v4634_v39 = vadd.f32 %v4626_v27, %v11718_v24  ;;  %v4629_v28 = vadd.f32 %v10728_v55, %v10233_v22 }
 0xc24   :  { %v4632_v31 = vadd.f32 %v4618_v36, %v11713_v34  ;;  %v4621_v14 = vadd.f32 %v10233_v22, %v4620_v16 }
 0xc25   :  { %v4635_v56 = vadd.f32 %v4629_v28, %v11720_v40  ;;  %v4642_v18 = vsel %vm88_vm0, %v4634_v39, 0.0  ;;  %v10236_v28 = vld [vmem:[%s13714_s6 + $0x4] ss:$0 sm:$0xff] }
 0xc26   :  { %v4633_v54 = vadd.f32 %v4621_v14, %v11711_v32  ;;  %v4636_v47 = vsel %vm88_vm0, %v4632_v31, 0.0 }
 0xc27   :  { %4637 = vadd.xlane.f32.xlu0 %v4636_v47  ;;  %v4645_v61 = vsel %vm88_vm0, %v4635_v56, 0.0 }
 0xc28   :  { %v4639_v9 = vsel %vm88_vm0, %v4633_v54, 0.0 }
 0xc29   :  { %4640 = vadd.xlane.f32.xlu1 %v4639_v9 }
 0xc2b   :  { %4643 = vadd.xlane.f32.xlu0 %v4642_v18 }
 0xc2f   :  { %4646 = vadd.xlane.f32.xlu0 %v4645_v61  ;;  %v10237_v61 = vld [vmem:[%s13714_s6 + $0x5] ss:$0 sm:$0xff] }
 0xcb4   :  { %v4638_v34 = vpop.xlane.xlu0 %4637 }
 0xcb5   :  { %v4648_v58 = vmul.f32 0.03125, %v4638_v34 }
 0xcb6   :  { %v4641_v24 = vpop.xlane.xlu1 %4640 }
 0xcb7   :  { %v12468_v29 = vsub.f32 %v4632_v31, %v4648_v58  ;;  %v4649_v32 = vmul.f32 0.03125, %v4641_v24 }
 0xcb8   :  { %v4644_v7 = vpop.xlane.xlu0 %4643 }
 0xcb9   :  { %v12470_v23 = vsub.f32 %v4633_v54, %v4649_v32  ;;  %v4650_v44 = vmul.f32 0.03125, %v4644_v7  ;;  %v4656_v12 = vmul.f32 %v12468_v29, %v12468_v29 }
 0xcbb   :  { %v12474_v40 = vsub.f32 %v4634_v39, %v4650_v44  ;;  %v4660_v46 = vsel %vm88_vm0, %v4656_v12, 0.0  ;;  %v4657_v6 = vmul.f32 %v12470_v23, %v12470_v23 }
 0xcbc   :  { %4661 = vadd.xlane.f32.xlu1 %v4660_v46  ;;  %v4647_v38 = vpop.xlane.xlu0 %4646 }
 0xcbd   :  { %v4651_v35 = vmul.f32 0.03125, %v4647_v38  ;;  %v4663_v33 = vsel %vm88_vm0, %v4657_v6, 0.0  ;;  %v4658_v17 = vmul.f32 %v12474_v40, %v12474_v40 }
 0xcbe   :  { %4664 = vadd.xlane.f32.xlu0 %v4663_v33 }
 0xcbf   :  { %v4655_v48 = vsub.f32 %v4635_v56, %v4651_v35  ;;  %v4666_v50 = vsel %vm88_vm0, %v4658_v17, 0.0  ;;  %v11172_v35 = vld [vmem:[%s13717_s4 + $0x18] sm:$0xff]  }
 0xcc0   :  { %4667 = vadd.xlane.f32.xlu1 %v4666_v50 }
 0xcc1   :  { %v4659_v43 = vmul.f32 %v4655_v48, %v4655_v48 }
 0xcc3   :  { %v4669_v5 = vsel %vm88_vm0, %v4659_v43, 0.0 }
 0xcc4   :  { %4670 = vadd.xlane.f32.xlu0 %v4669_v5 }
 0xcd1   :  { %4739 = vrot.lane.b32.xlu1 %v4720_v26, %s11428_s30  ;;  %v10242_v26 = vld [vmem:[%s13714_s6 + $0x6] ss:$0 sm:$0xff] }
 0xcda   :  { %4741 = vrot.lane.b32.xlu0 %v4724_v8, %s11428_s30 }
 0xd49   :  { %v4662_v53 = vpop.xlane.xlu1 %4661 }
 0xd4a   :  { %v4672_v63 = vmul.f32 0.03125, %v4662_v53 }
 0xd4b   :  { %v4665_v57 = vpop.xlane.xlu0 %4664 }
 0xd4c   :  { %v4676_v22 = vadd.f32 1e-05, %v4672_v63  ;;  %v4673_v45 = vmul.f32 0.03125, %v4665_v57 }
 0xd4d   :  { %v4668_v42 = vpop.xlane.xlu1 %4667 }
 0xd4e   :  { %11281 = vrsqrt.f32 %v4676_v22  ;;  %v4677_v27 = vadd.f32 1e-05, %v4673_v45  ;;  %v4674_v36 = vmul.f32 0.03125, %v4668_v42 }
 0xd50   :  { %11283 = vrsqrt.f32 %v4677_v27  ;;  %v4678_v55 = vadd.f32 1e-05, %v4674_v36 }
 0xd51   :  { %v4671_v16 = vpop.xlane.xlu0 %4670  ;;  %v4740_v33 = vpop.permute.xlu1 %4739 }
 0xd52   :  { %11285 = vrsqrt.f32 %v4678_v55  ;;  %v4675_v31 = vmul.f32 0.03125, %v4671_v16 }
 0xd54   :  { %v4679_v14 = vadd.f32 1e-05, %v4675_v31 }
 0xd55   :  { %v4742_v17 = vpop.permute.xlu0 %4741 }
 0xd56   :  { %11287 = vrsqrt.f32 %v4679_v14 }
 0xd58   :  { %v11282_v39 = vpop.eup %11281 }
 0xd59   :  { %v4684_v54 = vmul.f32 %v11282_v39, %v12468_v29 }
 0xd5a   :  { %v11284_v47 = vpop.eup %11283 }
 0xd5b   :  { %v4685_v9 = vmul.f32 %v11284_v47, %v12470_v23  ;;  %v4692_v56 = vmul.f32 %v10236_v28, %v4684_v54 }
 0xd5c   :  { %v11286_v18 = vpop.eup %11285 }
 0xd5d   :  { %v4686_v34 = vmul.f32 %v11286_v18, %v12474_v40  ;;  %v4693_v58 = vmul.f32 %v10236_v28, %v4685_v9  ;;  %v4700_v24 = vadd.f32 %v10237_v61, %v4692_v56  ;;  %v11171_v40 = vld [vmem:[%s13717_s4 + $0x10] sm:$0xff]  }
 0xd5e   :  { %10741 = vmatprep.subr.bf16.mxu0 %v11171_v40 }
 0xd5f   :  { %v4701_v32 = vadd.f32 %v10237_v61, %v4693_v58  ;;  %v4694_v46 = vmul.f32 %v10236_v28, %v4686_v34  ;;  %10742 = vmatpush3.bf16.msra.mxu0 %v11171_v40 }
 0xd60   :  { %v11288_v7 = vpop.eup %11287  ;;  %10743 = vmatprep.subr.bf16.mxu0 %v11172_v35 }
 0xd61   :  { %v4687_v44 = vmul.f32 %v11288_v7, %v4655_v48  ;;  %v4704_v12 = vpack.c.bf16 %v4701_v32, %v4700_v24  ;;  %v4702_v6 = vadd.f32 %v10237_v61, %v4694_v46  ;;  %v4743_v48 = vsel %vm88_vm0, %v4740_v33, %v4742_v17  ;;  %v11421_v17 = vld [vmem:[%s13711_s1] sm:$0xff] }
 0xd63   :  { %10733 = vmatprep.mubr.msk.bf16.mxu1 %vm88_vm0, %v4704_v12  ;;  %v4695_v29 = vmul.f32 %v10236_v28, %v4687_v44  ;;  %10744 = vmatpush3.bf16.msra.mxu0 %v11172_v35 }
 0xd65   :  { %v4703_v23 = vadd.f32 %v10237_v61, %v4695_v29 }
 0xd67   :  { %v4705_v38 = vpack.c.bf16 %v4703_v23, %v4702_v6 }
 0xd69   :  { %10734 = vmatmul.mubr.msk.bf16.vlgmr.msra.gmra.mrb[28].mxu1 %vm88_vm0, %v4705_v38 }
 0xd6a   :  { %5037 = vmatprep.mubr.bf16.mxu1 %v11425_v0 }
 0xe3c   :  { %v10735_v50 = vpop.f32.mrb[28].mxu1 }
 0xe3d   :  { %v4794_v43 = vadd.f32 %v10735_v50, %v4743_v48  ;;  %v4785_v5 = vpop.f32.mrb[29].mxu1  ;;  %v11422_v50 = vld [vmem:[%s13711_s1 + $0x10] sm:$0xff] }
 0xe3e   :  { %v4786_v52 = vadd.f32 %v4785_v5, %v4743_v48  ;;  %v10736_v51 = vpop.f32.mrb[30].mxu1 }
 0xe3f   :  { %v4797_v25 = vadd.f32 %v10736_v51, %v4743_v48  ;;  %v4788_v3 = vpop.f32.mrb[31].mxu1  ;;  %v4802_v49 = vmax.f32 %v4794_v43, 0.0  ;;  %v5253_v43 = vsub.f32 1.0, %v11422_v50 }
 0xe40   :  { %v4789_v41 = vadd.f32 %v4788_v3, %v4743_v48  ;;  %v4800_v62 = vmax.f32 %v4786_v52, 0.0  ;;  %v5251_v48 = vsub.f32 1.0, %v11421_v17  ;;  %v11423_v52 = vld [vmem:[%s13711_s1 + $0x8] sm:$0xff]  ;;  %v11424_v3 = vld [vmem:[%s13711_s1 + $0x18] sm:$0xff]  ;;  %v11174_v17 = vld [vmem:[%s13718_s5] sm:$0xff]  }
 0xe41   :  { %v4803_v4 = vmax.f32 %v4797_v25, 0.0  ;;  %v5252_v51 = vsub.f32 1.0, %v11423_v52  ;;  %v5257_v25 = vmul.f32 -1000.0, %v5253_v43  ;;  %v11176_v43 = vld [vmem:[%s13718_s5 + $0x8] sm:$0xff]   ;;  %v11177_v52 = vld [vmem:[%s13718_s5 + $0x50] sm:$0xff]  }
 0xe42   :  { %v4801_v19 = vmax.f32 %v4789_v41, 0.0  ;;  %v5255_v5 = vmul.f32 -1000.0, %v5251_v48  ;;  %v5254_v41 = vsub.f32 1.0, %v11424_v3  ;;  %v11179_v3 = vld [vmem:[%s13718_s5 + $0x58] sm:$0xff]  }
 0xe43   :  { %v4805_v60 = vpack.c.bf16 %v4803_v4, %v4802_v49  ;;  %v5256_v49 = vmul.f32 -1000.0, %v5252_v51 }
 0xe44   :  { %v4804_v30 = vpack.c.bf16 %v4801_v19, %v4800_v62  ;;  %v5258_v4 = vmul.f32 -1000.0, %v5254_v41  ;;  %v4962_v62 = vld [vmem:[%s13712_s3 + $0x14] sm:$0xff] }
 0xe45   :  { %v4963_v19 = vld [vmem:[%s13712_s3 + $0x34] sm:$0xff] }
 0xe46   :  { %10745 = vmatprep.mubr.msk.bf16.mxu0 %vm4834_vm1, %v4804_v30  ;;  %v10251_v30 = vcombine.low %v4962_v62, %v4963_v19  ;;  %v11180_v41 = vld [vmem:[%s13718_s5 + $0x18] sm:$0xff]  }
 0xe47   :  { %10746 = vmatmul.mubr.msk.bf16.vlgmr.msra.gmra.mrb[24].mxu0 %vm4834_vm1, %v4805_v60  ;;  %v4964_v60 = vld [vmem:[%s13712_s3 + $0x54] sm:$0xff] }
 0xf1a   :  { %v10747_v8 = vpop.f32.mrb[24].mxu0 }
 0xf1b   :  { %v4875_v53 = vpop.f32.mrb[25].mxu0  ;;  %v4884_v63 = vadd.f32 %v10747_v8, %v10242_v26  ;;  %v4965_v8 = vld [vmem:[%s13712_s3 + $0x74] sm:$0xff] }
 0xf1c   :  { %v4876_v57 = vadd.f32 %v10242_v26, %v4875_v53  ;;  %v10748_v22 = vpop.f32.mrb[26].mxu0  ;;  %v10254_v53 = vcombine.high %v4964_v60, %v4965_v8 }
 0xf1d   :  { %v4878_v45 = vpop.f32.mrb[27].mxu0  ;;  %v4887_v27 = vadd.f32 %v10748_v22, %v10242_v26  ;;  %v4892_v55 = vadd.f32 %v4884_v63, %v4702_v6  ;;  %v10253_v63 = vcombine.low %v4964_v60, %v4965_v8  ;;  %v11185_v60 = vld [vmem:[%s13718_s5 + $0x70] sm:$0xff]   ;;  %v11188_v8 = vld [vmem:[%s13718_s5 + $0x38] sm:$0xff]  }
 0xf1e   :  { %v4890_v42 = vadd.f32 %v4876_v57, %v4700_v24  ;;  %v4879_v36 = vadd.f32 %v10242_v26, %v4878_v45  ;;  %v10252_v26 = vcombine.high %v4962_v62, %v4963_v19  ;;  %v11173_v57 = vld [vmem:[%s13718_s5 + $0x40] sm:$0xff]   ;;  %v11183_v62 = vld [vmem:[%s13718_s5 + $0x68] sm:$0xff]  }
 0xf1f   :  { %v4893_v14 = vadd.f32 %v4887_v27, %v4703_v23  ;;  %v4900_v28 = vsel %vm88_vm0, %v4892_v55, 0.0  ;;  %v11184_v19 = vld [vmem:[%s13718_s5 + $0x28] sm:$0xff]  }
 0xf20   :  { %v4891_v16 = vadd.f32 %v4879_v36, %v4701_v32  ;;  %v4894_v31 = vsel %vm88_vm0, %v4890_v42, 0.0  ;;  %5005 = vmatprep.subr.bf16.mxu1 %v10252_v26  ;;  %v11187_v26 = vld [vmem:[%s13718_s5 + $0x78] sm:$0xff]  }
 0xf21   :  { %4895 = vadd.xlane.f32.xlu1 %v4894_v31  ;;  %v4903_v54 = vsel %vm88_vm0, %v4893_v14, 0.0  ;;  %5006 = vmatpush1.bf16.msra.mxu1 %v10251_v30  ;;  %v11186_v30 = vld [vmem:[%s13718_s5 + $0x30] sm:$0xff]  }
 0xf22   :  { %v4897_v39 = vsel %vm88_vm0, %v4891_v16, 0.0  ;;  %5007 = vmatprep.subr.bf16.mxu1 %v10254_v53  ;;  %v4966_v53 = vld [vmem:[%s13712_s3 + $0x1c] sm:$0xf] }
 0xf23   :  { %4898 = vadd.xlane.f32.xlu0 %v4897_v39 }
 0xf25   :  { %4901 = vadd.xlane.f32.xlu1 %v4900_v28  ;;  %5008 = vmatpush1.bf16.msra.mxu1 %v10253_v63  ;;  %v4967_v63 = vld [vmem:[%s13712_s3 + $0x3c] sm:$0xf] }
 0xf26   :  { %10479 = vmatprep.subr.bf16.mxu1 %v11173_v57  ;;  %v4968_v57 = vld [vmem:[%s13712_s3 + $0x5c] sm:$0xf] }
 0xf27   :  { %4904 = vadd.xlane.f32.xlu0 %v4903_v54 }
 0xfae   :  { %v4896_v47 = vpop.xlane.xlu1 %4895 }
 0xfaf   :  { %v4906_v9 = vmul.f32 0.03125, %v4896_v47 }
 0xfb0   :  { %v4899_v56 = vpop.xlane.xlu0 %4898 }
 0xfb1   :  { %v12544_v18 = vsub.f32 %v4890_v42, %v4906_v9  ;;  %v4907_v61 = vmul.f32 0.03125, %v4899_v56  ;;  %v10249_v9 = vld [vmem:[%s13714_s6 + $0x7] ss:$0 sm:$0xff] }
 0xfb2   :  { %v4902_v34 = vpop.xlane.xlu1 %4901 }
 0xfb3   :  { %v12546_v58 = vsub.f32 %v4891_v16, %v4907_v61  ;;  %v4908_v24 = vmul.f32 0.03125, %v4902_v34  ;;  %v4914_v32 = vmul.f32 %v12544_v18, %v12544_v18  ;;  %v10250_v34 = vld [vmem:[%s13714_s6 + $0x8] ss:$0 sm:$0xff] }
 0xfb4   :  { %v4905_v7 = vpop.xlane.xlu0 %4904 }
 0xfb5   :  { %v12550_v44 = vsub.f32 %v4892_v55, %v4908_v24  ;;  %v4909_v12 = vmul.f32 0.03125, %v4905_v7  ;;  %v4918_v46 = vsel %vm88_vm0, %v4914_v32, 0.0  ;;  %v4915_v29 = vmul.f32 %v12546_v58, %v12546_v58 }
 0xfb6   :  { %4919 = vadd.xlane.f32.xlu1 %v4918_v46 }
 0xfb7   :  { %v12555_v6 = vsub.f32 %v4893_v14, %v4909_v12  ;;  %v4921_v23 = vsel %vm88_vm0, %v4915_v29, 0.0  ;;  %v4916_v38 = vmul.f32 %v12550_v44, %v12550_v44 }
 0xfb8   :  { %4922 = vadd.xlane.f32.xlu0 %v4921_v23 }
 0xfb9   :  { %v4924_v40 = vsel %vm88_vm0, %v4916_v38, 0.0  ;;  %v4917_v35 = vmul.f32 %v12555_v6, %v12555_v6 }
 0xfba   :  { %4925 = vadd.xlane.f32.xlu1 %v4924_v40 }
 0xfbb   :  { %v4927_v33 = vsel %vm88_vm0, %v4917_v35, 0.0 }
 0xfbc   :  { %4928 = vadd.xlane.f32.xlu0 %v4927_v33 }
 0xfcb   :  { %5261 = vperm.xlu1 %11108, %v5255_v5  }
 0xfcf   :  { %5271 = vperm.xlu1 %11108, %v5257_v25  }
 0xfd2   :  { %5266 = vperm.xlu0 %11107, %v5256_v49   ;;  %v11181_v49 = vld [vmem:[%s13718_s5 + $0x60] sm:$0xff]  }
 0xfd3   :  { %5276 = vperm.xlu1 %11108, %v5258_v4   ;;  %v11182_v4 = vld [vmem:[%s13718_s5 + $0x20] sm:$0xff]  }
0x1043   :  { %v4920_v22 = vpop.xlane.xlu1 %4919 }
0x1044   :  { %v4930_v45 = vmul.f32 0.03125, %v4920_v22  ;;  %v12686_v22 = vcombine.low %v4966_v53, %v4967_v63 }
0x1045   :  { %v4923_v42 = vpop.xlane.xlu0 %4922 }
0x1046   :  { %v4934_v27 = vadd.f32 1e-05, %v4930_v45  ;;  %v4931_v36 = vmul.f32 0.03125, %v4923_v42  ;;  %v4969_v45 = vld [vmem:[%s13712_s3 + $0x7c] sm:$0xf]  ;;  %5346 = vrot.lane.b32.xlu0 %v12686_v22, %s11427_s29 }
0x1047   :  { %v4926_v55 = vpop.xlane.xlu1 %4925  ;;  %v12691_v42 = vcombine.low %v4968_v57, %v4969_v45 }
0x1048   :  { %11289 = vrsqrt.f32 %v4934_v27  ;;  %v4935_v16 = vadd.f32 1e-05, %v4931_v36  ;;  %v4932_v31 = vmul.f32 0.03125, %v4926_v55 }
0x1049   :  { %v4929_v14 = vpop.xlane.xlu0 %4928  ;;  %5348 = vrot.lane.b32.xlu1 %v12691_v42, %s11427_s29 }
0x104a   :  { %11291 = vrsqrt.f32 %v4935_v16  ;;  %v4936_v39 = vadd.f32 1e-05, %v4932_v31  ;;  %v4933_v28 = vmul.f32 0.03125, %v4929_v14 }
0x104c   :  { %11293 = vrsqrt.f32 %v4936_v39  ;;  %v4937_v54 = vadd.f32 1e-05, %v4933_v28 }
0x104e   :  { %11295 = vrsqrt.f32 %v4937_v54 }
0x1052   :  { %v11290_v47 = vpop.eup %11289 }
0x1053   :  { %v4942_v56 = vmul.f32 %v11290_v47, %v12544_v18 }
0x1054   :  { %v11292_v61 = vpop.eup %11291 }
0x1055   :  { %v4950_v24 = vmul.f32 %v10249_v9, %v4942_v56  ;;  %v4943_v32 = vmul.f32 %v11292_v61, %v12546_v58 }
0x1056   :  { %v11294_v7 = vpop.eup %11293 }
0x1057   :  { %v12599_v12 = vadd.f32 %v10250_v34, %v4950_v24  ;;  %v4951_v46 = vmul.f32 %v10249_v9, %v4943_v32  ;;  %v4944_v29 = vmul.f32 %v11294_v7, %v12550_v44 }
0x1058   :  { %v11296_v23 = vpop.eup %11295 }
0x1059   :  { %v12602_v38 = vadd.f32 %v10250_v34, %v4951_v46  ;;  %v4945_v40 = vmul.f32 %v11296_v23, %v12555_v6  ;;  %v4952_v18 = vmul.f32 %v10249_v9, %v4944_v29  ;;  %v12607_v33 = vmul.f32 %v12599_v12, %v11517_v15  ;;  %v11175_v6 = vld [vmem:[%s13718_s5 + $0x48] sm:$0xff]  }
0x105b   :  { %v4953_v35 = vmul.f32 %v10249_v9, %v4945_v40  ;;  %v12611_v58 = vmul.f32 %v12602_v38, %v11533_v21  ;;  %v12624_v50 = vadd.f32 %v10250_v34, %v4952_v18  ;;  %v5262_v40 = vpop.permute.xlu1 %5261 }
0x105d   :  { %v4977_v44 = vpack.c.bf16 %v12611_v58, %v12607_v33  ;;  %v12618_v48 = vadd.f32 %v10250_v34, %v4953_v35  ;;  %v12639_v51 = vmul.f32 %v12624_v50, %v11512_v13  ;;  %v5267_v35 = vpop.permute.xlu0 %5266 }
0x105f   :  { %10255 = vmatmul.mubr.msk.bf16.vlgmr.msra.gmra.mrb[32].mxu1 %vm88_vm0, %v4977_v44  ;;  %v12632_v5 = vmul.f32 %v12618_v48, %v11531_v20  ;;  %v5272_v18 = vpop.permute.xlu1 %5271 }
0x1060   :  { %5047 = vmatprep.mubr.bf16.mxu1 %v11425_v0  ;;  %10480 = vmatpush3.bf16.msra.mxu1 %v11174_v17  ;;  %v11178_v0 = vld [vmem:[%s13718_s5 + $0x10] sm:$0xff]  }
0x1061   :  { %10481 = vmatprep.subr.bf16.mxu1 %v11175_v6  ;;  %v4978_v25 = vpack.c.bf16 %v12632_v5, %v12639_v51  ;;  %v11437_v6 = vmov 0.0  }
0x1062   :  { %10749 = vmatprep.subr.bf16.mxu0 %v11437_v6  ;;  %10753 = vmatprep.mubr.msk.bf16.mxu0 %vm11438_vm2, %v11437_v6 }
0x1063   :  { %v5277_v17 = vpop.permute.xlu1 %5276 }
0x1064   :  { %10482 = vmatpush3.bf16.msra.mxu1 %v11176_v43 }
0x1065   :  { %10483 = vmatprep.subr.bf16.mxu1 %v11177_v52 }
0x1067   :  { %10256 = vmatmul.mubr.msk.bf16.gmra.mrb[36].mxu1 %vm88_vm0, %v4978_v25 }
0x1068   :  { %10484 = vmatpush3.bf16.msra.mxu1 %v11178_v0 }
0x1069   :  { %10485 = vmatprep.subr.bf16.mxu1 %v11179_v3 }
0x106c   :  { %10486 = vmatpush3.bf16.msra.mxu1 %v11180_v41 }
0x106d   :  { %10487 = vmatprep.subr.bf16.mxu1 %v11181_v49 }
0x1070   :  { %10488 = vmatpush3.bf16.msra.mxu1 %v11182_v4 }
0x1071   :  { %10489 = vmatprep.subr.bf16.mxu1 %v11183_v62 }
0x1074   :  { %10490 = vmatpush3.bf16.msra.mxu1 %v11184_v19 }
0x1075   :  { %10491 = vmatprep.subr.bf16.mxu1 %v11185_v60 }
0x1078   :  { %10492 = vmatpush3.bf16.msra.mxu1 %v11186_v30 }
0x1079   :  { %10493 = vmatprep.subr.bf16.mxu1 %v11187_v26 }
0x107c   :  { %10494 = vmatpush3.bf16.msra.mxu1 %v11188_v8 }
0x10b8   :  { %v12697_v44 = vpop.permute.xlu0 %5346 }
0x10b9   :  { %10750 = vmatpush3.bf16.msra.mxu0 %v12697_v44 }
0x10ba   :  { %10751 = vmatprep.subr.bf16.mxu0 %v11437_v6 }
0x10bb   :  { %v12704_v43 = vpop.permute.xlu1 %5348 }
0x10bd   :  { %10752 = vmatpush3.bf16.msra.mxu0 %v12704_v43 }
0x10be   :  { %10757 = vmatprep.subr.bf16.mxu0 %v11437_v6 }
0x1132   :  { %v5039_v27 = vpop.f32.mrb[32].mxu1 }
0x1133   :  { %11297 = vtanh.f32 %v5039_v27  ;;  %v5041_v36 = vpop.f32.mrb[33].mxu1 }
0x1134   :  { %11299 = vtanh.f32 %v5041_v36  ;;  %v5043_v55 = vpop.f32.mrb[34].mxu1 }
0x1135   :  { %11301 = vtanh.f32 %v5043_v55  ;;  %v5045_v16 = vpop.f32.mrb[35].mxu1 }
0x1136   :  { %11303 = vtanh.f32 %v5045_v16 }
0x113a   :  { %v5049_v31 = vpop.f32.mrb[36].mxu1 }
0x113b   :  { %11305 = vtanh.f32 %v5049_v31  ;;  %v5051_v14 = vpop.f32.mrb[37].mxu1 }
0x113c   :  { %11307 = vtanh.f32 %v5051_v14  ;;  %v5053_v39 = vpop.f32.mrb[38].mxu1 }
0x113d   :  { %v11298_v28 = vpop.eup %11297  ;;  %11309 = vtanh.f32 %v5053_v39  ;;  %v5055_v54 = vpop.f32.mrb[39].mxu1 }
0x113e   :  { %v11300_v47 = vpop.eup %11299  ;;  %11311 = vtanh.f32 %v5055_v54 }
0x113f   :  { %v11302_v9 = vpop.eup %11301 }
0x1140   :  { %v11304_v56 = vpop.eup %11303  ;;  %v5066_v61 = vpack.c.bf16 %v11302_v9, %v11298_v28 }
0x1141   :  { %v5067_v34 = vpack.c.bf16 %v11304_v56, %v11300_v47 }
0x1143   :  { %5230 = vmatprep.mubr.bf16.mxu1 %v5067_v34 }
0x1144   :  { %5231 = vmatmul.mubr.bf16.vlgmr.msra.gmra.mrb[40].mxu1 %v5066_v61 }
0x1145   :  { %v11306_v24 = vpop.eup %11305 }
0x1146   :  { %v11308_v32 = vpop.eup %11307 }
0x1147   :  { %v11310_v7 = vpop.eup %11309 }
0x1148   :  { %v11312_v46 = vpop.eup %11311  ;;  %v5068_v29 = vpack.c.bf16 %v11310_v7, %v11306_v24 }
0x1149   :  { %v5069_v23 = vpack.c.bf16 %v11312_v46, %v11308_v32 }
0x114b   :  { %5238 = vmatprep.mubr.bf16.mxu1 %v5069_v23 }
0x114c   :  { %5239 = vmatmul.mubr.bf16.gmra.mrb[44].mxu1 %v5068_v29 }
0x1217   :  { %v10495_v52 = vpop.f32.mrb[40].mxu1 }
0x1218   :  { %v10496_v0 = vpop.f32.mrb[41].mxu1 }
0x1219   :  { %v10497_v25 = vadd.f32 %v10496_v0, %v10495_v52  ;;  %v10498_v3 = vpop.f32.mrb[42].mxu1 }
0x121a   :  { %v10499_v41 = vpop.f32.mrb[43].mxu1 }
0x121b   :  { %v5247_v49 = vmul.f32 %v10497_v25, %v11517_v15  ;;  %v10500_v4 = vadd.f32 %v10499_v41, %v10498_v3 }
0x121d   :  { %v5279_v62 = vadd.f32 %v5262_v40, %v5247_v49  ;;  %v5248_v19 = vmul.f32 %v10500_v4, %v11533_v21 }
0x121f   :  { %v5280_v60 = vadd.f32 %v5267_v35, %v5248_v19  ;;  %v10501_v30 = vpop.f32.mrb[44].mxu1  ;;  %v5283_v8 = vsel %vm88_vm0, %v5279_v62, -inf }
0x1220   :  { %v10502_v26 = vpop.f32.mrb[45].mxu1 }
0x1221   :  { %v5284_v53 = vsel %vm88_vm0, %v5280_v60, -inf  ;;  %v10503_v63 = vadd.f32 %v10502_v26, %v10501_v30  ;;  %v10504_v57 = vpop.f32.mrb[46].mxu1 }
0x1222   :  { %v5285_v45 = vmax.f32 %v5283_v8, %v5284_v53  ;;  %v10505_v27 = vpop.f32.mrb[47].mxu1 }
0x1223   :  { %v5249_v36 = vmul.f32 %v10503_v63, %v11512_v13  ;;  %v10506_v55 = vadd.f32 %v10505_v27, %v10504_v57 }
0x1224   :  { %v5286_v16 = vrot.slane %v5285_v45, 4 }
0x1225   :  { %v5281_v15 = vadd.f32 %v5272_v18, %v5249_v36  ;;  %v5250_v31 = vmul.f32 %v10506_v55, %v11531_v20 }
0x1226   :  { %v5287_v14 = vmax.f32 %v5285_v45, %v5286_v16 }
0x1227   :  { %v5282_v21 = vadd.f32 %v5277_v17, %v5250_v31  ;;  %v5486_v28 = vsel %vm88_vm0, %v5281_v15, -inf }
0x1228   :  { %v5288_v39 = vrot.slane %v5287_v14, 2 }
0x1229   :  { %v5487_v54 = vsel %vm88_vm0, %v5282_v21, -inf }
0x122a   :  { %v5289_v47 = vmax.f32 %v5287_v14, %v5288_v39  ;;  %v5488_v9 = vmax.f32 %v5486_v28, %v5487_v54 }
0x122c   :  { %v5290_v56 = vrot.slane %v5289_v47, 1  ;;  %v5489_v61 = vrot.slane %v5488_v9, 4 }
0x122e   :  { %v5291_v34 = vmax.f32 %v5289_v47, %v5290_v56  ;;  %v5490_v24 = vmax.f32 %v5488_v9, %v5489_v61 }
0x1230   :  { %v5292_v32 = vsub.f32 %v5279_v62, %v5291_v34  ;;  %v5293_v13 = vsub.f32 %v5280_v60, %v5291_v34  ;;  %v5491_v7 = vrot.slane %v5490_v24, 2 }
0x1232   :  { %v5294_v46 = vmul.f32 1.442695, %v5292_v32  ;;  %v5296_v29 = vmul.f32 1.442695, %v5293_v13  ;;  %v5492_v23 = vmax.f32 %v5490_v24, %v5491_v7 }
0x1234   :  { %11313 = vpow2.f32 %v5294_v46  ;;  %v5493_v20 = vrot.slane %v5492_v23, 1 }
0x1235   :  { %11315 = vpow2.f32 %v5296_v29 }
0x1236   :  { %v5494_v40 = vmax.f32 %v5492_v23, %v5493_v20 }
0x1238   :  { %v5495_v18 = vsub.f32 %v5281_v15, %v5494_v40  ;;  %v5496_v35 = vsub.f32 %v5282_v21, %v5494_v40 }
0x123a   :  { %v5497_v17 = vmul.f32 1.442695, %v5495_v18  ;;  %v5499_v52 = vmul.f32 1.442695, %v5496_v35 }
0x123c   :  { %11317 = vpow2.f32 %v5497_v17 }
0x123d   :  { %11319 = vpow2.f32 %v5499_v52 }
0x123e   :  { %v11314_v0 = vpop.eup %11313 }
0x123f   :  { %v11316_v25 = vpop.eup %11315  ;;  %v5298_v3 = vsel %vm88_vm0, %v11314_v0, 0.0 }
0x1240   :  { %v5299_v41 = vsel %vm88_vm0, %v11316_v25, 0.0 }
0x1241   :  { %v5300_v49 = vadd.f32 %v5299_v41, %v5298_v3 }
0x1243   :  { %v5301_v4 = vrot.slane %v5300_v49, 4 }
0x1245   :  { %v5302_v62 = vadd.f32 %v5301_v4, %v5300_v49 }
0x1246   :  { %v11318_v19 = vpop.eup %11317 }
0x1247   :  { %v11320_v60 = vpop.eup %11319  ;;  %v5303_v30 = vrot.slane %v5302_v62, 2  ;;  %v5501_v26 = vsel %vm88_vm0, %v11318_v19, 0.0 }
0x1248   :  { %v5502_v8 = vsel %vm88_vm0, %v11320_v60, 0.0 }
0x1249   :  { %v5304_v53 = vadd.f32 %v5303_v30, %v5302_v62  ;;  %v5503_v63 = vadd.f32 %v5502_v8, %v5501_v26 }
0x124b   :  { %v5305_v57 = vrot.slane %v5304_v53, 1  ;;  %v5504_v45 = vrot.slane %v5503_v63, 4 }
0x124d   :  { %v5306_v27 = vadd.f32 %v5305_v57, %v5304_v53  ;;  %v5505_v36 = vadd.f32 %v5504_v45, %v5503_v63 }
0x124f   :  { %11321 = vrcp.f32 %v5306_v27  ;;  %v5506_v55 = vrot.slane %v5505_v36, 2 }
0x1251   :  { %v5507_v16 = vadd.f32 %v5506_v55, %v5505_v36 }
0x1253   :  { %v5508_v15 = vrot.slane %v5507_v16, 1 }
0x1255   :  { %v5509_v31 = vadd.f32 %v5508_v15, %v5507_v16 }
0x1257   :  { %11323 = vrcp.f32 %v5509_v31 }
0x1259   :  { %v11322_v14 = vpop.eup %11321 }
0x125a   :  { %v5308_v21 = vmul.f32 %v11322_v14, %v11314_v0  ;;  %v5309_v39 = vmul.f32 %v11322_v14, %v11316_v25 }
0x125c   :  { %v12721_v28 = vmul.f32 %v5308_v21, %v12607_v33  ;;  %v12724_v54 = vmul.f32 %v5309_v39, %v12611_v58 }
0x125e   :  { %v5312_v47 = vmul.f32 %v12721_v28, %v12607_v33  ;;  %v5313_v9 = vmul.f32 %v12724_v54, %v12611_v58  ;;  %v5314_v56 = vmul.f32 %v12721_v28, %v12721_v28  ;;  %v5315_v61 = vmul.f32 %v12724_v54, %v12724_v54 }
0x125f   :  { %v5334_v34 = vpack.c.bf16 %v12724_v54, %v12721_v28 }
0x1260   :  { %v5316_v24 = vsub.f32 %v5312_v47, %v5314_v56  ;;  %v5317_v32 = vsub.f32 %v5313_v9, %v5315_v61 }
0x1261   :  { %v11324_v13 = vpop.eup %11323 }
0x1262   :  { %v5318_v7 = vadd.f32 1e-05, %v5316_v24  ;;  %v5319_v46 = vadd.f32 1e-05, %v5317_v32  ;;  %v5511_v29 = vmul.f32 %v11324_v13, %v11318_v19  ;;  %v5512_v23 = vmul.f32 %v11324_v13, %v11320_v60 }
0x1264   :  { %v12737_v33 = vmul.f32 %v5511_v29, %v12639_v51  ;;  %v5514_v58 = vmul.f32 %v5512_v23, %v12632_v5  ;;  %11325 = vrsqrt.f32 %v5318_v7  ;;  %vm5322_vm3 = vcmp.eq.f32.partialorder %v5318_v7, inf }
0x1265   :  { %11327 = vrsqrt.f32 %v5319_v46  ;;  %v5325_v62 = vand.u32 2147483648, %v5318_v7  ;;  %vm5324_vm4 = vcmp.eq.f32.partialorder %v5318_v7, 0.0  ;;  %vm5329_vm5 = vcmp.eq.f32.partialorder %v5319_v46, inf }
0x1266   :  { %v5515_v20 = vmul.f32 %v12737_v33, %v12639_v51  ;;  %v5516_v40 = vmul.f32 %v5514_v58, %v12632_v5  ;;  %v5517_v18 = vmul.f32 %v12737_v33, %v12737_v33  ;;  %v5518_v35 = vmul.f32 %v5514_v58, %v5514_v58 }
0x1267   :  { %v5537_v17 = vpack.c.bf16 %v5514_v58, %v12737_v33  ;;  %v5332_v5 = vand.u32 2147483648, %v5319_v46  ;;  %vm5331_vm6 = vcmp.eq.f32.partialorder %v5319_v46, 0.0 }
0x1268   :  { %v5519_v52 = vsub.f32 %v5515_v20, %v5517_v18  ;;  %v5520_v0 = vsub.f32 %v5516_v40, %v5518_v35  ;;  %v5663_v20 = vld [vmem:[%s13712_s3 + $0xc] sm:$0xff] }
0x1269   :  { %v5664_v40 = vld [vmem:[%s13712_s3 + $0x2c] sm:$0xff] }
0x126a   :  { %v5521_v25 = vadd.f32 1e-05, %v5519_v52  ;;  %v5522_v3 = vadd.f32 1e-05, %v5520_v0 }
0x126c   :  { %11329 = vrsqrt.f32 %v5521_v25  ;;  %vm5525_vm7 = vcmp.eq.f32.partialorder %v5521_v25, inf  ;;  %v5528_v45 = vand.u32 2147483648, %v5521_v25  ;;  %vm5527_vm8 = vcmp.eq.f32.partialorder %v5521_v25, 0.0 }
0x126d   :  { %11331 = vrsqrt.f32 %v5522_v3  ;;  %vm5532_vm9 = vcmp.eq.f32.partialorder %v5522_v3, inf  ;;  %v5535_v55 = vand.u32 2147483648, %v5522_v3  ;;  %vm5534_vm10 = vcmp.eq.f32.partialorder %v5522_v3, 0.0 }
0x126e   :  { %v11326_v41 = vpop.eup %11325 }
0x126f   :  { %v11328_v49 = vpop.eup %11327  ;;  %v5321_v4 = vmul.f32 %v11326_v41, %v5318_v7 }
0x1270   :  { %v5328_v51 = vmul.f32 %v11328_v49, %v5319_v46 }
0x1271   :  { %v5323_v19 = vsel %vm5322_vm3, %v5318_v7, %v5321_v4 }
0x1272   :  { %v5326_v60 = vsel %vm5324_vm4, %v5325_v62, %v5323_v19  ;;  %v5330_v30 = vsel %vm5329_vm5, %v5319_v46, %v5328_v51 }
0x1273   :  { %v5333_v26 = vsel %vm5331_vm6, %v5332_v5, %v5330_v30 }
0x1274   :  { %v5335_v8 = vpack.c.bf16 %v5333_v26, %v5326_v60 }
0x1276   :  { %v11330_v53 = vpop.eup %11329  ;;  %10754 = vmatmul.mubr.msk.bf16.vlgmr.msra.gmra.mrb[28].mxu0 %vm88_vm0, %v5335_v8 }
0x1277   :  { %v11332_v63 = vpop.eup %11331  ;;  %10758 = vmatpush3.bf16.msra.mxu0 %v12686_v22  ;;  %10761 = vmatprep.mubr.msk.bf16.mxu0 %vm11438_vm2, %v11437_v6  ;;  %v5524_v57 = vmul.f32 %v11330_v53, %v5521_v25 }
0x1278   :  { %10759 = vmatprep.subr.bf16.mxu0 %v11437_v6  ;;  %v5531_v27 = vmul.f32 %v11332_v63, %v5522_v3 }
0x1279   :  { %v5526_v36 = vsel %vm5525_vm7, %v5521_v25, %v5524_v57  ;;  %v10283_v25 = vcombine.low %v5663_v20, %v5664_v40 }
0x127a   :  { %v5529_v16 = vsel %vm5527_vm8, %v5528_v45, %v5526_v36  ;;  %v5533_v15 = vsel %vm5532_vm9, %v5522_v3, %v5531_v27 }
0x127b   :  { %10760 = vmatpush3.bf16.msra.mxu0 %v12691_v42  ;;  %v5536_v31 = vsel %vm5534_vm10, %v5535_v55, %v5533_v15 }
0x127c   :  { %10765 = vmatprep.subr.bf16.mxu0 %v11437_v6  ;;  %v5538_v14 = vpack.c.bf16 %v5536_v31, %v5529_v16  ;;  %v5665_v31 = vld [vmem:[%s13712_s3 + $0x4c] sm:$0xff] }
0x127e   :  { %10762 = vmatmul.mubr.msk.bf16.vlgmr.msra.gmra.mrb[32].mxu0 %vm88_vm0, %v5334_v34 }
0x127f   :  { %10766 = vmatpush3.bf16.msra.mxu0 %v12697_v44  ;;  %10769 = vmatprep.mubr.msk.bf16.mxu0 %vm11438_vm2, %v11437_v6 }
0x1280   :  { %10767 = vmatprep.subr.bf16.mxu0 %v11437_v6 }
0x1283   :  { %10768 = vmatpush3.bf16.msra.mxu0 %v12704_v43  ;;  %v10277_v43 = vld [vmem:[%s13714_s6 + $0xf] ss:$0 sm:$0xff] }
0x1284   :  { %10773 = vmatprep.subr.bf16.mxu0 %v11437_v6 }
0x1286   :  { %10770 = vmatmul.mubr.msk.bf16.vlgmr.msra.gmra.mrb[36].mxu0 %vm88_vm0, %v5538_v14  ;;  %v5666_v14 = vld [vmem:[%s13712_s3 + $0x6c] sm:$0xff] }
0x1287   :  { %10774 = vmatpush3.bf16.msra.mxu0 %v12686_v22  ;;  %10777 = vmatprep.mubr.msk.bf16.mxu0 %vm11438_vm2, %v11437_v6 }
0x1288   :  { %10775 = vmatprep.subr.bf16.mxu0 %v11437_v6 }
0x128b   :  { %10776 = vmatpush3.bf16.msra.mxu0 %v12691_v42 }
0x128e   :  { %10778 = vmatmul.mubr.msk.bf16.vlgmr.msra.gmra.mrb[40].mxu0 %vm88_vm0, %v5537_v17 }
0x1349   :  { %v5389_v44 = vpop.f32.mrb[28].mxu0 }
0x134a   :  { %v10755_v21 = vpop.f32.mrb[29].mxu0 }
0x134b   :  { %v5392_v39 = vpop.f32.mrb[30].mxu0  ;;  %v10286_v21 = vcombine.high %v5665_v31, %v5666_v14 }
0x134c   :  { %v10756_v28 = vpop.f32.mrb[31].mxu0 }
0x1351   :  { %v5435_v54 = vpop.f32.mrb[32].mxu0 }
0x1352   :  { %v5436_v47 = vadd.f32 %v5435_v54, %v5389_v44  ;;  %v10763_v22 = vpop.f32.mrb[33].mxu0  ;;  %v10285_v44 = vcombine.low %v5665_v31, %v5666_v14 }
0x1353   :  { %v5438_v9 = vpop.f32.mrb[34].mxu0 }
0x1354   :  { %v5446_v56 = vadd.f32 %v10277_v43, %v5436_v47  ;;  %v5439_v61 = vadd.f32 %v5438_v9, %v5392_v39  ;;  %v10764_v34 = vpop.f32.mrb[35].mxu0  ;;  %v10284_v39 = vcombine.high %v5663_v20, %v5664_v40 }
0x1355   :  { %v10278_v34 = vld [vmem:[%s13714_s6 + $0x10] ss:$0 sm:$0xff] }
0x1356   :  { %v5447_v6 = vadd.f32 %v10277_v43, %v5439_v61  ;;  %v5448_v42 = vsel %vm88_vm0, %v5446_v56, 0.0 }
0x1357   :  { %5449 = vadd.xlane.f32.xlu0 %v5448_v42 }
0x1358   :  { %v5451_v24 = vsel %vm88_vm0, %v5447_v6, 0.0 }
0x1359   :  { %5452 = vadd.xlane.f32.xlu1 %v5451_v24  ;;  %v5576_v32 = vpop.f32.mrb[36].mxu0 }
0x135a   :  { %v10771_v13 = vpop.f32.mrb[37].mxu0 }
0x135b   :  { %v5579_v7 = vpop.f32.mrb[38].mxu0 }
0x135c   :  { %v10772_v46 = vpop.f32.mrb[39].mxu0 }
0x1361   :  { %v5620_v29 = vpop.f32.mrb[40].mxu0 }
0x1362   :  { %v5621_v23 = vadd.f32 %v5620_v29, %v5576_v32  ;;  %v10779_v33 = vpop.f32.mrb[41].mxu0  ;;  %v10279_v32 = vld [vmem:[%s13714_s6 + $0x11] ss:$0 sm:$0xff] }
0x1363   :  { %v5623_v58 = vpop.f32.mrb[42].mxu0 }
0x1364   :  { %v5627_v18 = vadd.f32 %v10277_v43, %v5621_v23  ;;  %v5624_v35 = vadd.f32 %v5623_v58, %v5579_v7  ;;  %v10780_v17 = vpop.f32.mrb[43].mxu0 }
0x1366   :  { %v5628_v52 = vadd.f32 %v10277_v43, %v5624_v35  ;;  %v5629_v0 = vsel %vm88_vm0, %v5627_v18, 0.0 }
0x1367   :  { %5630 = vadd.xlane.f32.xlu0 %v5629_v0 }
0x1368   :  { %v5632_v3 = vsel %vm88_vm0, %v5628_v52, 0.0 }
0x136a   :  { %5709 = vrot.lane.b32.xlu1 %v10283_v25, %s11426_s0 }
0x136b   :  { %5633 = vadd.xlane.f32.xlu0 %v5632_v3 }
0x13e4   :  { %v5450_v41 = vpop.xlane.xlu0 %5449 }
0x13e5   :  { %v5454_v49 = vmul.f32 0.03125, %v5450_v41 }
0x13e6   :  { %v5453_v4 = vpop.xlane.xlu1 %5452 }
0x13e7   :  { %v5456_v62 = vsub.f32 %v5446_v56, %v5454_v49  ;;  %v5455_v51 = vmul.f32 0.03125, %v5453_v4 }
0x13e9   :  { %v5457_v19 = vsub.f32 %v5447_v6, %v5455_v51  ;;  %v5458_v5 = vmul.f32 %v5456_v62, %v5456_v62 }
0x13ea   :  { %v5710_v28 = vpop.permute.xlu1 %5709 }
0x13eb   :  { %v5460_v60 = vsel %vm88_vm0, %v5458_v5, 0.0  ;;  %v5459_v30 = vmul.f32 %v5457_v19, %v5457_v19 }
0x13ec   :  { %5461 = vadd.xlane.f32.xlu1 %v5460_v60 }
0x13ed   :  { %v5463_v26 = vsel %vm88_vm0, %v5459_v30, 0.0 }
0x13ee   :  { %5464 = vadd.xlane.f32.xlu0 %v5463_v26 }
0x13f4   :  { %v5631_v8 = vpop.xlane.xlu0 %5630 }
0x13f5   :  { %v5635_v53 = vmul.f32 0.03125, %v5631_v8 }
0x13f7   :  { %v12783_v63 = vsub.f32 %v5627_v18, %v5635_v53 }
0x13f8   :  { %v5634_v57 = vpop.xlane.xlu0 %5633 }
0x13f9   :  { %v5636_v45 = vmul.f32 0.03125, %v5634_v57  ;;  %v5639_v27 = vmul.f32 %v12783_v63, %v12783_v63 }
0x13fb   :  { %v12787_v36 = vsub.f32 %v5628_v52, %v5636_v45  ;;  %v5641_v55 = vsel %vm88_vm0, %v5639_v27, 0.0 }
0x13fc   :  { %5642 = vadd.xlane.f32.xlu1 %v5641_v55 }
0x13fd   :  { %v5640_v16 = vmul.f32 %v12787_v36, %v12787_v36 }
0x13ff   :  { %v5644_v15 = vsel %vm88_vm0, %v5640_v16, 0.0 }
0x1400   :  { %5645 = vadd.xlane.f32.xlu0 %v5644_v15 }
0x140d   :  { %5713 = vrot.lane.b32.xlu1 %v10285_v44, %s11426_s0 }
0x1411   :  { %5715 = vrot.lane.b32.xlu1 %v10286_v21, %s11426_s0 }
0x1416   :  { %5711 = vrot.lane.b32.xlu0 %v10284_v39, %s11426_s0 }
0x1479   :  { %v5462_v43 = vpop.xlane.xlu1 %5461 }
0x147a   :  { %v5466_v54 = vmul.f32 0.03125, %v5462_v43 }
0x147b   :  { %v5465_v47 = vpop.xlane.xlu0 %5464 }
0x147c   :  { %v5468_v22 = vadd.f32 1e-05, %v5466_v54  ;;  %v5467_v9 = vmul.f32 0.03125, %v5465_v47 }
0x147e   :  { %11333 = vrsqrt.f32 %v5468_v22  ;;  %v5469_v56 = vadd.f32 1e-05, %v5467_v9 }
0x1480   :  { %11335 = vrsqrt.f32 %v5469_v56 }
0x1488   :  { %v11334_v61 = vpop.eup %11333 }
0x1489   :  { %v5472_v6 = vmul.f32 %v11334_v61, %v5456_v62  ;;  %v5643_v42 = vpop.xlane.xlu1 %5642 }
0x148a   :  { %v11336_v24 = vpop.eup %11335  ;;  %v5647_v13 = vmul.f32 0.03125, %v5643_v42 }
0x148b   :  { %v5478_v7 = vmul.f32 %v10278_v34, %v5472_v6  ;;  %v5473_v46 = vmul.f32 %v11336_v24, %v5457_v19 }
0x148c   :  { %v5649_v29 = vadd.f32 1e-05, %v5647_v13 }
0x148d   :  { %v5479_v23 = vmul.f32 %v10278_v34, %v5473_v46  ;;  %v5646_v33 = vpop.xlane.xlu0 %5645  ;;  %v5484_v58 = vadd.f32 %v10279_v32, %v5478_v7  ;;  %v5714_v20 = vpop.permute.xlu1 %5713 }
0x148e   :  { %11337 = vrsqrt.f32 %v5649_v29  ;;  %v5648_v40 = vmul.f32 0.03125, %v5646_v33 }
0x148f   :  { %v5485_v18 = vadd.f32 %v10279_v32, %v5479_v23  ;;  %v12809_v35 = vsub.f32 %v12599_v12, %v5484_v58  ;;  %10119 = vst.msk [vmem:[%s13719_s8] sm:$0xff] %vm88_vm0, %v5484_v58 }
0x1490   :  { %v5650_v17 = vadd.f32 1e-05, %v5648_v40 }
0x1491   :  { %v5712_v52 = vpop.permute.xlu0 %5711  ;;  %v12816_v0 = vsub.f32 %v12602_v38, %v5485_v18  ;;  %10120 = vst.msk [vmem:[%s13719_s8 + $0x8] sm:$0xff] %vm88_vm0, %v5485_v18  ;;  %10389 = vst.msk [vmem:[%s13719_s8 + $0x20] sm:$0xff] %vm88_vm0, %v12809_v35  ;;  %v5716_v12 = vpop.permute.xlu1 %5715 }
0x1492   :  { %11339 = vrsqrt.f32 %v5650_v17  ;;  %v5718_v25 = vsel %vm4834_vm1, %v5710_v28, %v5712_v52  ;;  %v5719_v3 = vsel %vm4834_vm1, %v5714_v20, %v5716_v12 }
0x1493   :  { %10781 = vmatprep.subr.bf16.mxu0 %v5718_v25  ;;  %v5687_v38 = vpack.c.bf16 %v12816_v0, %v12809_v35  ;;  %10390 = vst.msk [vmem:[%s13719_s8 + $0x28] sm:$0xff] %vm88_vm0, %v12816_v0 }
0x1494   :  { %10782 = vmatpush3.bf16.msra.mxu0 %v5718_v25 }
0x1495   :  { %10785 = vmatprep.mubr.msk.bf16.mxu0 %vm88_vm0, %v5687_v38  ;;  %10783 = vmatprep.subr.bf16.mxu0 %v5719_v3 }
0x1498   :  { %v11338_v41 = vpop.eup %11337  ;;  %10784 = vmatpush3.bf16.msra.mxu0 %v5719_v3 }
0x1499   :  { %v5653_v49 = vmul.f32 %v11338_v41, %v12783_v63 }
0x149b   :  { %v5655_v4 = vmul.f32 %v10278_v34, %v5653_v49 }
0x149c   :  { %v11340_v62 = vpop.eup %11339 }
0x149d   :  { %v5657_v51 = vadd.f32 %v10279_v32, %v5655_v4  ;;  %v5654_v19 = vmul.f32 %v11340_v62, %v12787_v36 }
0x149f   :  { %10121 = vst.msk [vmem:[%s13719_s8 + $0x10] sm:$0xff] %vm88_vm0, %v5657_v51  ;;  %v5656_v5 = vmul.f32 %v10278_v34, %v5654_v19  ;;  %v12844_v60 = vsub.f32 %v12624_v50, %v5657_v51  ;;  %v10282_v50 = vld [vmem:[%s13715_s7 + $0x1] ss:$0 sm:$0xff] }
0x14a1   :  { %v5658_v30 = vadd.f32 %v10279_v32, %v5656_v5  ;;  %10391 = vst.msk [vmem:[%s13719_s8 + $0x30] sm:$0xff] %vm88_vm0, %v12844_v60 }
0x14a3   :  { %10122 = vst.msk [vmem:[%s13719_s8 + $0x18] sm:$0xff] %vm88_vm0, %v5658_v30  ;;  %v12856_v26 = vsub.f32 %v12618_v48, %v5658_v30 }
0x14a5   :  { %v5688_v8 = vpack.c.bf16 %v12856_v26, %v12844_v60  ;;  %10392 = vst.msk [vmem:[%s13719_s8 + $0x38] sm:$0xff] %vm88_vm0, %v12856_v26 }
0x14a7   :  { %10786 = vmatmul.mubr.msk.bf16.vlgmr.msra.gmra.mrb[44].mxu0 %vm88_vm0, %v5688_v8 }
0x157a   :  { %v10787_v53 = vpop.f32.mrb[44].mxu0 }
0x157b   :  { %v12869_v63 = vadd.f32 %v10787_v53, %v10282_v50  ;;  %v5762_v48 = vpop.f32.mrb[45].mxu0 }
0x157c   :  { %v5763_v57 = vadd.f32 %v10282_v50, %v5762_v48  ;;  %v10788_v45 = vpop.f32.mrb[46].mxu0 }
0x157d   :  { %v12871_v27 = vadd.f32 %v10788_v45, %v10282_v50  ;;  %v5765_v36 = vpop.f32.mrb[47].mxu0 }
0x157e   :  { %v12873_v55 = vadd.f32 %v10282_v50, %v5765_v36  ;;  %5781 = vrot.lane.b32.xlu0 %v5763_v57, %s11429_s25 }
0x1580   :  { %5783 = vrot.lane.b32.xlu1 %v12873_v55, %s11429_s25 }
0x1582   :  { %5793 = vrot.lane.b32.xlu0 %v5763_v57, %s11430_s26 }
0x1584   :  { %5795 = vrot.lane.b32.xlu1 %v12873_v55, %s11430_s26 }
0x1586   :  { %5805 = vrot.lane.b32.xlu0 %v5763_v57, %s11431_s27 }
0x1588   :  { %5807 = vrot.lane.b32.xlu1 %v12873_v55, %s11431_s27 }
0x158a   :  { %6361 = vrot.lane.b32.xlu0 %v5763_v57, %s11427_s29 }
0x158c   :  { %6363 = vrot.lane.b32.xlu1 %v12873_v55, %s11427_s29 }
0x15f0   :  { %v5782_v16 = vpop.permute.xlu0 %5781 }
0x15f1   :  { %6369 = vrot.lane.b32.xlu0 %v5782_v16, %s11427_s29 }
0x15f2   :  { %v12888_v15 = vpop.permute.xlu1 %5783 }
0x15f3   :  { %6371 = vrot.lane.b32.xlu1 %v12888_v15, %s11427_s29 }
0x15f4   :  { %v5794_v31 = vpop.permute.xlu0 %5793 }
0x15f5   :  { %6377 = vrot.lane.b32.xlu0 %v5794_v31, %s11427_s29  ;;  %v5817_v44 = vcombine.low %v5763_v57, %v5794_v31  ;;  %v5818_v21 = vcombine.high %v5763_v57, %v5794_v31 }
0x15f6   :  { %v12893_v14 = vpop.permute.xlu1 %5795 }
0x15f7   :  { %6379 = vrot.lane.b32.xlu1 %v12893_v14, %s11427_s29  ;;  %v5825_v47 = vrot.slane %v5817_v44, %v11763_v1  ;;  %v5832_v22 = vrot.slane %v5818_v21, %v11763_v1 }
0x15f8   :  { %v5806_v39 = vpop.permute.xlu0 %5805 }
0x15f9   :  { %v5833_v28 = vcombine.low %v5782_v16, %v5806_v39  ;;  %v5834_v43 = vcombine.high %v5782_v16, %v5806_v39  ;;  %6385 = vrot.lane.b32.xlu0 %v5806_v39, %s11427_s29 }
0x15fa   :  { %v12898_v54 = vpop.permute.xlu1 %5807 }
0x15fb   :  { %v5841_v9 = vrot.slane %v5833_v28, %v11763_v1  ;;  %v5848_v56 = vrot.slane %v5834_v43, %v11763_v1  ;;  %6387 = vrot.lane.b32.xlu1 %v12898_v54, %s11427_s29  ;;  %v5901_v53 = vcombine.low %v12888_v15, %v12898_v54  ;;  %v5902_v44 = vcombine.high %v12888_v15, %v12898_v54 }
0x15fc   :  { %v6362_v5 = vpop.permute.xlu0 %6361 }
0x15fd   :  { %v5849_v61 = vcombine.low %v5825_v47, %v5841_v9  ;;  %v5850_v34 = vcombine.high %v5825_v47, %v5841_v9  ;;  %v5865_v6 = vcombine.low %v5832_v22, %v5848_v56  ;;  %v5866_v42 = vcombine.high %v5832_v22, %v5848_v56  ;;  %5787 = vrot.lane.b32.xlu0 %v12871_v27, %s11429_s25 }
0x15fe   :  { %v6364_v30 = vpop.permute.xlu1 %6363  ;;  %v5909_v21 = vrot.slane %v5901_v53, %v11763_v1 }
0x15ff   :  { %v5857_v24 = vrot.slane %v5849_v61, %v11771_v10  ;;  %v5864_v32 = vrot.slane %v5850_v34, %v11771_v10  ;;  %v5873_v13 = vrot.slane %v5865_v6, %v11771_v10  ;;  %v5880_v7 = vrot.slane %v5866_v42, %v11771_v10  ;;  %5785 = vrot.lane.b32.xlu1 %v12869_v63, %s11429_s25 }
0x1601   :  { %5809 = vrot.lane.b32.xlu0 %v12869_v63, %s11431_s27  ;;  %v6089_v46 = vcombine.low %v5857_v24, %v5864_v32  ;;  %v10289_v29 = vcombine.high %v5857_v24, %v5864_v32  ;;  %v6105_v23 = vcombine.low %v5873_v13, %v5880_v7  ;;  %v10290_v33 = vcombine.high %v5873_v13, %v5880_v7 }
0x1602   :  { %v5916_v13 = vrot.slane %v5902_v44, %v11763_v1 }
0x1603   :  { %5797 = vrot.lane.b32.xlu1 %v12869_v63, %s11430_s26  ;;  %v6096_v58 = vrot.slane %v6089_v46, %v11763_v1  ;;  %v6104_v20 = vrot.slane %v10289_v29, %v11763_v1  ;;  %v6112_v40 = vrot.slane %v6105_v23, %v11763_v1  ;;  %v6120_v18 = vrot.slane %v10290_v33, %v11763_v1 }
0x1605   :  { %6953 = vrot.lane.b32.xlu0 %v5763_v57, %s11426_s0  ;;  %v6121_v17 = vcombine.low %v6096_v58, %v6104_v20  ;;  %v6137_v52 = vcombine.low %v6112_v40, %v6120_v18  ;;  %v6122_v12 = vcombine.high %v6096_v58, %v6104_v20  ;;  %v6138_v25 = vcombine.high %v6112_v40, %v6120_v18 }
0x1606   :  { %v5885_v57 = vcombine.low %v12873_v55, %v12893_v14 }
0x1607   :  { %5799 = vrot.lane.b32.xlu1 %v12871_v27, %s11430_s26  ;;  %v6129_v3 = vrot.slane %v6121_v17, %v11771_v10  ;;  %v6145_v38 = vrot.slane %v6137_v52, %v11771_v10  ;;  %v12928_v41 = vrot.slane %v6122_v12, %v11771_v10  ;;  %v12931_v49 = vrot.slane %v6138_v25, %v11771_v10 }
0x1608   :  { %v5893_v28 = vrot.slane %v5885_v57, %v11763_v1 }
0x1609   :  { %6961 = vrot.lane.b32.xlu0 %v5782_v16, %s11426_s0  ;;  %v6153_v4 = vcombine.low %v6129_v3, %v6145_v38  ;;  %v6154_v62 = vcombine.high %v6129_v3, %v6145_v38  ;;  %v6155_v51 = vcombine.low %v12928_v41, %v12931_v49  ;;  %v6156_v19 = vcombine.high %v12928_v41, %v12931_v49 }
0x160a   :  { %v5917_v7 = vcombine.low %v5893_v28, %v5909_v21  ;;  %v5918_v46 = vcombine.high %v5893_v28, %v5909_v21 }
0x160b   :  { %5811 = vrot.lane.b32.xlu1 %v12871_v27, %s11431_s27  ;;  %10793 = vmatprep.mubr.msk.f32.mxu1 %vm2396_vm12, %v6153_v4 }
0x160c   :  { %10800 = vmatprep.mubr.msk.f32.mxu0 %vm2396_vm12, %v6154_v62 }
0x160d   :  { %6969 = vrot.lane.b32.xlu0 %v5794_v31, %s11426_s0  ;;  %v5886_v31 = vcombine.high %v12873_v55, %v12893_v14 }
0x160f   :  { %6955 = vrot.lane.b32.xlu1 %v12873_v55, %s11426_s0  ;;  %v5900_v32 = vrot.slane %v5886_v31, %v11763_v1 }
0x1611   :  { %6977 = vrot.lane.b32.xlu0 %v5806_v39, %s11426_s0  ;;  %v5933_v53 = vcombine.low %v5900_v32, %v5916_v13 }
0x1613   :  { %6365 = vrot.lane.b32.xlu1 %v12869_v63, %s11427_s29 }
0x1615   :  { %6367 = vrot.lane.b32.xlu0 %v12871_v27, %s11427_s29 }
0x1663   :  { %v6370_v8 = vpop.permute.xlu0 %6369 }
0x1665   :  { %v6372_v50 = vpop.permute.xlu1 %6371 }
0x1667   :  { %v6378_v48 = vpop.permute.xlu0 %6377 }
0x1668   :  { %v6409_v45 = vcombine.low %v6362_v5, %v6378_v48  ;;  %v6410_v36 = vcombine.high %v6362_v5, %v6378_v48  ;;  %v5934_v48 = vcombine.high %v5900_v32, %v5916_v13 }
0x1669   :  { %v6380_v16 = vpop.permute.xlu1 %6379 }
0x166a   :  { %v6417_v22 = vrot.slane %v6409_v45, %v11763_v1  ;;  %v6424_v9 = vrot.slane %v6410_v36, %v11763_v1  ;;  %v6477_v56 = vcombine.low %v6364_v30, %v6380_v16  ;;  %v6478_v61 = vcombine.high %v6364_v30, %v6380_v16 }
0x166b   :  { %v6386_v39 = vpop.permute.xlu0 %6385 }
0x166c   :  { %v6425_v43 = vcombine.low %v6370_v8, %v6386_v39  ;;  %v6426_v47 = vcombine.high %v6370_v8, %v6386_v39  ;;  %v6485_v40 = vrot.slane %v6477_v56, %v11763_v1  ;;  %v6492_v18 = vrot.slane %v6478_v61, %v11763_v1 }
0x166d   :  { %v6388_v34 = vpop.permute.xlu1 %6387  ;;  %v5941_v56 = vrot.slane %v5933_v53, %v11771_v10  ;;  %v5948_v61 = vrot.slane %v5934_v48, %v11771_v10 }
0x166e   :  { %v6433_v6 = vrot.slane %v6425_v43, %v11763_v1  ;;  %v6440_v55 = vrot.slane %v6426_v47, %v11763_v1  ;;  %v6493_v42 = vcombine.low %v6372_v50, %v6388_v34  ;;  %v6494_v24 = vcombine.high %v6372_v50, %v6388_v34 }
0x166f   :  { %v12966_v29 = vpop.permute.xlu0 %5787 }
0x1670   :  { %v6441_v23 = vcombine.low %v6417_v22, %v6433_v6  ;;  %v6442_v33 = vcombine.high %v6417_v22, %v6433_v6  ;;  %v6457_v58 = vcombine.low %v6424_v9, %v6440_v55  ;;  %v6458_v20 = vcombine.high %v6424_v9, %v6440_v55 }
0x1671   :  { %v6501_v17 = vrot.slane %v6493_v42, %v11763_v1  ;;  %v6508_v52 = vrot.slane %v6494_v24, %v11763_v1  ;;  %v12972_v12 = vpop.permute.xlu1 %5785  ;;  %v5925_v22 = vrot.slane %v5917_v7, %v11771_v10  ;;  %v5932_v9 = vrot.slane %v5918_v46, %v11771_v10 }
0x1672   :  { %v6449_v25 = vrot.slane %v6441_v23, %v11771_v10  ;;  %v6456_v3 = vrot.slane %v6442_v33, %v11771_v10  ;;  %v6465_v38 = vrot.slane %v6457_v58, %v11771_v10  ;;  %v6472_v4 = vrot.slane %v6458_v20, %v11771_v10  ;;  %6373 = vrot.lane.b32.xlu1 %v12972_v12, %s11427_s29 }
0x1673   :  { %v6509_v62 = vcombine.low %v6485_v40, %v6501_v17  ;;  %v6510_v5 = vcombine.high %v6485_v40, %v6501_v17  ;;  %v6525_v30 = vcombine.low %v6492_v18, %v6508_v52  ;;  %v6526_v8 = vcombine.high %v6492_v18, %v6508_v52  ;;  %v12980_v50 = vpop.permute.xlu0 %5809 }
0x1674   :  { %v6681_v57 = vcombine.low %v6449_v25, %v6456_v3  ;;  %v10297_v45 = vcombine.high %v6449_v25, %v6456_v3  ;;  %v6697_v36 = vcombine.low %v6465_v38, %v6472_v4  ;;  %v10298_v16 = vcombine.high %v6465_v38, %v6472_v4 }
0x1675   :  { %v6517_v31 = vrot.slane %v6509_v62, %v11771_v10  ;;  %v6524_v44 = vrot.slane %v6510_v5, %v11771_v10  ;;  %v6533_v21 = vrot.slane %v6525_v30, %v11771_v10  ;;  %v6540_v39 = vrot.slane %v6526_v8, %v11771_v10 }
0x1676   :  { %6963 = vrot.lane.b32.xlu1 %v12888_v15, %s11426_s0  ;;  %v6688_v34 = vrot.slane %v6681_v57, %v11763_v1  ;;  %v6696_v6 = vrot.slane %v10297_v45, %v11763_v1  ;;  %v12995_v55 = vrot.slane %v6697_v36, %v11763_v1  ;;  %v12998_v15 = vrot.slane %v10298_v16, %v11763_v1 }
0x1677   :  { %v6749_v28 = vcombine.low %v6517_v31, %v6524_v44  ;;  %v10299_v43 = vcombine.high %v6517_v31, %v6524_v44  ;;  %v6954_v47 = vpop.permute.xlu0 %6953  ;;  %v6765_v42 = vcombine.low %v6533_v21, %v6540_v39  ;;  %v10300_v24 = vcombine.high %v6533_v21, %v6540_v39 }
0x1678   :  { %v6157_v46 = vcombine.low %v5925_v22, %v5932_v9  ;;  %v10291_v23 = vcombine.high %v5925_v22, %v5932_v9  ;;  %v6173_v33 = vcombine.low %v5941_v56, %v5948_v61  ;;  %v10292_v58 = vcombine.high %v5941_v56, %v5948_v61 }
0x1679   :  { %v13003_v32 = vrot.slane %v6749_v28, %v11763_v1  ;;  %v13006_v13 = vrot.slane %v10299_v43, %v11763_v1  ;;  %v6713_v20 = vcombine.low %v6688_v34, %v6696_v6  ;;  %v6729_v40 = vcombine.low %v12995_v55, %v12998_v15 }
0x167a   :  { %6971 = vrot.lane.b32.xlu1 %v12893_v14, %s11426_s0  ;;  %v6772_v18 = vrot.slane %v6765_v42, %v11763_v1  ;;  %v6780_v17 = vrot.slane %v10300_v24, %v11763_v1  ;;  %v13017_v25 = vrot.slane %v6157_v46, %v11763_v1  ;;  %v13020_v3 = vrot.slane %v10291_v23, %v11763_v1 }
0x167b   :  { %v6962_v7 = vpop.permute.xlu0 %6961  ;;  %v6781_v52 = vcombine.low %v13003_v32, %v13006_v13  ;;  %v13023_v38 = vrot.slane %v6173_v33, %v11763_v1  ;;  %v13026_v4 = vrot.slane %v10292_v58, %v11763_v1  ;;  %v6721_v5 = vrot.slane %v6713_v20, %v11771_v10 }
0x167c   :  { %v6797_v8 = vcombine.low %v6772_v18, %v6780_v17  ;;  %v6189_v57 = vcombine.low %v13017_v25, %v13020_v3  ;;  %v6714_v9 = vcombine.high %v6688_v34, %v6696_v6  ;;  %v6730_v20 = vcombine.high %v12995_v55, %v12998_v15 }
0x167d   :  { %v6789_v30 = vrot.slane %v6781_v52, %v11771_v10  ;;  %v6205_v16 = vcombine.low %v13023_v38, %v13026_v4  ;;  %v6782_v52 = vcombine.high %v13003_v32, %v13006_v13 }
0x167e   :  { %6979 = vrot.lane.b32.xlu1 %v12898_v54, %s11426_s0  ;;  %v6737_v54 = vrot.slane %v6729_v40, %v11771_v10  ;;  %v6805_v45 = vrot.slane %v6797_v8, %v11771_v10  ;;  %v6197_v46 = vrot.slane %v6189_v57, %v11771_v10  ;;  %v6728_v6 = vrot.slane %v6714_v9, %v11771_v10 }
0x167f   :  { %v6970_v14 = vpop.permute.xlu0 %6969  ;;  %v6213_v23 = vrot.slane %v6205_v16, %v11771_v10  ;;  %v6796_v57 = vrot.slane %v6782_v52, %v11771_v10 }
0x1680   :  { %v7001_v62 = vcombine.low %v6954_v47, %v6970_v14  ;;  %v7002_v53 = vcombine.high %v6954_v47, %v6970_v14  ;;  %v6745_v44 = vcombine.low %v6721_v5, %v6737_v54  ;;  %v6746_v21 = vcombine.high %v6721_v5, %v6737_v54 }
0x1681   :  { %v6813_v39 = vcombine.low %v6789_v30, %v6805_v45  ;;  %v6814_v28 = vcombine.high %v6789_v30, %v6805_v45  ;;  %v6744_v54 = vrot.slane %v6730_v20, %v11771_v10  ;;  %v6221_v30 = vcombine.low %v6197_v46, %v6213_v23 }
0x1682   :  { %v7009_v31 = vrot.slane %v7001_v62, %v11763_v1  ;;  %v7016_v47 = vrot.slane %v7002_v53, %v11763_v1  ;;  %v6798_v62 = vcombine.high %v6772_v18, %v6780_v17  ;;  %v6222_v8 = vcombine.high %v6197_v46, %v6213_v23 }
0x1683   :  { %v6978_v48 = vpop.permute.xlu0 %6977  ;;  %v11009_v56 = vpack.c.bf16 %v6813_v39, %v6745_v44  ;;  %v11015_v61 = vpack.c.bf16 %v6814_v28, %v6746_v21  ;;  %v6748_v16 = vcombine.high %v6728_v6, %v6744_v54  ;;  %v6190_v21 = vcombine.high %v13017_v25, %v13020_v3 }
0x1684   :  { %v7017_v36 = vcombine.low %v6962_v7, %v6978_v48  ;;  %v7018_v43 = vcombine.high %v6962_v7, %v6978_v48  ;;  %v6812_v55 = vrot.slane %v6798_v62, %v11771_v10 }
0x1685   :  { %11011 = vmatprep.subr.msk.bf16.mxu1 %vm11916_vm13, %v11009_v56  ;;  %11017 = vmatprep.subr.msk.bf16.mxu0 %vm11916_vm13, %v11015_v61 }
0x1686   :  { %v7025_v22 = vrot.slane %v7017_v36, %v11763_v1  ;;  %v7032_v42 = vrot.slane %v7018_v43, %v11763_v1  ;;  %11014 = vmatpush3.bf16.xpose.msk.msra.mxu1 %vm11916_vm13, %v11009_v56  ;;  %11020 = vmatpush3.bf16.xpose.msk.msra.mxu0 %vm11916_vm13, %v11015_v61  ;;  %v6747_v36 = vcombine.low %v6728_v6, %v6744_v54 }
0x1687   :  { %v6815_v13 = vcombine.low %v6796_v57, %v6812_v55  ;;  %v6816_v18 = vcombine.high %v6796_v57, %v6812_v55  ;;  %v6206_v43 = vcombine.high %v13023_v38, %v13026_v4 }
0x1688   :  { %v7033_v24 = vcombine.low %v7009_v31, %v7025_v22  ;;  %v7034_v7 = vcombine.high %v7009_v31, %v7025_v22  ;;  %v7049_v58 = vcombine.low %v7016_v47, %v7032_v42  ;;  %v7050_v34 = vcombine.high %v7016_v47, %v7032_v42  ;;  %v13106_v47 = vpop.permute.xlu1 %5797 }
0x1689   :  { %v11021_v39 = vpack.c.bf16 %v6815_v13, %v6747_v36  ;;  %v11027_v28 = vpack.c.bf16 %v6816_v18, %v6748_v16 }
0x168a   :  { %v7041_v33 = vrot.slane %v7033_v24, %v11771_v10  ;;  %v7048_v40 = vrot.slane %v7034_v7, %v11771_v10  ;;  %v7057_v14 = vrot.slane %v7049_v58, %v11771_v10  ;;  %v7064_v5 = vrot.slane %v7050_v34, %v11771_v10 }
0x168b   :  { %11023 = vmatprep.subr.msk.bf16.mxu1 %vm11916_vm13, %v11021_v39  ;;  %11029 = vmatprep.subr.msk.bf16.mxu0 %vm11916_vm13, %v11027_v28 }
0x168c   :  { %v7273_v53 = vcombine.low %v7041_v33, %v7048_v40  ;;  %v10305_v48 = vcombine.high %v7041_v33, %v7048_v40  ;;  %v7289_v15 = vcombine.low %v7057_v14, %v7064_v5  ;;  %v10306_v45 = vcombine.high %v7057_v14, %v7064_v5  ;;  %v13108_v9 = vpop.permute.xlu1 %5799 }
0x168d   :  { %10794 = vmatmul.mubr.msk.f32.vlgmr.msra.gmra.mrb[26].mxu1 %vm2396_vm12, %v6221_v30  ;;  %10801 = vmatmul.mubr.msk.f32.vlgmr.msra.gmra.mrb[18].mxu0 %vm2396_vm12, %v6222_v8 }
0x168e   :  { %v13063_v31 = vrot.slane %v7273_v53, %v11763_v1  ;;  %v13066_v32 = vrot.slane %v10305_v48, %v11763_v1  ;;  %v7296_v17 = vrot.slane %v7289_v15, %v11763_v1  ;;  %v7304_v44 = vrot.slane %v10306_v45, %v11763_v1  ;;  %10807 = vmatprep.mubr.msk.f32.mxu1 %vm2396_vm12, %v6155_v51 }
0x168f   :  { %10814 = vmatprep.mubr.msk.f32.mxu0 %vm2396_vm12, %v6156_v19  ;;  %11026 = vmatpush3.bf16.xpose.msk.msra.mxu1 %vm11916_vm13, %v11021_v39  ;;  %v6204_v51 = vrot.slane %v6190_v21, %v11771_v10  ;;  %v6220_v19 = vrot.slane %v6206_v43, %v11771_v10 }
0x1690   :  { %v7306_v25 = vcombine.high %v13063_v31, %v13066_v32  ;;  %v7322_v3 = vcombine.high %v7296_v17, %v7304_v44  ;;  %11032 = vmatpush3.bf16.xpose.msk.msra.mxu0 %vm11916_vm13, %v11027_v28  ;;  %v13110_v56 = vpop.permute.xlu1 %5811  ;;  %v7305_v55 = vcombine.low %v13063_v31, %v13066_v32  ;;  %v7321_v15 = vcombine.low %v7296_v17, %v7304_v44 }
0x1691   :  { %v6223_v4 = vcombine.low %v6204_v51, %v6220_v19  ;;  %v6224_v22 = vcombine.high %v6204_v51, %v6220_v19 }
0x1692   :  { %v13095_v41 = vrot.slane %v7306_v25, %v11771_v10  ;;  %v13098_v49 = vrot.slane %v7322_v3, %v11771_v10  ;;  %v7313_v43 = vrot.slane %v7305_v55, %v11771_v10  ;;  %v7329_v25 = vrot.slane %v7321_v15, %v11771_v10 }
0x1694   :  { %v7340_v38 = vcombine.high %v13095_v41, %v13098_v49  ;;  %v6956_v61 = vpop.permute.xlu1 %6955 }
0x1696   :  { %10808 = vmatmul.mubr.msk.f32.vlgmr.msra.gmra.mrb[48].mxu1 %vm2396_vm12, %v6223_v4 }
0x1697   :  { %10815 = vmatmul.mubr.msk.f32.vlgmr.msra.gmra.mrb[48].mxu0 %vm2396_vm12, %v6224_v22  ;;  %v7337_v22 = vcombine.low %v7313_v43, %v7329_v25 }
0x1698   :  { %v13112_v42 = vpop.permute.xlu1 %6365 }
0x16e4   :  { %v13114_v24 = vpop.permute.xlu1 %6373 }
0x16e8   :  { %v6964_v46 = vpop.permute.xlu1 %6963 }
0x16ec   :  { %v6972_v23 = vpop.permute.xlu1 %6971 }
0x16ed   :  { %v7069_v7 = vcombine.low %v6956_v61, %v6972_v23  ;;  %v7070_v33 = vcombine.high %v6956_v61, %v6972_v23  ;;  %v7339_v61 = vcombine.low %v13095_v41, %v13098_v49  ;;  %v10329_v41 = vld [vmem:[%s13716_s2] ss:$0 sm:$0xff] }
0x16ef   :  { %v7077_v20 = vrot.slane %v7069_v7, %v11763_v1  ;;  %v7084_v40 = vrot.slane %v7070_v33, %v11763_v1 }
0x16f0   :  { %v6980_v58 = vpop.permute.xlu1 %6979 }
0x16f1   :  { %v7085_v34 = vcombine.low %v6964_v46, %v6980_v58  ;;  %v7086_v6 = vcombine.high %v6964_v46, %v6980_v58 }
0x16f3   :  { %v7093_v14 = vrot.slane %v7085_v34, %v11763_v1  ;;  %v7100_v52 = vrot.slane %v7086_v6, %v11763_v1  ;;  %v7338_v6 = vcombine.high %v7313_v43, %v7329_v25 }
0x16f5   :  { %v7101_v62 = vcombine.low %v7077_v20, %v7093_v14  ;;  %v7102_v5 = vcombine.high %v7077_v20, %v7093_v14  ;;  %v7117_v54 = vcombine.low %v7084_v40, %v7100_v52  ;;  %v7118_v30 = vcombine.high %v7084_v40, %v7100_v52 }
0x16f7   :  { %v7109_v8 = vrot.slane %v7101_v62, %v11771_v10  ;;  %v7116_v53 = vrot.slane %v7102_v5, %v11771_v10  ;;  %v7125_v48 = vrot.slane %v7117_v54, %v11771_v10  ;;  %v7132_v57 = vrot.slane %v7118_v30, %v11771_v10 }
0x16f9   :  { %v7341_v45 = vcombine.low %v7109_v8, %v7116_v53  ;;  %v10307_v36 = vcombine.high %v7109_v8, %v7116_v53  ;;  %v7357_v16 = vcombine.low %v7125_v48, %v7132_v57  ;;  %v10308_v13 = vcombine.high %v7125_v48, %v7132_v57 }
0x16fb   :  { %v7348_v18 = vrot.slane %v7341_v45, %v11763_v1  ;;  %v7356_v21 = vrot.slane %v10307_v36, %v11763_v1  ;;  %v7364_v39 = vrot.slane %v7357_v16, %v11763_v1  ;;  %v7372_v28 = vrot.slane %v10308_v13, %v11763_v1 }
0x16fd   :  { %v7373_v3 = vcombine.low %v7348_v18, %v7356_v21  ;;  %v7389_v51 = vcombine.low %v7364_v39, %v7372_v28  ;;  %v7374_v31 = vcombine.high %v7348_v18, %v7356_v21  ;;  %v7390_v32 = vcombine.high %v7364_v39, %v7372_v28 }
0x16ff   :  { %v7381_v17 = vrot.slane %v7373_v3, %v11771_v10  ;;  %v7397_v44 = vrot.slane %v7389_v51, %v11771_v10  ;;  %v7388_v19 = vrot.slane %v7374_v31, %v11771_v10  ;;  %v7404_v4 = vrot.slane %v7390_v32, %v11771_v10 }
0x1701   :  { %v7405_v46 = vcombine.low %v7381_v17, %v7397_v44  ;;  %v7407_v23 = vcombine.low %v7388_v19, %v7404_v4  ;;  %v7406_v7 = vcombine.high %v7381_v17, %v7397_v44  ;;  %v7408_v33 = vcombine.high %v7388_v19, %v7404_v4 }
0x1703   :  { %v11033_v58 = vpack.c.bf16 %v7405_v46, %v7337_v22  ;;  %v11041_v34 = vpack.c.bf16 %v7407_v23, %v7339_v61  ;;  %v13138_v20 = vpack.c.bf16 %v7408_v33, %v7340_v38  ;;  %v13140_v40 = vpack.c.bf16 %v7406_v7, %v7338_v6  ;;  %v13160_v22 = vpop.permute.xlu0 %6367 }
0x1705   :  { %11034 = vmatprep.subr.bf16.mxu1 %v11033_v58  ;;  %11042 = vmatprep.subr.bf16.mxu0 %v11041_v34 }
0x1706   :  { %11036 = vmatpush3.bf16.msra.mxu1 %v11033_v58  ;;  %11044 = vmatpush3.bf16.msra.mxu0 %v11041_v34 }
0x1707   :  { %11038 = vmatprep.subr.bf16.mxu1 %v13140_v40 }
0x1760   :  { %v10795_v14 = vpop.f32.mrb[26].mxu1  ;;  %v10802_v49 = vpop.f32.mrb[18].mxu0 }
0x1761   :  { %v7894_v52 = vmul.f32 0.35355338, %v10795_v14  ;;  %v7896_v62 = vmul.f32 0.35355338, %v10802_v49  ;;  %v7623_v5 = vpop.f32.mrb[27].mxu1  ;;  %v7710_v54 = vpop.f32.mrb[19].mxu0 }
0x1762   :  { %v7893_v38 = vmul.f32 0.35355338, %v7623_v5  ;;  %v7895_v48 = vmul.f32 0.35355338, %v7710_v54 }
0x1763   :  { %v7907_v30 = vadd.f32 %v10329_v41, %v7894_v52  ;;  %v7909_v8 = vadd.f32 %v10329_v41, %v7896_v62 }
0x1764   :  { %v7906_v53 = vadd.f32 %v10329_v41, %v7893_v38  ;;  %v7908_v15 = vadd.f32 %v10329_v41, %v7895_v48 }
0x1765   :  { %v7923_v57 = vsel %vm2766_vm14, %v7909_v8, -inf  ;;  %v7917_v55 = vsel %vm2766_vm14, %v7907_v30, -inf }
0x1766   :  { %7924 = vmax.xlane.f32.xlu0 %v7923_v57  ;;  %7918 = vmax.xlane.f32.xlu1 %v7917_v55  ;;  %v7914_v45 = vsel %vm2766_vm14, %v7906_v53, -inf  ;;  %v7920_v43 = vsel %vm2766_vm14, %v7908_v15, -inf }
0x1769   :  { %v10809_v36 = vpop.f32.mrb[48].mxu1 }
0x176a   :  { %v10816_v16 = vpop.f32.mrb[48].mxu0  ;;  %7915 = vmax.xlane.f32.xlu0 %v7914_v45  ;;  %v7797_v18 = vpop.f32.mrb[49].mxu1  ;;  %v7898_v31 = vmul.f32 0.35355338, %v10809_v36 }
0x176b   :  { %v7900_v13 = vmul.f32 0.35355338, %v10816_v16  ;;  %v7884_v21 = vpop.f32.mrb[49].mxu0  ;;  %v7897_v17 = vmul.f32 0.35355338, %v7797_v18 }
0x176c   :  { %v7899_v28 = vmul.f32 0.35355338, %v7884_v21  ;;  %v7911_v32 = vadd.f32 %v10329_v41, %v7898_v31 }
0x176d   :  { %v7913_v39 = vadd.f32 %v10329_v41, %v7900_v13  ;;  %v7910_v44 = vadd.f32 %v10329_v41, %v7897_v17 }
0x176e   :  { %7921 = vmax.xlane.f32.xlu0 %v7920_v43  ;;  %v7912_v25 = vadd.f32 %v10329_v41, %v7899_v28  ;;  %v7929_v19 = vsel %vm2766_vm14, %v7911_v32, -inf }
0x176f   :  { %v7935_v3 = vsel %vm2766_vm14, %v7913_v39, -inf  ;;  %v7926_v4 = vsel %vm2766_vm14, %v7910_v44, -inf }
0x1770   :  { %v7932_v51 = vsel %vm2766_vm14, %v7912_v25, -inf }
0x1772   :  { %7936 = vmax.xlane.f32.xlu0 %v7935_v3 }
0x1776   :  { %7933 = vmax.xlane.f32.xlu0 %v7932_v51 }
0x1777   :  { %6375 = vrot.lane.b32.xlu1 %v12966_v29, %s11427_s29 }
0x178c   :  { %6381 = vrot.lane.b32.xlu0 %v13106_v47, %s11427_s29 }
0x179b   :  { %7930 = vmax.xlane.f32.xlu1 %v7929_v19 }
0x179f   :  { %7927 = vmax.xlane.f32.xlu1 %v7926_v4 }
0x17b0   :  { %6383 = vrot.lane.b32.xlu1 %v13108_v9, %s11427_s29 }
0x17f3   :  { %v7919_v61 = vpop.xlane.xlu1 %7918  ;;  %v7925_v46 = vpop.xlane.xlu0 %7924 }
0x17f4   :  { %v7939_v23 = vsub.f32 %v7907_v30, %v7919_v61  ;;  %v7941_v7 = vsub.f32 %v7909_v8, %v7925_v46 }
0x17f6   :  { %v7948_v33 = vmul.f32 1.442695, %v7939_v23  ;;  %v7952_v58 = vmul.f32 1.442695, %v7941_v7 }
0x17f7   :  { %v7916_v34 = vpop.xlane.xlu0 %7915  ;;  %v13170_v16 = vpop.permute.xlu1 %6375 }
0x17f8   :  { %11341 = vpow2.f32 %v7948_v33  ;;  %v7938_v6 = vsub.f32 %v7906_v53, %v7916_v34 }
0x17f9   :  { %11343 = vpow2.f32 %v7952_v58 }
0x17fa   :  { %v7946_v14 = vmul.f32 1.442695, %v7938_v6 }
0x17fb   :  { %v7922_v41 = vpop.xlane.xlu0 %7921 }
0x17fc   :  { %11345 = vpow2.f32 %v7946_v14  ;;  %v7940_v49 = vsub.f32 %v7908_v15, %v7922_v41 }
0x17fe   :  { %v7950_v52 = vmul.f32 1.442695, %v7940_v49 }
0x17ff   :  { %v7937_v62 = vpop.xlane.xlu0 %7936 }
0x1800   :  { %11347 = vpow2.f32 %v7950_v52  ;;  %v7945_v5 = vsub.f32 %v7913_v39, %v7937_v62 }
0x1802   :  { %v11342_v54 = vpop.eup %11341  ;;  %v7960_v38 = vmul.f32 1.442695, %v7945_v5 }
0x1803   :  { %v7965_v48 = vsel %vm2766_vm14, %v11342_v54, 0.0  ;;  %v11344_v30 = vpop.eup %11343  ;;  %v7934_v13 = vpop.xlane.xlu0 %7933 }
0x1804   :  { %11349 = vpow2.f32 %v7960_v38  ;;  %7966 = vadd.xlane.f32.xlu1 %v7965_v48  ;;  %v7971_v57 = vsel %vm2766_vm14, %v11344_v30, 0.0  ;;  %v7944_v39 = vsub.f32 %v7912_v25, %v7934_v13 }
0x1806   :  { %v11346_v8 = vpop.eup %11345  ;;  %v7958_v51 = vmul.f32 1.442695, %v7944_v39 }
0x1807   :  { %v7962_v53 = vsel %vm2766_vm14, %v11346_v8, 0.0  ;;  %v13194_v7 = vpop.permute.xlu0 %6381 }
0x1808   :  { %7972 = vadd.xlane.f32.xlu1 %v7971_v57  ;;  %7963 = vadd.xlane.f32.xlu0 %v7962_v53  ;;  %v5969_v57 = vcombine.low %v12972_v12, %v12980_v50 }
0x180a   :  { %v11348_v55 = vpop.eup %11347 }
0x180b   :  { %v7968_v15 = vsel %vm2766_vm14, %v11348_v55, 0.0 }
0x180c   :  { %7969 = vadd.xlane.f32.xlu0 %v7968_v15 }
0x180e   :  { %v13166_v45 = vpop.eup %11349 }
0x180f   :  { %v7983_v36 = vsel %vm2766_vm14, %v13166_v45, 0.0 }
0x1810   :  { %7984 = vadd.xlane.f32.xlu0 %v7983_v36 }
0x1828   :  { %v7931_v18 = vpop.xlane.xlu1 %7930 }
0x1829   :  { %v7943_v21 = vsub.f32 %v7911_v32, %v7931_v18 }
0x182b   :  { %v7956_v28 = vmul.f32 1.442695, %v7943_v21 }
0x182c   :  { %v7928_v43 = vpop.xlane.xlu1 %7927 }
0x182d   :  { %11351 = vpow2.f32 %v7956_v28  ;;  %v7942_v3 = vsub.f32 %v7910_v44, %v7928_v43 }
0x182f   :  { %v7954_v31 = vmul.f32 1.442695, %v7942_v3  ;;  %v6037_v3 = vcombine.low %v12966_v29, %v13110_v56 }
0x1830   :  { %v13172_v17 = vpop.permute.xlu1 %6383 }
0x1831   :  { %11353 = vpow2.f32 %v7954_v31  ;;  %v6613_v19 = vcombine.low %v13160_v22, %v13172_v17  ;;  %v6614_v4 = vcombine.high %v13160_v22, %v13172_v17 }
0x1832   :  { %11355 = vpow2.f32 %v7958_v51  ;;  %v6021_v51 = vcombine.low %v12871_v27, %v13108_v9 }
0x1837   :  { %v13178_v61 = vpop.eup %11351 }
0x1838   :  { %v7977_v25 = vsel %vm2766_vm14, %v13178_v61, 0.0 }
0x1839   :  { %7978 = vadd.xlane.f32.xlu1 %v7977_v25 }
0x183b   :  { %v13182_v32 = vpop.eup %11353 }
0x183c   :  { %v7974_v44 = vsel %vm2766_vm14, %v13182_v32, 0.0  ;;  %v13186_v46 = vpop.eup %11355 }
0x183d   :  { %7975 = vadd.xlane.f32.xlu0 %v7974_v44  ;;  %v7980_v23 = vsel %vm2766_vm14, %v13186_v46, 0.0 }
0x1841   :  { %7981 = vadd.xlane.f32.xlu0 %v7980_v23 }
0x184a   :  { %6391 = vrot.lane.b32.xlu1 %v13110_v56, %s11427_s29 }
0x1857   :  { %6389 = vrot.lane.b32.xlu0 %v12980_v50, %s11427_s29 }
0x1891   :  { %v7967_v33 = vpop.xlane.xlu1 %7966 }
0x1892   :  { %11357 = vrcp.f32 %v7967_v33  ;;  %v6038_v33 = vcombine.high %v12966_v29, %v13110_v56 }
0x1895   :  { %v7964_v58 = vpop.xlane.xlu0 %7963  ;;  %v7973_v34 = vpop.xlane.xlu1 %7972 }
0x1896   :  { %11359 = vrcp.f32 %v7964_v58  ;;  %v6045_v58 = vrot.slane %v6037_v3, %v11763_v1 }
0x1897   :  { %11361 = vrcp.f32 %v7973_v34 }
0x1899   :  { %v7970_v6 = vpop.xlane.xlu0 %7969 }
0x189a   :  { %11363 = vrcp.f32 %v7970_v6  ;;  %v6022_v6 = vcombine.high %v12871_v27, %v13108_v9 }
0x189c   :  { %v11358_v14 = vpop.eup %11357 }
0x189d   :  { %v7989_v62 = vmul.f32 %v11358_v14, %v11342_v54  ;;  %v5953_v54 = vcombine.low %v12869_v63, %v13106_v47  ;;  %v7985_v34 = vpop.xlane.xlu0 %7984  ;;  %v6029_v14 = vrot.slane %v6021_v51, %v11763_v1 }
0x189e   :  { %11365 = vrcp.f32 %v7985_v34 }
0x18a0   :  { %v11360_v41 = vpop.eup %11359 }
0x18a1   :  { %v7987_v49 = vmul.f32 %v11360_v41, %v11346_v8  ;;  %v11362_v52 = vpop.eup %11361  ;;  %v5954_v8 = vcombine.high %v12869_v63, %v13106_v47 }
0x18a2   :  { %v7993_v48 = vmul.f32 %v11362_v52, %v11344_v30  ;;  %v5961_v30 = vrot.slane %v5953_v54, %v11763_v1  ;;  %v6036_v54 = vrot.slane %v6022_v6, %v11763_v1 }
0x18a3   :  { %10821 = vmatprep.mubr.msk.f32.mxu1 %vm2766_vm14, %v7987_v49  ;;  %v5968_v53 = vrot.slane %v5954_v8, %v11763_v1  ;;  %v6054_v8 = vcombine.high %v6029_v14, %v6045_v58 }
0x18a4   :  { %v11364_v5 = vpop.eup %11363  ;;  %10822 = vmatmul.mubr.msk.f32.vlgmr.msra.gmra.mrb[50].mxu1 %vm2766_vm14, %v7989_v62 }
0x18a5   :  { %v7991_v38 = vmul.f32 %v11364_v5, %v11348_v55  ;;  %11040 = vmatpush3.bf16.msra.mxu1 %v13140_v40  ;;  %v5970_v40 = vcombine.high %v12972_v12, %v12980_v50  ;;  %v5977_v55 = vrot.slane %v5969_v57, %v11763_v1 }
0x18a6   :  { %11046 = vmatprep.subr.bf16.mxu1 %v13138_v20 }
0x18a7   :  { %10828 = vmatprep.mubr.msk.f32.mxu1 %vm2766_vm14, %v7991_v38  ;;  %v5985_v15 = vcombine.low %v5961_v30, %v5977_v55  ;;  %v5986_v36 = vcombine.high %v5961_v30, %v5977_v55  ;;  %v6052_v38 = vrot.slane %v6038_v33, %v11763_v1 }
0x18a8   :  { %10829 = vmatmul.mubr.msk.f32.vlgmr.msra.gmra.mrb[52].mxu1 %vm2766_vm14, %v7993_v48  ;;  %v6053_v48 = vcombine.low %v6029_v14, %v6045_v58  ;;  %v11366_v33 = vpop.eup %11365 }
0x18a9   :  { %11048 = vmatpush3.bf16.msra.mxu1 %v13138_v20  ;;  %v5984_v20 = vrot.slane %v5970_v40, %v11763_v1  ;;  %v5993_v21 = vrot.slane %v5985_v15, %v11771_v10  ;;  %v6000_v39 = vrot.slane %v5986_v36, %v11771_v10  ;;  %v6069_v36 = vcombine.low %v6036_v54, %v6052_v38 }
0x18aa   :  { %v13250_v15 = vrot.slane %v6053_v48, %v11771_v10 }
0x18ab   :  { %v6001_v13 = vcombine.low %v5968_v53, %v5984_v20  ;;  %v6002_v18 = vcombine.high %v5968_v53, %v5984_v20  ;;  %v6225_v31 = vcombine.low %v5993_v21, %v6000_v39  ;;  %v10293_v25 = vcombine.high %v5993_v21, %v6000_v39 }
0x18ac   :  { %v6628_v21 = vrot.slane %v6614_v4, %v11763_v1 }
0x18ad   :  { %v6009_v28 = vrot.slane %v6001_v13, %v11771_v10  ;;  %v6016_v43 = vrot.slane %v6002_v18, %v11771_v10  ;;  %v13230_v49 = vrot.slane %v6225_v31, %v11763_v1  ;;  %v13233_v52 = vrot.slane %v10293_v25, %v11763_v1 }
0x18ae   :  { %v6070_v13 = vcombine.high %v6036_v54, %v6052_v38  ;;  %v6621_v18 = vrot.slane %v6613_v19, %v11763_v1  ;;  %v13274_v25 = vrot.slane %v6069_v36, %v11771_v10 }
0x18af   :  { %v6241_v44 = vcombine.low %v6009_v28, %v6016_v43  ;;  %v10294_v23 = vcombine.high %v6009_v28, %v6016_v43  ;;  %v6257_v30 = vcombine.low %v13230_v49, %v13233_v52  ;;  %v13263_v28 = vrot.slane %v6054_v8, %v11771_v10 }
0x18b0   :  { %v6545_v43 = vcombine.low %v13112_v42, %v13194_v7 }
0x18b1   :  { %v13236_v62 = vrot.slane %v6241_v44, %v11763_v1  ;;  %v13239_v5 = vrot.slane %v10294_v23, %v11763_v1  ;;  %v13268_v51 = vrot.slane %v6257_v30, %v11771_v10  ;;  %v13277_v44 = vrot.slane %v6070_v13, %v11771_v10 }
0x18b2   :  { %v6546_v23 = vcombine.high %v13112_v42, %v13194_v7  ;;  %v10295_v38 = vcombine.high %v13250_v15, %v13263_v28  ;;  %v6553_v48 = vrot.slane %v6545_v43, %v11763_v1 }
0x18b3   :  { %v6273_v53 = vcombine.low %v13236_v62, %v13239_v5 }
0x18b5   :  { %v13271_v19 = vrot.slane %v6273_v53, %v11771_v10  ;;  %v6560_v53 = vrot.slane %v6546_v23, %v11763_v1 }
0x18b7   :  { %v6289_v42 = vcombine.low %v13268_v51, %v13271_v19 }
0x18c6   :  { %v7979_v41 = vpop.xlane.xlu1 %7978 }
0x18c7   :  { %11367 = vrcp.f32 %v7979_v41  ;;  %v6293_v41 = vcombine.low %v13250_v15, %v13263_v28 }
0x18ca   :  { %v6392_v57 = vpop.permute.xlu1 %6391  ;;  %v7976_v40 = vpop.xlane.xlu0 %7975 }
0x18cb   :  { %v6629_v55 = vcombine.low %v13170_v16, %v6392_v57  ;;  %v6630_v20 = vcombine.high %v13170_v16, %v6392_v57  ;;  %11369 = vrcp.f32 %v7976_v40 }
0x18cd   :  { %v6637_v39 = vrot.slane %v6629_v55, %v11763_v1  ;;  %v6644_v16 = vrot.slane %v6630_v20, %v11763_v1  ;;  %v8001_v55 = vmul.f32 %v11366_v33, %v13166_v45 }
0x18ce   :  { %v7982_v3 = vpop.xlane.xlu0 %7981 }
0x18cf   :  { %v6645_v31 = vcombine.low %v6621_v18, %v6637_v39  ;;  %v6646_v22 = vcombine.high %v6621_v18, %v6637_v39  ;;  %v6661_v17 = vcombine.low %v6628_v21, %v6644_v16  ;;  %v6662_v4 = vcombine.high %v6628_v21, %v6644_v16 }
0x18d0   :  { %11371 = vrcp.f32 %v7982_v3 }
0x18d1   :  { %v6653_v58 = vrot.slane %v6645_v31, %v11771_v10  ;;  %v6660_v34 = vrot.slane %v6646_v22, %v11771_v10  ;;  %v6669_v6 = vrot.slane %v6661_v17, %v11771_v10  ;;  %v6676_v14 = vrot.slane %v6662_v4, %v11771_v10  ;;  %v11368_v7 = vpop.eup %11367 }
0x18d2   :  { %v6390_v54 = vpop.permute.xlu0 %6389  ;;  %v7997_v43 = vmul.f32 %v11368_v7, %v13178_v61 }
0x18d3   :  { %v6885_v8 = vcombine.low %v6653_v58, %v6660_v34  ;;  %v10303_v57 = vcombine.high %v6653_v58, %v6660_v34  ;;  %v6901_v40 = vcombine.low %v6669_v6, %v6676_v14  ;;  %v10304_v30 = vcombine.high %v6669_v6, %v6676_v14 }
0x18d4   :  { %v6561_v20 = vcombine.low %v13114_v24, %v6390_v54  ;;  %v6562_v36 = vcombine.high %v13114_v24, %v6390_v54 }
0x18d5   :  { %v11370_v13 = vpop.eup %11369  ;;  %v6892_v18 = vrot.slane %v6885_v8, %v11763_v1  ;;  %v6900_v21 = vrot.slane %v10303_v57, %v11763_v1  ;;  %v6908_v39 = vrot.slane %v6901_v40, %v11763_v1  ;;  %v6916_v16 = vrot.slane %v10304_v30, %v11763_v1 }
0x18d6   :  { %v6569_v3 = vrot.slane %v6561_v20, %v11763_v1  ;;  %v6576_v31 = vrot.slane %v6562_v36, %v11763_v1  ;;  %v7995_v45 = vmul.f32 %v11370_v13, %v13182_v32 }
0x18d7   :  { %v6917_v22 = vcombine.low %v6892_v18, %v6900_v21  ;;  %v6933_v17 = vcombine.low %v6908_v39, %v6916_v16  ;;  %v6918_v24 = vcombine.high %v6892_v18, %v6900_v21  ;;  %v6934_v4 = vcombine.high %v6908_v39, %v6916_v16 }
0x18d8   :  { %v6577_v23 = vcombine.low %v6553_v48, %v6569_v3  ;;  %v6578_v33 = vcombine.high %v6553_v48, %v6569_v3  ;;  %v6593_v58 = vcombine.low %v6560_v53, %v6576_v31  ;;  %v6594_v34 = vcombine.high %v6560_v53, %v6576_v31  ;;  %10835 = vmatprep.mubr.msk.f32.mxu0 %vm2766_vm14, %v7995_v45 }
0x18d9   :  { %10836 = vmatmul.mubr.msk.f32.vlgmr.msra.gmra.mrb[50].mxu0 %vm2766_vm14, %v7997_v43  ;;  %v6925_v61 = vrot.slane %v6917_v22, %v11771_v10  ;;  %v6941_v6 = vrot.slane %v6933_v17, %v11771_v10  ;;  %v6932_v14 = vrot.slane %v6918_v24, %v11771_v10  ;;  %v6948_v32 = vrot.slane %v6934_v4, %v11771_v10 }
0x18da   :  { %v11372_v54 = vpop.eup %11371  ;;  %v6585_v7 = vrot.slane %v6577_v23, %v11771_v10  ;;  %v6592_v8 = vrot.slane %v6578_v33, %v11771_v10  ;;  %v6601_v48 = vrot.slane %v6593_v58, %v11771_v10  ;;  %v6608_v57 = vrot.slane %v6594_v34, %v11771_v10  ;;  %10849 = vmatprep.mubr.msk.f32.mxu0 %vm2396_vm12, %v6289_v42 }
0x18db   :  { %v7999_v40 = vmul.f32 %v11372_v54, %v13186_v46  ;;  %v6949_v30 = vcombine.low %v6925_v61, %v6941_v6  ;;  %v6950_v53 = vcombine.high %v6925_v61, %v6941_v6  ;;  %v6951_v20 = vcombine.low %v6932_v14, %v6948_v32 }
0x18dc   :  { %v6817_v36 = vcombine.low %v6585_v7, %v6592_v8  ;;  %v10301_v13 = vcombine.high %v6585_v7, %v6592_v8  ;;  %v6833_v18 = vcombine.low %v6601_v48, %v6608_v57  ;;  %v10302_v21 = vcombine.high %v6601_v48, %v6608_v57 }
0x18dd   :  { %v6309_v39 = vcombine.low %v13274_v25, %v13277_v44  ;;  %v10296_v16 = vcombine.high %v13274_v25, %v13277_v44  ;;  %10842 = vmatprep.mubr.msk.f32.mxu1 %vm2766_vm14, %v7999_v40  ;;  %v6290_v42 = vcombine.high %v13268_v51, %v13271_v19  ;;  %v6952_v43 = vcombine.high %v6932_v14, %v6948_v32 }
0x18de   :  { %v6824_v46 = vrot.slane %v6817_v36, %v11763_v1  ;;  %v6832_v3 = vrot.slane %v10301_v13, %v11763_v1  ;;  %v6840_v31 = vrot.slane %v6833_v18, %v11763_v1  ;;  %v6848_v45 = vrot.slane %v10302_v21, %v11763_v1  ;;  %10843 = vmatmul.mubr.msk.f32.vlgmr.msra.gmra.mrb[54].mxu1 %vm2766_vm14, %v8001_v55 }
0x18df   :  { %10856 = vmatprep.mubr.msk.f32.mxu1 %vm2396_vm12, %v6290_v42  ;;  %v6300_v51 = vrot.slane %v6293_v41, %v11763_v1  ;;  %v6308_v19 = vrot.slane %v10295_v38, %v11763_v1  ;;  %v6316_v24 = vrot.slane %v6309_v39, %v11763_v1  ;;  %v6324_v55 = vrot.slane %v10296_v16, %v11763_v1 }
0x18e0   :  { %v6849_v22 = vcombine.low %v6824_v46, %v6832_v3  ;;  %v6865_v25 = vcombine.low %v6840_v31, %v6848_v45  ;;  %v6850_v44 = vcombine.high %v6824_v46, %v6832_v3  ;;  %v6866_v17 = vcombine.high %v6840_v31, %v6848_v45 }
0x18e1   :  { %v6325_v14 = vcombine.low %v6300_v51, %v6308_v19  ;;  %v6341_v32 = vcombine.low %v6316_v24, %v6324_v55  ;;  %v6258_v7 = vcombine.high %v13230_v49, %v13233_v52  ;;  %v6274_v8 = vcombine.high %v13236_v62, %v13239_v5 }
0x18e2   :  { %v6857_v4 = vrot.slane %v6849_v22, %v11771_v10  ;;  %v6873_v23 = vrot.slane %v6865_v25, %v11771_v10  ;;  %v6864_v33 = vrot.slane %v6850_v44, %v11771_v10  ;;  %v6880_v58 = vrot.slane %v6866_v17, %v11771_v10 }
0x18e3   :  { %v6333_v49 = vrot.slane %v6325_v14, %v11771_v10  ;;  %v6349_v52 = vrot.slane %v6341_v32, %v11771_v10  ;;  %v6272_v62 = vrot.slane %v6258_v7, %v11771_v10  ;;  %v6288_v5 = vrot.slane %v6274_v8, %v11771_v10 }
0x18e4   :  { %v6881_v34 = vcombine.low %v6857_v4, %v6873_v23  ;;  %v6882_v61 = vcombine.high %v6857_v4, %v6873_v23  ;;  %v6883_v41 = vcombine.low %v6864_v33, %v6880_v58  ;;  %v6884_v6 = vcombine.high %v6864_v33, %v6880_v58 }
0x18e5   :  { %v6357_v48 = vcombine.low %v6333_v49, %v6349_v52  ;;  %v6358_v57 = vcombine.high %v6333_v49, %v6349_v52  ;;  %v6326_v40 = vcombine.high %v6300_v51, %v6308_v19 }
0x18e6   :  { %v11049_v15 = vpack.c.bf16 %v6949_v30, %v6881_v34  ;;  %v11055_v28 = vpack.c.bf16 %v6950_v53, %v6882_v61  ;;  %v11061_v38 = vpack.c.bf16 %v6951_v20, %v6883_v41  ;;  %v11067_v54 = vpack.c.bf16 %v6952_v43, %v6884_v6 }
0x18e7   :  { %v6342_v30 = vcombine.high %v6316_v24, %v6324_v55  ;;  %v6291_v53 = vcombine.low %v6272_v62, %v6288_v5  ;;  %v6292_v20 = vcombine.high %v6272_v62, %v6288_v5  ;;  %v6340_v36 = vrot.slane %v6326_v40, %v11771_v10 }
0x18e8   :  { %11051 = vmatprep.subr.msk.bf16.mxu0 %vm11916_vm13, %v11049_v15  ;;  %11057 = vmatprep.subr.msk.bf16.mxu1 %vm11916_vm13, %v11055_v28 }
0x18e9   :  { %11054 = vmatpush3.bf16.xpose.msk.msra.mxu0 %vm11916_vm13, %v11049_v15  ;;  %11060 = vmatpush3.bf16.xpose.msk.msra.mxu1 %vm11916_vm13, %v11055_v28  ;;  %v6356_v13 = vrot.slane %v6342_v30, %v11771_v10 }
0x18ea   :  { %11063 = vmatprep.subr.msk.bf16.mxu0 %vm11916_vm13, %v11061_v38  ;;  %11069 = vmatprep.subr.msk.bf16.mxu1 %vm11916_vm13, %v11067_v54 }
0x18eb   :  { %v6359_v18 = vcombine.low %v6340_v36, %v6356_v13  ;;  %v6360_v21 = vcombine.high %v6340_v36, %v6356_v13 }
0x18f0   :  { %10850 = vmatmul.mubr.msk.f32.vlgmr.msra.gmra.mrb[52].mxu0 %vm2396_vm12, %v6357_v48  ;;  %10857 = vmatmul.mubr.msk.f32.vlgmr.msra.gmra.mrb[56].mxu1 %vm2396_vm12, %v6358_v57 }
0x18f1   :  { %11066 = vmatpush3.bf16.xpose.msk.msra.mxu0 %vm11916_vm13, %v11061_v38  ;;  %10863 = vmatprep.mubr.msk.f32.mxu0 %vm2396_vm12, %v6291_v53 }
0x18f2   :  { %11072 = vmatpush3.bf16.xpose.msk.msra.mxu1 %vm11916_vm13, %v11067_v54  ;;  %10870 = vmatprep.mubr.msk.f32.mxu1 %vm2396_vm12, %v6292_v20 }
0x18f8   :  { %10864 = vmatmul.mubr.msk.f32.vlgmr.msra.gmra.mrb[54].mxu0 %vm2396_vm12, %v6359_v18 }
0x18f9   :  { %10871 = vmatmul.mubr.msk.f32.vlgmr.msra.gmra.mrb[58].mxu1 %vm2396_vm12, %v6360_v21 }
0x1977   :  { %v10823_v39 = vpop.f32.mrb[50].mxu1 }
0x1978   :  { %v8074_v16 = vpop.f32.mrb[51].mxu1 }
0x197b   :  { %v10830_v42 = vpop.f32.mrb[52].mxu1 }
0x197c   :  { %v8155_v43 = vpop.f32.mrb[53].mxu1 }
0x19ac   :  { %v10837_v46 = vpop.f32.mrb[50].mxu0 }
0x19ad   :  { %v9175_v3 = vcombine.low %v10823_v39, %v10837_v46  ;;  %v9176_v37 = vcombine.high %v10823_v39, %v10837_v46  ;;  %v8236_v31 = vpop.f32.mrb[51].mxu0 }
0x19ae   :  { %v9107_v45 = vcombine.low %v8074_v16, %v8236_v31  ;;  %v9108_v22 = vcombine.high %v8074_v16, %v8236_v31 }
0x19af   :  { %v9183_v55 = vrot.slane %v9175_v3, %v11763_v1  ;;  %v9190_v4 = vrot.slane %v9176_v37, %v11763_v1 }
0x19b0   :  { %v9115_v58 = vrot.slane %v9107_v45, %v11763_v1  ;;  %v9122_v34 = vrot.slane %v9108_v22, %v11763_v1 }
0x19b1   :  { %v10844_v25 = vpop.f32.mrb[54].mxu1 }
0x19b2   :  { %v9191_v44 = vcombine.low %v10830_v42, %v10844_v25  ;;  %v9192_v17 = vcombine.high %v10830_v42, %v10844_v25  ;;  %v8317_v51 = vpop.f32.mrb[55].mxu1 }
0x19b3   :  { %v9123_v19 = vcombine.low %v8155_v43, %v8317_v51  ;;  %v9124_v24 = vcombine.high %v8155_v43, %v8317_v51 }
0x19b4   :  { %v9199_v23 = vrot.slane %v9191_v44, %v11763_v1  ;;  %v9206_v33 = vrot.slane %v9192_v17, %v11763_v1 }
0x19b5   :  { %v9131_v61 = vrot.slane %v9123_v19, %v11763_v1  ;;  %v9138_v41 = vrot.slane %v9124_v24, %v11763_v1 }
0x19b6   :  { %v9207_v6 = vcombine.low %v9183_v55, %v9199_v23  ;;  %v9208_v14 = vcombine.high %v9183_v55, %v9199_v23  ;;  %v9223_v32 = vcombine.low %v9190_v4, %v9206_v33  ;;  %v9224_v15 = vcombine.high %v9190_v4, %v9206_v33 }
0x19b7   :  { %v9139_v28 = vcombine.low %v9115_v58, %v9131_v61  ;;  %v9140_v38 = vcombine.high %v9115_v58, %v9131_v61  ;;  %v9155_v54 = vcombine.low %v9122_v34, %v9138_v41  ;;  %v9156_v7 = vcombine.high %v9122_v34, %v9138_v41 }
0x19b8   :  { %v9215_v8 = vrot.slane %v9207_v6, %v11771_v10  ;;  %v9222_v49 = vrot.slane %v9208_v14, %v11771_v10  ;;  %v9231_v52 = vrot.slane %v9223_v32, %v11771_v10  ;;  %v9238_v62 = vrot.slane %v9224_v15, %v11771_v10 }
0x19b9   :  { %v9147_v5 = vrot.slane %v9139_v28, %v11771_v10  ;;  %v9154_v48 = vrot.slane %v9140_v38, %v11771_v10  ;;  %v9163_v57 = vrot.slane %v9155_v54, %v11771_v10  ;;  %v9170_v40 = vrot.slane %v9156_v7, %v11771_v10  ;;  %v10354_v54 = vld [vmem:[%s13716_s2 + $0x1] ss:$0 sm:$0xff] }
0x19ba   :  { %v9447_v30 = vcombine.low %v9215_v8, %v9222_v49  ;;  %v10365_v53 = vcombine.high %v9215_v8, %v9222_v49  ;;  %v9463_v20 = vcombine.low %v9231_v52, %v9238_v62  ;;  %v10366_v36 = vcombine.high %v9231_v52, %v9238_v62 }
0x19bb   :  { %v9379_v13 = vcombine.low %v9147_v5, %v9154_v48  ;;  %v10363_v18 = vcombine.high %v9147_v5, %v9154_v48  ;;  %v9395_v21 = vcombine.low %v9163_v57, %v9170_v40  ;;  %v10364_v39 = vcombine.high %v9163_v57, %v9170_v40 }
0x19bc   :  { %v9454_v16 = vrot.slane %v9447_v30, %v11763_v1  ;;  %v9462_v42 = vrot.slane %v10365_v53, %v11763_v1  ;;  %v9470_v43 = vrot.slane %v9463_v20, %v11763_v1  ;;  %v9478_v46 = vrot.slane %v10366_v36, %v11763_v1 }
0x19bd   :  { %v9386_v3 = vrot.slane %v9379_v13, %v11763_v1  ;;  %v9394_v37 = vrot.slane %v10363_v18, %v11763_v1  ;;  %v9402_v31 = vrot.slane %v9395_v21, %v11763_v1  ;;  %v9410_v45 = vrot.slane %v10364_v39, %v11763_v1 }
0x19be   :  { %v9480_v22 = vcombine.high %v9454_v16, %v9462_v42  ;;  %v9496_v25 = vcombine.high %v9470_v43, %v9478_v46  ;;  %v9479_v44 = vcombine.low %v9454_v16, %v9462_v42  ;;  %v9495_v17 = vcombine.low %v9470_v43, %v9478_v46 }
0x19bf   :  { %v9412_v51 = vcombine.high %v9386_v3, %v9394_v37  ;;  %v9428_v19 = vcombine.high %v9402_v31, %v9410_v45  ;;  %v9411_v24 = vcombine.low %v9386_v3, %v9394_v37  ;;  %v9427_v55 = vcombine.low %v9402_v31, %v9410_v45 }
0x19c0   :  { %v9494_v4 = vrot.slane %v9480_v22, %v11771_v10  ;;  %v9510_v23 = vrot.slane %v9496_v25, %v11771_v10  ;;  %v13402_v33 = vrot.slane %v9479_v44, %v11771_v10  ;;  %v13405_v58 = vrot.slane %v9495_v17, %v11771_v10 }
0x19c1   :  { %v9426_v34 = vrot.slane %v9412_v51, %v11771_v10  ;;  %v9442_v61 = vrot.slane %v9428_v19, %v11771_v10  ;;  %v13410_v41 = vrot.slane %v9411_v24, %v11771_v10  ;;  %v13413_v6 = vrot.slane %v9427_v55, %v11771_v10 }
0x19c2   :  { %v9513_v14 = vcombine.low %v9494_v4, %v9510_v23  ;;  %v9514_v32 = vcombine.high %v9494_v4, %v9510_v23  ;;  %v9512_v15 = vcombine.high %v13402_v33, %v13405_v58  ;;  %v9511_v28 = vcombine.low %v13402_v33, %v13405_v58 }
0x19c3   :  { %v10851_v38 = vpop.f32.mrb[52].mxu0  ;;  %v10858_v7 = vpop.f32.mrb[56].mxu1  ;;  %v9445_v8 = vcombine.low %v9426_v34, %v9442_v61  ;;  %v9446_v49 = vcombine.high %v9426_v34, %v9442_v61  ;;  %v9444_v52 = vcombine.high %v13410_v41, %v13413_v6  ;;  %v9443_v62 = vcombine.low %v13410_v41, %v13413_v6 }
0x19c4   :  { %v8675_v5 = vmul.f32 0.35355338, %v10851_v38  ;;  %v8404_v48 = vpop.f32.mrb[53].mxu0  ;;  %v8491_v57 = vpop.f32.mrb[57].mxu1  ;;  %v8677_v21 = vmul.f32 0.35355338, %v10858_v7 }
0x19c5   :  { %v8674_v40 = vmul.f32 0.35355338, %v8404_v48  ;;  %v8676_v30 = vmul.f32 0.35355338, %v8491_v57  ;;  %v13426_v53 = vpack.i.bf16 %v9513_v14, %v9445_v8  ;;  %v13428_v20 = vpack.i.bf16 %v9514_v32, %v9446_v49 }
0x19c6   :  { %v8688_v36 = vadd.f32 %v10354_v54, %v8675_v5  ;;  %v13430_v13 = vpack.i.bf16 %v9512_v15, %v9444_v52  ;;  %v8690_v46 = vadd.f32 %v10354_v54, %v8677_v21 }
0x19c7   :  { %v8689_v18 = vadd.f32 %v10354_v54, %v8676_v30  ;;  %v8687_v39 = vadd.f32 %v10354_v54, %v8674_v40 }
0x19c8   :  { %v8698_v16 = vsel %vm2766_vm14, %v8688_v36, -inf  ;;  %v8704_v24 = vsel %vm2766_vm14, %v8690_v46, -inf }
0x19c9   :  { %8699 = vmax.xlane.f32.xlu0 %v8698_v16  ;;  %v8701_v42 = vsel %vm2766_vm14, %v8689_v18, -inf  ;;  %v8695_v31 = vsel %vm2766_vm14, %v8687_v39, -inf }
0x19ca   :  { %8702 = vmax.xlane.f32.xlu1 %v8701_v42 }
0x19cb   :  { %v10865_v43 = vpop.f32.mrb[54].mxu0 }
0x19cc   :  { %v10872_v3 = vpop.f32.mrb[58].mxu1  ;;  %v8578_v37 = vpop.f32.mrb[55].mxu0  ;;  %v8679_v45 = vmul.f32 0.35355338, %v10865_v43 }
0x19cd   :  { %v8678_v22 = vmul.f32 0.35355338, %v8578_v37  ;;  %v8665_v25 = vpop.f32.mrb[59].mxu1  ;;  %8696 = vmax.xlane.f32.xlu0 %v8695_v31  ;;  %v8681_v51 = vmul.f32 0.35355338, %v10872_v3 }
0x19ce   :  { %v8680_v44 = vmul.f32 0.35355338, %v8665_v25  ;;  %v8692_v55 = vadd.f32 %v10354_v54, %v8679_v45 }
0x19cf   :  { %v8691_v17 = vadd.f32 %v10354_v54, %v8678_v22  ;;  %v8694_v23 = vadd.f32 %v10354_v54, %v8681_v51 }
0x19d0   :  { %v8693_v19 = vadd.f32 %v10354_v54, %v8680_v44  ;;  %v8710_v61 = vsel %vm2766_vm14, %v8692_v55, -inf }
0x19d1   :  { %8705 = vmax.xlane.f32.xlu0 %v8704_v24  ;;  %v8707_v4 = vsel %vm2766_vm14, %v8691_v17, -inf  ;;  %v8716_v14 = vsel %vm2766_vm14, %v8694_v23, -inf }
0x19d2   :  { %8708 = vmax.xlane.f32.xlu1 %v8707_v4  ;;  %v8713_v34 = vsel %vm2766_vm14, %v8693_v19, -inf }
0x19d5   :  { %8714 = vmax.xlane.f32.xlu0 %v8713_v34 }
0x19d6   :  { %8711 = vmax.xlane.f32.xlu1 %v8710_v61 }
0x19d9   :  { %8717 = vmax.xlane.f32.xlu0 %v8716_v14 }
0x19e7   :  { %6957 = vrot.lane.b32.xlu1 %v12869_v63, %s11426_s0 }
0x19eb   :  { %6965 = vrot.lane.b32.xlu1 %v12972_v12, %s11426_s0 }
0x19ef   :  { %6959 = vrot.lane.b32.xlu0 %v12871_v27, %s11426_s0  ;;  %6967 = vrot.lane.b32.xlu1 %v12966_v29, %s11426_s0 }
0x19f3   :  { %6973 = vrot.lane.b32.xlu0 %v13106_v47, %s11426_s0  ;;  %6975 = vrot.lane.b32.xlu1 %v13108_v9, %s11426_s0 }
0x19f7   :  { %6981 = vrot.lane.b32.xlu0 %v12980_v50, %s11426_s0  ;;  %6983 = vrot.lane.b32.xlu1 %v13110_v56, %s11426_s0 }
0x1a56   :  { %v8700_v63 = vpop.xlane.xlu0 %8699 }
0x1a57   :  { %v8720_v12 = vsub.f32 %v8688_v36, %v8700_v63  ;;  %v8703_v15 = vpop.xlane.xlu1 %8702 }
0x1a58   :  { %v8721_v29 = vsub.f32 %v8689_v18, %v8703_v15 }
0x1a59   :  { %v8729_v32 = vmul.f32 1.442695, %v8720_v12 }
0x1a5a   :  { %v8697_v27 = vpop.xlane.xlu0 %8696  ;;  %v8731_v9 = vmul.f32 1.442695, %v8721_v29 }
0x1a5b   :  { %11373 = vpow2.f32 %v8729_v32  ;;  %v8719_v38 = vsub.f32 %v8687_v39, %v8697_v27 }
0x1a5d   :  { %v8727_v54 = vmul.f32 1.442695, %v8719_v38 }
0x1a5e   :  { %v8706_v7 = vpop.xlane.xlu0 %8705 }
0x1a5f   :  { %11375 = vpow2.f32 %v8727_v54  ;;  %v8722_v47 = vsub.f32 %v8690_v46, %v8706_v7  ;;  %v8709_v8 = vpop.xlane.xlu1 %8708 }
0x1a60   :  { %v8723_v52 = vsub.f32 %v8691_v17, %v8709_v8 }
0x1a61   :  { %v8733_v49 = vmul.f32 1.442695, %v8722_v47 }
0x1a62   :  { %v8715_v50 = vpop.xlane.xlu0 %8714  ;;  %v8735_v40 = vmul.f32 1.442695, %v8723_v52 }
0x1a63   :  { %11377 = vpow2.f32 %v8733_v49  ;;  %v8725_v5 = vsub.f32 %v8693_v19, %v8715_v50  ;;  %v8712_v56 = vpop.xlane.xlu1 %8711 }
0x1a64   :  { %v8724_v48 = vsub.f32 %v8692_v55, %v8712_v56  ;;  %11379 = vpow2.f32 %v8731_v9 }
0x1a65   :  { %v13456_v57 = vpop.eup %11373  ;;  %v8739_v30 = vmul.f32 1.442695, %v8725_v5 }
0x1a66   :  { %v8718_v36 = vpop.xlane.xlu0 %8717  ;;  %v8746_v18 = vsel %vm2766_vm14, %v13456_v57, 0.0  ;;  %v8737_v21 = vmul.f32 1.442695, %v8724_v48 }
0x1a67   :  { %11381 = vpow2.f32 %v8739_v30  ;;  %v8726_v39 = vsub.f32 %v8694_v23, %v8718_v36  ;;  %8747 = vadd.xlane.f32.xlu1 %v8746_v18  ;;  %v6958_v16 = vpop.permute.xlu1 %6957 }
0x1a68   :  { %11383 = vpow2.f32 %v8735_v40 }
0x1a69   :  { %v13460_v42 = vpop.eup %11375  ;;  %v8741_v43 = vmul.f32 1.442695, %v8726_v39  ;;  %11385 = vpow2.f32 %v8737_v21 }
0x1a6a   :  { %v6960_v46 = vpop.permute.xlu0 %6959  ;;  %v8743_v3 = vsel %vm2766_vm14, %v13460_v42, 0.0 }
0x1a6b   :  { %8744 = vadd.xlane.f32.xlu1 %v8743_v3  ;;  %v6966_v37 = vpop.permute.xlu1 %6965  ;;  %11387 = vpow2.f32 %v8741_v43 }
0x1a6d   :  { %v13464_v31 = vpop.eup %11377 }
0x1a6e   :  { %v6974_v45 = vpop.permute.xlu0 %6973  ;;  %v8752_v22 = vsel %vm2766_vm14, %v13464_v31, 0.0  ;;  %v13468_v25 = vpop.eup %11379 }
0x1a6f   :  { %8753 = vadd.xlane.f32.xlu0 %v8752_v22  ;;  %v6968_v44 = vpop.permute.xlu1 %6967  ;;  %v7137_v51 = vcombine.low %v6958_v16, %v6974_v45  ;;  %v7138_v19 = vcombine.high %v6958_v16, %v6974_v45  ;;  %v8749_v55 = vsel %vm2766_vm14, %v13468_v25, 0.0 }
0x1a71   :  { %v13470_v17 = vpop.eup %11381  ;;  %v7145_v32 = vrot.slane %v7137_v51, %v11763_v1  ;;  %v7152_v15 = vrot.slane %v7138_v19, %v11763_v1 }
0x1a72   :  { %v6982_v24 = vpop.permute.xlu0 %6981  ;;  %v8761_v4 = vsel %vm2766_vm14, %v13470_v17, 0.0  ;;  %v13476_v23 = vpop.eup %11383 }
0x1a73   :  { %v7153_v34 = vcombine.low %v6966_v37, %v6982_v24  ;;  %v7154_v61 = vcombine.high %v6966_v37, %v6982_v24  ;;  %8750 = vadd.xlane.f32.xlu0 %v8749_v55  ;;  %8762 = vadd.xlane.f32.xlu1 %v8761_v4  ;;  %v6976_v14 = vpop.permute.xlu1 %6975  ;;  %v13478_v12 = vpop.eup %11385  ;;  %v8755_v54 = vsel %vm2766_vm14, %v13476_v23, 0.0  ;;  %v5667_v24 = vld [vmem:[%s13712_s3 + $0x10] sm:$0xf] }
0x1a74   :  { %v7205_v63 = vcombine.low %v6960_v46, %v6976_v14  ;;  %v7206_v29 = vcombine.high %v6960_v46, %v6976_v14  ;;  %v8758_v48 = vsel %vm2766_vm14, %v13478_v12, 0.0  ;;  %v5668_v55 = vld [vmem:[%s13712_s3 + $0x30] sm:$0xf] }
0x1a75   :  { %v7161_v27 = vrot.slane %v7153_v34, %v11763_v1  ;;  %v7168_v38 = vrot.slane %v7154_v61, %v11763_v1  ;;  %v13486_v7 = vpop.eup %11387 }
0x1a76   :  { %v7213_v50 = vrot.slane %v7205_v63, %v11763_v1  ;;  %v7220_v21 = vrot.slane %v7206_v29, %v11763_v1  ;;  %v8764_v43 = vsel %vm2766_vm14, %v13486_v7, 0.0 }
0x1a77   :  { %v7169_v47 = vcombine.low %v7145_v32, %v7161_v27  ;;  %v7170_v8 = vcombine.high %v7145_v32, %v7161_v27  ;;  %v7185_v9 = vcombine.low %v7152_v15, %v7168_v38  ;;  %v7186_v49 = vcombine.high %v7152_v15, %v7168_v38  ;;  %8756 = vadd.xlane.f32.xlu0 %v8755_v54  ;;  %v6984_v52 = vpop.permute.xlu1 %6983 }
0x1a78   :  { %v7221_v5 = vcombine.low %v6968_v44, %v6984_v52  ;;  %v7222_v56 = vcombine.high %v6968_v44, %v6984_v52  ;;  %v13514_v38 = vcombine.low %v5667_v24, %v5668_v55 }
0x1a79   :  { %v7177_v40 = vrot.slane %v7169_v47, %v11771_v10  ;;  %v7184_v30 = vrot.slane %v7170_v8, %v11771_v10  ;;  %v7193_v36 = vrot.slane %v7185_v9, %v11771_v10  ;;  %v7200_v18 = vrot.slane %v7186_v49, %v11771_v10 }
0x1a7a   :  { %v7229_v39 = vrot.slane %v7221_v5, %v11763_v1  ;;  %v7236_v16 = vrot.slane %v7222_v56, %v11763_v1 }
0x1a7b   :  { %v7409_v46 = vcombine.low %v7177_v40, %v7184_v30  ;;  %v10309_v3 = vcombine.high %v7177_v40, %v7184_v30  ;;  %v7425_v37 = vcombine.low %v7193_v36, %v7200_v18  ;;  %v10310_v45 = vcombine.high %v7193_v36, %v7200_v18  ;;  %8759 = vadd.xlane.f32.xlu0 %v8758_v48 }
0x1a7c   :  { %v7237_v22 = vcombine.low %v7213_v50, %v7229_v39  ;;  %v7238_v44 = vcombine.high %v7213_v50, %v7229_v39  ;;  %v7253_v51 = vcombine.low %v7220_v21, %v7236_v16  ;;  %v7254_v19 = vcombine.high %v7220_v21, %v7236_v16 }
0x1a7d   :  { %v7416_v4 = vrot.slane %v7409_v46, %v11763_v1  ;;  %v7424_v34 = vrot.slane %v10309_v3, %v11763_v1  ;;  %v7432_v61 = vrot.slane %v7425_v37, %v11763_v1  ;;  %v7440_v14 = vrot.slane %v10310_v45, %v11763_v1 }
0x1a7e   :  { %v7245_v63 = vrot.slane %v7237_v22, %v11771_v10  ;;  %v7252_v32 = vrot.slane %v7238_v44, %v11771_v10  ;;  %v7261_v15 = vrot.slane %v7253_v51, %v11771_v10  ;;  %v7268_v27 = vrot.slane %v7254_v19, %v11771_v10 }
0x1a7f   :  { %8765 = vadd.xlane.f32.xlu0 %v8764_v43  ;;  %v7441_v29 = vcombine.low %v7416_v4, %v7424_v34  ;;  %v7457_v54 = vcombine.low %v7432_v61, %v7440_v14  ;;  %v7442_v52 = vcombine.high %v7416_v4, %v7424_v34  ;;  %v7458_v50 = vcombine.high %v7432_v61, %v7440_v14 }
0x1a80   :  { %v7477_v47 = vcombine.low %v7245_v63, %v7252_v32  ;;  %v10311_v8 = vcombine.high %v7245_v63, %v7252_v32  ;;  %v7493_v9 = vcombine.low %v7261_v15, %v7268_v27  ;;  %v10312_v49 = vcombine.high %v7261_v15, %v7268_v27 }
0x1a81   :  { %v7449_v30 = vrot.slane %v7441_v29, %v11771_v10  ;;  %v7465_v36 = vrot.slane %v7457_v54, %v11771_v10  ;;  %v7456_v43 = vrot.slane %v7442_v52, %v11771_v10  ;;  %v7472_v46 = vrot.slane %v7458_v50, %v11771_v10 }
0x1a82   :  { %v7484_v5 = vrot.slane %v7477_v47, %v11763_v1  ;;  %v7492_v56 = vrot.slane %v10311_v8, %v11763_v1  ;;  %v7500_v48 = vrot.slane %v7493_v9, %v11763_v1  ;;  %v7508_v40 = vrot.slane %v10312_v49, %v11763_v1 }
0x1a83   :  { %v7473_v44 = vcombine.low %v7449_v30, %v7465_v36  ;;  %v7474_v19 = vcombine.high %v7449_v30, %v7465_v36  ;;  %v7475_v14 = vcombine.low %v7456_v43, %v7472_v46  ;;  %v7476_v63 = vcombine.high %v7456_v43, %v7472_v46 }
0x1a84   :  { %9727 = vrot.lane.b32.xlu1 %v13514_v38, %s11427_s29  ;;  %v7509_v18 = vcombine.low %v7484_v5, %v7492_v56  ;;  %v7525_v21 = vcombine.low %v7500_v48, %v7508_v40  ;;  %v7510_v39 = vcombine.high %v7484_v5, %v7492_v56  ;;  %v7526_v16 = vcombine.high %v7500_v48, %v7508_v40 }
0x1a86   :  { %v7517_v3 = vrot.slane %v7509_v18, %v11771_v10  ;;  %v7533_v37 = vrot.slane %v7525_v21, %v11771_v10  ;;  %v7524_v45 = vrot.slane %v7510_v39, %v11771_v10  ;;  %v7540_v22 = vrot.slane %v7526_v16, %v11771_v10 }
0x1a88   :  { %11145 = vrot.lane.b32.xlu1 %v13426_v53, %s11434_s12  ;;  %v7541_v51 = vcombine.low %v7517_v3, %v7533_v37  ;;  %v7542_v24 = vcombine.high %v7517_v3, %v7533_v37  ;;  %v7543_v55 = vcombine.low %v7524_v45, %v7540_v22  ;;  %v7544_v4 = vcombine.high %v7524_v45, %v7540_v22 }
0x1a8a   :  { %v11073_v34 = vpack.c.bf16 %v7541_v51, %v7473_v44  ;;  %v11077_v61 = vpack.c.bf16 %v7542_v24, %v7474_v19  ;;  %v11081_v32 = vpack.c.bf16 %v7543_v55, %v7475_v14  ;;  %v11085_v15 = vpack.c.bf16 %v7544_v4, %v7476_v63 }
0x1a8c   :  { %11150 = vrot.lane.b32.xlu1 %v13428_v20, %s11435_s13  ;;  %11074 = vmatprep.subr.bf16.mxu0 %v11073_v34 }
0x1a8d   :  { %11078 = vmatprep.subr.bf16.mxu1 %v11077_v61  ;;  %11076 = vmatpush3.bf16.msra.mxu0 %v11073_v34 }
0x1a8e   :  { %11080 = vmatpush3.bf16.msra.mxu1 %v11077_v61  ;;  %11082 = vmatprep.subr.bf16.mxu0 %v11081_v32 }
0x1a8f   :  { %11086 = vmatprep.subr.bf16.mxu1 %v11085_v15 }
0x1a95   :  { %11140 = vrot.lane.b32.xlu0 %v13430_v13, %s11436_s14 }
0x1af4   :  { %v8748_v53 = vpop.xlane.xlu1 %8747 }
0x1af5   :  { %11389 = vrcp.f32 %v8748_v53 }
0x1af8   :  { %v8745_v27 = vpop.xlane.xlu1 %8744 }
0x1af9   :  { %11391 = vrcp.f32 %v8745_v27 }
0x1afc   :  { %v8754_v29 = vpop.xlane.xlu0 %8753 }
0x1afd   :  { %11393 = vrcp.f32 %v8754_v29 }
0x1aff   :  { %v11390_v20 = vpop.eup %11389 }
0x1b00   :  { %v8751_v54 = vpop.xlane.xlu0 %8750  ;;  %v8763_v47 = vpop.xlane.xlu1 %8762  ;;  %v8770_v50 = vmul.f32 %v11390_v20, %v13456_v57 }
0x1b01   :  { %11395 = vrcp.f32 %v8751_v54 }
0x1b02   :  { %11397 = vrcp.f32 %v8763_v47 }
0x1b03   :  { %v11392_v8 = vpop.eup %11391 }
0x1b04   :  { %v8757_v9 = vpop.xlane.xlu0 %8756  ;;  %v9728_v49 = vpop.permute.xlu1 %9727  ;;  %v8768_v52 = vmul.f32 %v11392_v8, %v13460_v42 }
0x1b05   :  { %11399 = vrcp.f32 %v8757_v9 }
0x1b06   :  { %10877 = vmatprep.mubr.msk.f32.mxu0 %vm2766_vm14, %v8768_v52 }
0x1b07   :  { %10878 = vmatmul.mubr.msk.f32.vlgmr.msra.gmra.mrb[56].mxu0 %vm2766_vm14, %v8770_v50  ;;  %v11394_v5 = vpop.eup %11393 }
0x1b08   :  { %11084 = vmatpush3.bf16.msra.mxu0 %v11081_v32  ;;  %v8760_v13 = vpop.xlane.xlu0 %8759  ;;  %v11146_v56 = vpop.permute.xlu1 %11145  ;;  %v8774_v42 = vmul.f32 %v11394_v5, %v13464_v31 }
0x1b09   :  { %11401 = vrcp.f32 %v8760_v13  ;;  %10901 = vmatprep.subr.bf16.mxu0 %v9728_v49  ;;  %v11147_v3 = vunpack.i.l.bf16 %v11146_v56 }
0x1b0b   :  { %v11396_v48 = vpop.eup %11395 }
0x1b0c   :  { %v11398_v40 = vpop.eup %11397  ;;  %v8766_v30 = vpop.xlane.xlu0 %8765  ;;  %v8772_v36 = vmul.f32 %v11396_v48, %v13468_v25  ;;  %v11148_v25 = vunpack.i.h.bf16 %v11146_v56 }
0x1b0d   :  { %11403 = vrcp.f32 %v8766_v30  ;;  %v8780_v57 = vmul.f32 %v11398_v40, %v13470_v17  ;;  %v11151_v21 = vpop.permute.xlu1 %11150 }
0x1b0e   :  { %10884 = vmatprep.mubr.msk.f32.mxu1 %vm2766_vm14, %v8772_v36  ;;  %v11153_v37 = vunpack.i.h.bf16 %v11151_v21  ;;  %v11152_v45 = vunpack.i.l.bf16 %v11151_v21 }
0x1b0f   :  { %v11400_v18 = vpop.eup %11399  ;;  %10885 = vmatmul.mubr.msk.f32.vlgmr.msra.gmra.mrb[60].mxu1 %vm2766_vm14, %v8774_v42 }
0x1b10   :  { %11088 = vmatpush3.bf16.msra.mxu1 %v11085_v15  ;;  %v11141_v39 = vpop.permute.xlu0 %11140  ;;  %10898 = vmatprep.mubr.msk.f32.mxu1 %vm2766_vm14, %v8780_v57  ;;  %v8776_v16 = vmul.f32 %v11400_v18, %v13476_v23 }
0x1b11   :  { %v11143_v43 = vunpack.i.h.bf16 %v11141_v39  ;;  %v11142_v46 = vunpack.i.l.bf16 %v11141_v39 }
0x1b12   :  { %10891 = vmatprep.mubr.msk.f32.mxu0 %vm2766_vm14, %v8776_v16 }
0x1b13   :  { %v11402_v31 = vpop.eup %11401  ;;  %v9700_v17 = vsel %vm2396_vm12, %v9511_v28, %v11143_v43  ;;  %v9699_v22 = vsel %vm2396_vm12, %v9443_v62, %v11142_v46 }
0x1b14   :  { %v8778_v23 = vmul.f32 %v11402_v31, %v13478_v12  ;;  %v9703_v44 = vsel %vm2766_vm14, %v9699_v22, %v11147_v3  ;;  %v9704_v51 = vsel %vm2766_vm14, %v9700_v17, %v11148_v25 }
0x1b15   :  { %v9707_v19 = vsel %vm4560_vm15, %v9703_v44, %v11152_v45  ;;  %v9708_v24 = vsel %vm4560_vm15, %v9704_v51, %v11153_v37 }
0x1b16   :  { %10892 = vmatmul.mubr.msk.f32.vlgmr.msra.gmra.mrb[58].mxu0 %vm2766_vm14, %v8778_v23  ;;  %v9711_v33 = vpack.c.bf16 %v9708_v24, %v9707_v19 }
0x1b17   :  { %v11404_v58 = vpop.eup %11403  ;;  %10902 = vmatpush3.bf16.msra.mxu0 %v9728_v49 }
0x1b18   :  { %v8782_v28 = vmul.f32 %v11404_v58, %v13486_v7  ;;  %10905 = vmatprep.mubr.msk.bf16.mxu0 %vm88_vm0, %v9711_v33 }
0x1b1a   :  { %10899 = vmatmul.mubr.msk.f32.vlgmr.msra.gmra.mrb[62].mxu1 %vm2766_vm14, %v8782_v28 }
0x1bda   :  { %v10879_v41 = vpop.f32.mrb[56].mxu0 }
0x1bdb   :  { %v8855_v6 = vpop.f32.mrb[57].mxu0 }
0x1be2   :  { %v10886_v62 = vpop.f32.mrb[60].mxu1 }
0x1be3   :  { %v8936_v12 = vpop.f32.mrb[61].mxu1 }
0x1be9   :  { %v10893_v55 = vpop.f32.mrb[58].mxu0 }
0x1bea   :  { %v9311_v4 = vcombine.low %v10879_v41, %v10893_v55  ;;  %v9312_v34 = vcombine.high %v10879_v41, %v10893_v55  ;;  %v9017_v61 = vpop.f32.mrb[59].mxu0 }
0x1beb   :  { %v9243_v14 = vcombine.low %v8855_v6, %v9017_v61  ;;  %v9244_v63 = vcombine.high %v8855_v6, %v9017_v61 }
0x1bec   :  { %v9319_v54 = vrot.slane %v9311_v4, %v11763_v1  ;;  %v9326_v47 = vrot.slane %v9312_v34, %v11763_v1 }
0x1bed   :  { %v10900_v32 = vpop.f32.mrb[62].mxu1  ;;  %v9251_v9 = vrot.slane %v9243_v14, %v11763_v1  ;;  %v9258_v49 = vrot.slane %v9244_v63, %v11763_v1 }
0x1bee   :  { %v9327_v15 = vcombine.low %v10886_v62, %v10900_v32  ;;  %v9328_v53 = vcombine.high %v10886_v62, %v10900_v32  ;;  %v9098_v27 = vpop.f32.mrb[63].mxu1 }
0x1bef   :  { %v9259_v29 = vcombine.low %v8936_v12, %v9098_v27  ;;  %v9260_v7 = vcombine.high %v8936_v12, %v9098_v27 }
0x1bf0   :  { %v9335_v20 = vrot.slane %v9327_v15, %v11763_v1  ;;  %v9342_v8 = vrot.slane %v9328_v53, %v11763_v1 }
0x1bf1   :  { %v9267_v52 = vrot.slane %v9259_v29, %v11763_v1  ;;  %v9274_v50 = vrot.slane %v9260_v7, %v11763_v1 }
0x1bf2   :  { %v9343_v13 = vcombine.low %v9319_v54, %v9335_v20  ;;  %v9344_v5 = vcombine.high %v9319_v54, %v9335_v20  ;;  %v9359_v56 = vcombine.low %v9326_v47, %v9342_v8  ;;  %v9360_v48 = vcombine.high %v9326_v47, %v9342_v8 }
0x1bf3   :  { %v9275_v40 = vcombine.low %v9251_v9, %v9267_v52  ;;  %v9276_v30 = vcombine.high %v9251_v9, %v9267_v52  ;;  %v9291_v36 = vcombine.low %v9258_v49, %v9274_v50  ;;  %v9292_v42 = vcombine.high %v9258_v49, %v9274_v50 }
0x1bf4   :  { %v9351_v57 = vrot.slane %v9343_v13, %v11771_v10  ;;  %v9358_v18 = vrot.slane %v9344_v5, %v11771_v10  ;;  %v9367_v21 = vrot.slane %v9359_v56, %v11771_v10  ;;  %v9374_v39 = vrot.slane %v9360_v48, %v11771_v10  ;;  %v5669_v5 = vld [vmem:[%s13712_s3 + $0x50] sm:$0xf] }
0x1bf5   :  { %v9283_v16 = vrot.slane %v9275_v40, %v11771_v10  ;;  %v9290_v43 = vrot.slane %v9276_v30, %v11771_v10  ;;  %v9299_v46 = vrot.slane %v9291_v36, %v11771_v10  ;;  %v9306_v25 = vrot.slane %v9292_v42, %v11771_v10  ;;  %v5670_v56 = vld [vmem:[%s13712_s3 + $0x70] sm:$0xf] }
0x1bf6   :  { %v9583_v3 = vcombine.low %v9351_v57, %v9358_v18  ;;  %v10369_v31 = vcombine.high %v9351_v57, %v9358_v18  ;;  %v9599_v37 = vcombine.low %v9367_v21, %v9374_v39  ;;  %v10370_v45 = vcombine.high %v9367_v21, %v9374_v39 }
0x1bf7   :  { %v9515_v17 = vcombine.low %v9283_v16, %v9290_v43  ;;  %v10367_v22 = vcombine.high %v9283_v16, %v9290_v43  ;;  %v9531_v23 = vcombine.low %v9299_v46, %v9306_v25  ;;  %v10368_v44 = vcombine.high %v9299_v46, %v9306_v25 }
0x1bf8   :  { %v9590_v51 = vrot.slane %v9583_v3, %v11763_v1  ;;  %v9598_v19 = vrot.slane %v10369_v31, %v11763_v1  ;;  %v9606_v24 = vrot.slane %v9599_v37, %v11763_v1  ;;  %v9614_v33 = vrot.slane %v10370_v45, %v11763_v1 }
0x1bf9   :  { %v9522_v58 = vrot.slane %v9515_v17, %v11763_v1  ;;  %v9530_v28 = vrot.slane %v10367_v22, %v11763_v1  ;;  %v9538_v41 = vrot.slane %v9531_v23, %v11763_v1  ;;  %v9546_v6 = vrot.slane %v10368_v44, %v11763_v1  ;;  %v10371_v44 = vld [vmem:[%s13714_s6 + $0x9] ss:$0 sm:$0xff] }
0x1bfa   :  { %v9616_v62 = vcombine.high %v9590_v51, %v9598_v19  ;;  %v9632_v12 = vcombine.high %v9606_v24, %v9614_v33  ;;  %v9615_v55 = vcombine.low %v9590_v51, %v9598_v19  ;;  %v9631_v4 = vcombine.low %v9606_v24, %v9614_v33 }
0x1bfb   :  { %v9548_v34 = vcombine.high %v9522_v58, %v9530_v28  ;;  %v9564_v61 = vcombine.high %v9538_v41, %v9546_v6  ;;  %v9547_v14 = vcombine.low %v9522_v58, %v9530_v28  ;;  %v9563_v63 = vcombine.low %v9538_v41, %v9546_v6 }
0x1bfc   :  { %v9630_v32 = vrot.slane %v9616_v62, %v11771_v10  ;;  %v9646_v15 = vrot.slane %v9632_v12, %v11771_v10  ;;  %v9623_v53 = vrot.slane %v9615_v55, %v11771_v10  ;;  %v9639_v27 = vrot.slane %v9631_v4, %v11771_v10 }
0x1bfd   :  { %v9562_v29 = vrot.slane %v9548_v34, %v11771_v10  ;;  %v9578_v1 = vrot.slane %v9564_v61, %v11771_v10  ;;  %v9555_v7 = vrot.slane %v9547_v14, %v11771_v10  ;;  %v9571_v54 = vrot.slane %v9563_v63, %v11771_v10 }
0x1bfe   :  { %v9649_v47 = vcombine.low %v9630_v32, %v9646_v15  ;;  %v9648_v20 = vcombine.high %v9623_v53, %v9639_v27  ;;  %v9650_v8 = vcombine.high %v9630_v32, %v9646_v15  ;;  %v9647_v9 = vcombine.low %v9623_v53, %v9639_v27 }
0x1bff   :  { %v9581_v49 = vcombine.low %v9562_v29, %v9578_v1  ;;  %v9580_v52 = vcombine.high %v9555_v7, %v9571_v54  ;;  %v9582_v50 = vcombine.high %v9562_v29, %v9578_v1  ;;  %v9579_v13 = vcombine.low %v9555_v7, %v9571_v54 }
0x1c00   :  { %v13605_v10 = vcombine.low %v5669_v5, %v5670_v56  ;;  %v11189_v5 = vld [vmem:[%s13717_s4] sm:$0xff]  }
0x1c01   :  { %v11159_v48 = vpack.i.bf16 %v9649_v47, %v9581_v49  ;;  %v11154_v40 = vpack.i.bf16 %v9648_v20, %v9580_v52  ;;  %v11164_v30 = vpack.i.bf16 %v9650_v8, %v9582_v50  ;;  %v5680_v56 = vld [vmem:[%s13715_s7 + $0x1] sm:$0x5] }
0x1c03   :  { %11160 = vrot.lane.b32.xlu0 %v11159_v48, %s11434_s12  ;;  %11155 = vrot.lane.b32.xlu1 %v11154_v40, %s11436_s14  ;;  %v9866_v48 = vrot.slane %v5680_v56, %v12500_v2  ;;  %v11190_v40 = vld [vmem:[%s13717_s4 + $0x8] sm:$0xff]  }
0x1c07   :  { %11165 = vrot.lane.b32.xlu1 %v11164_v30, %s11435_s13  ;;  %9729 = vrot.lane.b32.xlu0 %v13605_v10, %s11427_s29  ;;  %v9876_v30 = vrot.slane %v9866_v48, %v12500_v2 }
0x1c75   :  { %v11161_v36 = vpop.permute.xlu0 %11160  ;;  %v11156_v42 = vpop.permute.xlu1 %11155 }
0x1c76   :  { %v11158_v57 = vunpack.i.h.bf16 %v11156_v42  ;;  %v11157_v18 = vunpack.i.l.bf16 %v11156_v42  ;;  %v11163_v21 = vunpack.i.h.bf16 %v11161_v36  ;;  %v11162_v39 = vunpack.i.l.bf16 %v11161_v36 }
0x1c78   :  { %v9702_v16 = vsel %vm2396_vm12, %v9647_v9, %v11158_v57  ;;  %v9701_v43 = vsel %vm2396_vm12, %v9579_v13, %v11157_v18 }
0x1c79   :  { %v11166_v46 = vpop.permute.xlu1 %11165  ;;  %v9730_v25 = vpop.permute.xlu0 %9729  ;;  %v9705_v37 = vsel %vm2766_vm14, %v9701_v43, %v11162_v39  ;;  %v9706_v45 = vsel %vm2766_vm14, %v9702_v16, %v11163_v21 }
0x1c7a   :  { %v11168_v3 = vunpack.i.h.bf16 %v11166_v46  ;;  %v11167_v31 = vunpack.i.l.bf16 %v11166_v46  ;;  %10903 = vmatprep.subr.bf16.mxu0 %v9730_v25 }
0x1c7b   :  { %10904 = vmatpush3.bf16.msra.mxu0 %v9730_v25 }
0x1c7c   :  { %v9709_v17 = vsel %vm4560_vm15, %v9705_v37, %v11167_v31  ;;  %v9710_v22 = vsel %vm4560_vm15, %v9706_v45, %v11168_v3 }
0x1c7d   :  { %v9712_v23 = vpack.c.bf16 %v9710_v22, %v9709_v17 }
0x1c7f   :  { %10906 = vmatmul.mubr.msk.bf16.vlgmr.msra.gmra.mrb[60].mxu0 %vm88_vm0, %v9712_v23  ;;  %v10376_v23 = vld [vmem:[%s13714_s6 + $0xa] ss:$0 sm:$0xff] }
0x1d52   :  { %v10907_v51 = vpop.f32.mrb[60].mxu0 }
0x1d53   :  { %v9773_v19 = vpop.f32.mrb[61].mxu0  ;;  %v9782_v24 = vadd.f32 %v10907_v51, %v10371_v44 }
0x1d54   :  { %v9774_v33 = vadd.f32 %v10371_v44, %v9773_v19  ;;  %v10908_v58 = vpop.f32.mrb[62].mxu0 }
0x1d55   :  { %v9776_v28 = vpop.f32.mrb[63].mxu0  ;;  %v9790_v62 = vadd.f32 %v9782_v24, %v12844_v60  ;;  %v9785_v12 = vadd.f32 %v10908_v58, %v10371_v44 }
0x1d56   :  { %v9788_v41 = vadd.f32 %v9774_v33, %v12809_v35  ;;  %v9777_v6 = vadd.f32 %v10371_v44, %v9776_v28 }
0x1d57   :  { %v9791_v61 = vadd.f32 %v9785_v12, %v12856_v26  ;;  %v9798_v14 = vsel %vm88_vm0, %v9790_v62, 0.0 }
0x1d58   :  { %v9789_v55 = vadd.f32 %v9777_v6, %v12816_v0  ;;  %v9792_v4 = vsel %vm88_vm0, %v9788_v41, 0.0  ;;  %v10377_v6 = vld [vmem:[%s13714_s6 + $0xb] ss:$0 sm:$0xff] }
0x1d59   :  { %9793 = vadd.xlane.f32.xlu0 %v9792_v4  ;;  %v9801_v63 = vsel %vm88_vm0, %v9791_v61, 0.0 }
0x1d5a   :  { %v9795_v34 = vsel %vm88_vm0, %v9789_v55, 0.0 }
0x1d5b   :  { %9796 = vadd.xlane.f32.xlu1 %v9795_v34 }
0x1d5d   :  { %9799 = vadd.xlane.f32.xlu0 %v9798_v14 }
0x1d61   :  { %9802 = vadd.xlane.f32.xlu0 %v9801_v63 }
0x1de6   :  { %v9794_v35 = vpop.xlane.xlu0 %9793 }
0x1de7   :  { %v9804_v60 = vmul.f32 0.03125, %v9794_v35 }
0x1de8   :  { %v9797_v32 = vpop.xlane.xlu1 %9796 }
0x1de9   :  { %v9805_v15 = vmul.f32 0.03125, %v9797_v32  ;;  %v13628_v29 = vsub.f32 %v9788_v41, %v9804_v60 }
0x1dea   :  { %v9800_v53 = vpop.xlane.xlu0 %9799 }
0x1deb   :  { %v9809_v0 = vsub.f32 %v9789_v55, %v9805_v15  ;;  %v9806_v27 = vmul.f32 0.03125, %v9800_v53  ;;  %v9812_v49 = vmul.f32 %v13628_v29, %v13628_v29 }
0x1ded   :  { %v9810_v1 = vsub.f32 %v9790_v62, %v9806_v27  ;;  %v9813_v7 = vmul.f32 %v9809_v0, %v9809_v0  ;;  %v9816_v50 = vsel %vm88_vm0, %v9812_v49, 0.0 }
0x1dee   :  { %v9803_v54 = vpop.xlane.xlu0 %9802 }
0x1def   :  { %v9807_v47 = vmul.f32 0.03125, %v9803_v54  ;;  %v9819_v26 = vsel %vm88_vm0, %v9813_v7, 0.0  ;;  %v9814_v20 = vmul.f32 %v9810_v1, %v9810_v1 }
0x1df0   :  { %9820 = vadd.xlane.f32.xlu0 %v9819_v26 }
0x1df1   :  { %v9811_v8 = vsub.f32 %v9791_v61, %v9807_v47  ;;  %v9822_v9 = vsel %vm88_vm0, %v9814_v20, 0.0 }
0x1df2   :  { %9823 = vadd.xlane.f32.xlu1 %v9822_v9 }
0x1df3   :  { %v9815_v52 = vmul.f32 %v9811_v8, %v9811_v8 }
0x1df5   :  { %v9825_v13 = vsel %vm88_vm0, %v9815_v52, 0.0 }
0x1df6   :  { %9817 = vadd.xlane.f32.xlu1 %v9816_v50  ;;  %9826 = vadd.xlane.f32.xlu0 %v9825_v13 }
0x1e07   :  { %9881 = vrot.lane.b32.xlu1 %v13514_v38, %s11426_s0  ;;  %v9870_v38 = vrot.slane %v5680_v56, %v4713_v11 }
0x1e09   :  { %v9880_v36 = vrot.slane %v9870_v38, %v12500_v2 }
0x1e0b   :  { %9980 = vrot.lane.b32.xlu1 %v11189_v5, %s11427_s29  ;;  %v10380_v5 = vld [vmem:[%s13714_s6 + $0xc] ss:$0 sm:$0xff] }
0x1e0c   :  { %9883 = vrot.lane.b32.xlu0 %v13605_v10, %s11426_s0  ;;  %v11191_v10 = vld [vmem:[%s13717_s4 + $0x10] sm:$0xff]  }
0x1e0f   :  { %9982 = vrot.lane.b32.xlu1 %v11190_v40, %s11427_s29 }
0x1e10   :  { %9889 = vrot.lane.b32.xlu0 %v9876_v30, %s11428_s30 }
0x1e13   :  { %9891 = vrot.lane.b32.xlu1 %v9880_v36, %s11428_s30 }
0x1e14   :  { %9984 = vrot.lane.b32.xlu0 %v11191_v10, %s11427_s29 }
0x1e17   :  { %9986 = vrot.lane.b32.xlu1 %v11192_v59, %s11427_s29 }
0x1e7d   :  { %v9821_v11 = vpop.xlane.xlu0 %9820 }
0x1e7e   :  { %v9829_v42 = vmul.f32 0.03125, %v9821_v11 }
0x1e7f   :  { %v9824_v57 = vpop.xlane.xlu1 %9823 }
0x1e80   :  { %v9833_v18 = vadd.f32 1e-05, %v9829_v42  ;;  %v9830_v21 = vmul.f32 0.03125, %v9824_v57 }
0x1e82   :  { %11405 = vrsqrt.f32 %v9833_v18  ;;  %v9834_v39 = vadd.f32 1e-05, %v9830_v21 }
0x1e83   :  { %v9818_v16 = vpop.xlane.xlu1 %9817  ;;  %v9827_v43 = vpop.xlane.xlu0 %9826 }
0x1e84   :  { %11407 = vrsqrt.f32 %v9834_v39  ;;  %v9828_v2 = vmul.f32 0.03125, %v9818_v16  ;;  %v9831_v46 = vmul.f32 0.03125, %v9827_v43 }
0x1e86   :  { %v9832_v25 = vadd.f32 1e-05, %v9828_v2  ;;  %v9835_v3 = vadd.f32 1e-05, %v9831_v46 }
0x1e87   :  { %v9882_v31 = vpop.permute.xlu1 %9881  ;;  %v9884_v37 = vpop.permute.xlu0 %9883 }
0x1e88   :  { %11409 = vrsqrt.f32 %v9832_v25  ;;  %10909 = vmatprep.subr.bf16.mxu1 %v9882_v31 }
0x1e89   :  { %11411 = vrsqrt.f32 %v9835_v3  ;;  %10910 = vmatpush3.bf16.msra.mxu1 %v9882_v31 }
0x1e8a   :  { %10911 = vmatprep.subr.bf16.mxu1 %v9884_v37 }
0x1e8b   :  { %v9981_v51 = vpop.permute.xlu1 %9980  ;;  %v9890_v32 = vpop.permute.xlu0 %9889 }
0x1e8c   :  { %v11406_v45 = vpop.eup %11405  ;;  %10917 = vmatprep.subr.bf16.mxu0 %v9981_v51 }
0x1e8d   :  { %10912 = vmatpush3.bf16.msra.mxu1 %v9884_v37  ;;  %v9841_v22 = vmul.f32 %v11406_v45, %v9809_v0  ;;  %10918 = vmatpush3.bf16.msra.mxu0 %v9981_v51 }
0x1e8e   :  { %v11408_v17 = vpop.eup %11407 }
0x1e8f   :  { %v9842_v44 = vmul.f32 %v11408_v17, %v9810_v1  ;;  %v9849_v58 = vmul.f32 %v10376_v23, %v9841_v22  ;;  %v9983_v62 = vpop.permute.xlu1 %9982  ;;  %v9985_v15 = vpop.permute.xlu0 %9984 }
0x1e90   :  { %10919 = vmatprep.subr.bf16.mxu0 %v9983_v62 }
0x1e91   :  { %v9850_v28 = vmul.f32 %v10376_v23, %v9842_v44  ;;  %10920 = vmatpush3.bf16.msra.mxu0 %v9983_v62  ;;  %v9857_v34 = vadd.f32 %v10377_v6, %v9849_v58 }
0x1e92   :  { %v11410_v19 = vpop.eup %11409  ;;  %10921 = vmatprep.subr.bf16.mxu0 %v9985_v15 }
0x1e93   :  { %v11412_v24 = vpop.eup %11411  ;;  %v9840_v33 = vmul.f32 %v11410_v19, %v13628_v29  ;;  %v9858_v61 = vadd.f32 %v10377_v6, %v9850_v28  ;;  %v9892_v60 = vpop.permute.xlu1 %9891 }
0x1e94   :  { %v9843_v41 = vmul.f32 %v11412_v24, %v9811_v8  ;;  %v9893_v0 = vsel %vm88_vm0, %v9890_v32, %v9892_v60 }
0x1e95   :  { %v9848_v12 = vmul.f32 %v10376_v23, %v9840_v33  ;;  %10922 = vmatpush3.bf16.msra.mxu0 %v9985_v15 }
0x1e96   :  { %v9851_v55 = vmul.f32 %v10376_v23, %v9843_v41 }
0x1e97   :  { %v9856_v4 = vadd.f32 %v10377_v6, %v9848_v12  ;;  %v9987_v53 = vpop.permute.xlu1 %9986 }
0x1e98   :  { %v9859_v14 = vadd.f32 %v10377_v6, %v9851_v55  ;;  %10923 = vmatprep.subr.bf16.mxu0 %v9987_v53 }
0x1e99   :  { %v9860_v63 = vpack.c.bf16 %v9857_v34, %v9856_v4  ;;  %10924 = vmatpush3.bf16.msra.mxu0 %v9987_v53 }
0x1e9a   :  { %v9861_v35 = vpack.c.bf16 %v9859_v14, %v9858_v61 }
0x1e9b   :  { %10913 = vmatprep.mubr.msk.bf16.mxu1 %vm88_vm0, %v9860_v63 }
0x1e9c   :  { %10914 = vmatmul.mubr.msk.bf16.vlgmr.msra.gmra.mrb[64].mxu1 %vm88_vm0, %v9861_v35 }
0x1f6f   :  { %v10915_v27 = vpop.f32.mrb[64].mxu1 }
0x1f70   :  { %v9944_v29 = vadd.f32 %v10915_v27, %v9893_v0  ;;  %v9935_v1 = vpop.f32.mrb[65].mxu1  ;;  %v10387_v27 = vld [vmem:[%s13714_s6 + $0xd] ss:$0 sm:$0xff] }
0x1f71   :  { %v9936_v7 = vadd.f32 %v9935_v1, %v9893_v0  ;;  %v10916_v54 = vpop.f32.mrb[66].mxu1 }
0x1f72   :  { %v9947_v47 = vadd.f32 %v10916_v54, %v9893_v0  ;;  %v9938_v26 = vpop.f32.mrb[67].mxu1  ;;  %v9952_v8 = vmax.f32 %v9944_v29, 0.0 }
0x1f73   :  { %v9939_v20 = vadd.f32 %v9938_v26, %v9893_v0  ;;  %v9950_v49 = vmax.f32 %v9936_v7, 0.0  ;;  %v10388_v7 = vld [vmem:[%s13714_s6 + $0xe] ss:$0 sm:$0xff] }
0x1f74   :  { %v9953_v9 = vmax.f32 %v9947_v47, 0.0 }
0x1f75   :  { %v9951_v52 = vmax.f32 %v9939_v20, 0.0 }
0x1f76   :  { %v9955_v50 = vpack.c.bf16 %v9953_v9, %v9952_v8 }
0x1f77   :  { %v9954_v13 = vpack.c.bf16 %v9951_v52, %v9950_v49 }
0x1f79   :  { %10925 = vmatprep.mubr.msk.bf16.mxu0 %vm4834_vm1, %v9954_v13 }
0x1f7a   :  { %10926 = vmatmul.mubr.msk.bf16.vlgmr.msra.gmra.mrb[64].mxu0 %vm4834_vm1, %v9955_v50 }
0x204d   :  { %v10927_v56 = vpop.f32.mrb[64].mxu0 }
0x204e   :  { %v10032_v48 = vpop.f32.mrb[65].mxu0  ;;  %v10041_v40 = vadd.f32 %v10927_v56, %v10380_v5 }
0x204f   :  { %v10033_v38 = vadd.f32 %v10380_v5, %v10032_v48  ;;  %v10928_v30 = vpop.f32.mrb[66].mxu0 }
0x2050   :  { %v10035_v10 = vpop.f32.mrb[67].mxu0  ;;  %v10049_v11 = vadd.f32 %v10041_v40, %v9858_v61  ;;  %v10044_v42 = vadd.f32 %v10928_v30, %v10380_v5 }
0x2051   :  { %v10047_v36 = vadd.f32 %v10033_v38, %v9856_v4  ;;  %v10036_v59 = vadd.f32 %v10380_v5, %v10035_v10 }
0x2052   :  { %v10050_v39 = vadd.f32 %v10044_v42, %v9859_v14  ;;  %v10057_v16 = vsel %vm88_vm0, %v10049_v11, 0.0 }
0x2053   :  { %v10048_v57 = vadd.f32 %v10036_v59, %v9857_v34  ;;  %v10051_v18 = vsel %vm88_vm0, %v10047_v36, 0.0 }
0x2054   :  { %10052 = vadd.xlane.f32.xlu0 %v10051_v18  ;;  %v10060_v43 = vsel %vm88_vm0, %v10050_v39, 0.0 }
0x2055   :  { %v10054_v21 = vsel %vm88_vm0, %v10048_v57, 0.0 }
0x2056   :  { %10055 = vadd.xlane.f32.xlu1 %v10054_v21 }
0x2058   :  { %10058 = vadd.xlane.f32.xlu0 %v10057_v16 }
0x205c   :  { %10061 = vadd.xlane.f32.xlu0 %v10060_v43 }
0x20e1   :  { %v10053_v2 = vpop.xlane.xlu0 %10052 }
0x20e2   :  { %v10063_v46 = vmul.f32 0.03125, %v10053_v2 }
0x20e3   :  { %v10056_v25 = vpop.xlane.xlu1 %10055 }
0x20e4   :  { %v10067_v3 = vsub.f32 %v10047_v36, %v10063_v46  ;;  %v10064_v31 = vmul.f32 0.03125, %v10056_v25 }
0x20e5   :  { %v10059_v37 = vpop.xlane.xlu0 %10058 }
0x20e6   :  { %v10068_v45 = vsub.f32 %v10048_v57, %v10064_v31  ;;  %v10065_v17 = vmul.f32 0.03125, %v10059_v37  ;;  %v10071_v22 = vmul.f32 %v10067_v3, %v10067_v3 }
0x20e8   :  { %v10069_v23 = vsub.f32 %v10049_v11, %v10065_v17  ;;  %v10075_v44 = vsel %vm88_vm0, %v10071_v22, 0.0  ;;  %v10072_v51 = vmul.f32 %v10068_v45, %v10068_v45 }
0x20e9   :  { %10076 = vadd.xlane.f32.xlu1 %v10075_v44  ;;  %v10062_v19 = vpop.xlane.xlu0 %10061 }
0x20ea   :  { %v10066_v24 = vmul.f32 0.03125, %v10062_v19  ;;  %v10078_v33 = vsel %vm88_vm0, %v10072_v51, 0.0  ;;  %v10073_v58 = vmul.f32 %v10069_v23, %v10069_v23 }
0x20eb   :  { %10079 = vadd.xlane.f32.xlu0 %v10078_v33 }
0x20ec   :  { %v10070_v28 = vsub.f32 %v10050_v39, %v10066_v24  ;;  %v10081_v41 = vsel %vm88_vm0, %v10073_v58, 0.0 }
0x20ed   :  { %10082 = vadd.xlane.f32.xlu1 %v10081_v41 }
0x20ee   :  { %v10074_v6 = vmul.f32 %v10070_v28, %v10070_v28 }
0x20f0   :  { %v10084_v62 = vsel %vm88_vm0, %v10074_v6, 0.0 }
0x20f1   :  { %10085 = vadd.xlane.f32.xlu0 %v10084_v62 }
0x2176   :  { %v10077_v12 = vpop.xlane.xlu1 %10076 }
0x2177   :  { %v10087_v55 = vmul.f32 0.03125, %v10077_v12 }
0x2178   :  { %v10080_v4 = vpop.xlane.xlu0 %10079 }
0x2179   :  { %v10091_v34 = vadd.f32 1e-05, %v10087_v55  ;;  %v10088_v61 = vmul.f32 0.03125, %v10080_v4 }
0x217a   :  { %v10083_v14 = vpop.xlane.xlu1 %10082 }
0x217b   :  { %11413 = vrsqrt.f32 %v10091_v34  ;;  %v10092_v63 = vadd.f32 1e-05, %v10088_v61  ;;  %v10089_v35 = vmul.f32 0.03125, %v10083_v14 }
0x217d   :  { %11415 = vrsqrt.f32 %v10092_v63  ;;  %v10093_v32 = vadd.f32 1e-05, %v10089_v35 }
0x217e   :  { %v10086_v60 = vpop.xlane.xlu0 %10085 }
0x217f   :  { %11417 = vrsqrt.f32 %v10093_v32  ;;  %v10090_v15 = vmul.f32 0.03125, %v10086_v60 }
0x2181   :  { %v10094_v53 = vadd.f32 1e-05, %v10090_v15 }
0x2183   :  { %11419 = vrsqrt.f32 %v10094_v53 }
0x2185   :  { %v11414_v0 = vpop.eup %11413 }
0x2186   :  { %v10099_v29 = vmul.f32 %v11414_v0, %v10067_v3 }
0x2187   :  { %v11416_v1 = vpop.eup %11415 }
0x2188   :  { %v10107_v54 = vmul.f32 %v10387_v27, %v10099_v29  ;;  %v10100_v47 = vmul.f32 %v11416_v1, %v10068_v45 }
0x2189   :  { %v11418_v26 = vpop.eup %11417 }
0x218a   :  { %v10115_v20 = vadd.f32 %v10388_v7, %v10107_v54  ;;  %v10108_v8 = vmul.f32 %v10387_v27, %v10100_v47  ;;  %v10101_v9 = vmul.f32 %v11418_v26, %v10069_v23 }
0x218c   :  { %10393 = vst.msk [vmem:[%s13719_s8 + $0x40] sm:$0xff] %vm88_vm0, %v10115_v20  ;;  %v10116_v49 = vadd.f32 %v10388_v7, %v10108_v8  ;;  %v10109_v52 = vmul.f32 %v10387_v27, %v10101_v9 }
0x218d   :  { %v11420_v50 = vpop.eup %11419 }
0x218e   :  { %10394 = vst.msk [vmem:[%s13719_s8 + $0x48] sm:$0xff] %vm88_vm0, %v10116_v49  ;;  %v10117_v13 = vadd.f32 %v10388_v7, %v10109_v52  ;;  %v10102_v5 = vmul.f32 %v11420_v50, %v10070_v28 }
0x2190   :  { %10395 = vst.msk [vmem:[%s13719_s8 + $0x50] sm:$0xff] %vm88_vm0, %v10117_v13  ;;  %v10110_v56 = vmul.f32 %v10387_v27, %v10102_v5 }
0x2192   :  { %v10118_v48 = vadd.f32 %v10388_v7, %v10110_v56 }
0x2194   :  { %10396 = vst.msk [vmem:[%s13719_s8 + $0x58] sm:$0xff] %vm88_vm0, %v10118_v48 }

</bundles_post_ra>
